<compile_context>
chip_gen: v7x
topology: tpu7x:2x2x1
jax: 0.10.0
libtpu: 0.0.40
codegen_flags: <defaults>
</compile_context>

<pallas_src>
import functools

import numpy as np
import jax
import jax.numpy as jnp
from jax.experimental import pallas as pl
from jax.experimental.pallas import tpu as pltpu


_BN_EPS = 1e-5


def _vmem_limit_bytes():
    """~3/4 of physical VMEM per core (v5e/v6e: 96 MiB, v7x: 48 MiB)."""
    try:
        info = pltpu.get_tpu_info()
        cap = int(getattr(info, "vmem_capacity_bytes", 128 * 1024 * 1024))
        return min(max((cap * 3) // 4, 32 * 1024 * 1024), 100 * 1024 * 1024)
    except Exception:  # not on TPU / older API — fall back to a safe value
        return 64 * 1024 * 1024


# ----------------------------------------------------------------------------
# Host-side constant operator matrices (built ONCE in init_encoder_params).
# ----------------------------------------------------------------------------
def _adaptive_pool_matrix(out_size, in_size):
    """Row p averages input rows [floor(p*I/O), ceil((p+1)*I/O)) — PyTorch AdaptiveAvgPool."""
    A = np.zeros((out_size, in_size), dtype=np.float32)
    for p in range(out_size):
        start = (p * in_size) // out_size
        end = -(-((p + 1) * in_size) // out_size)  # ceil
        A[p, start:end] = 1.0 / (end - start)
    return A


def _bilinear_matrix(out_size, in_size):
    """F.interpolate(mode='bilinear', align_corners=False) as a (out, in) matrix."""
    U = np.zeros((out_size, in_size), dtype=np.float32)
    if in_size == 1:
        U[:, 0] = 1.0
        return U
    scale = in_size / out_size
    for i in range(out_size):
        src = max((i + 0.5) * scale - 0.5, 0.0)
        i0 = min(int(np.floor(src)), in_size - 1)
        i1 = min(i0 + 1, in_size - 1)
        l1 = src - i0
        U[i, i0] += 1.0 - l1
        U[i, i1] += l1
    return U


# ----------------------------------------------------------------------------
# Fully-fused Encoder kernel (one grid step per image):
#   PSP:  pooled = P_cat @ x            (SBB, Cin)
#         z      = relu(pooled @ W_cat + b) * blockdiag_mask
#         psp    = U_cat @ z            (HW, 4*cout)    -- stays in VMEM
#   Conv3x3 (pad=1, BN folded, ReLU), concat-free over channels:
#         for each tap (dy,dx): t = x @ wx[dy,dx] + psp @ wp[dy,dx]
#         shift t in flattened (HW) space via pltpu.roll, zero the padded
#         border via a precomputed 0/1 mask, accumulate in f32.
# ----------------------------------------------------------------------------
def _encoder_fused_kernel(x_ref, p_ref, u_ref, w1_ref, b1_ref, zm_ref,
                          wx_ref, wp_ref, tm_ref, shift_ref, o_ref, *, H, W):
    HW = H * W
    x = x_ref[0]                                                           # (HW, Cin) bf16

    # ---- PSP pyramid (all bins fused) ----
    pooled = jnp.dot(p_ref[...], x, preferred_element_type=jnp.float32)    # adaptive avg pool
    z = jnp.dot(pooled.astype(jnp.bfloat16), w1_ref[...],
                preferred_element_type=jnp.float32)                        # 1x1 conv (BN folded)
    z = jnp.maximum(z + b1_ref[...], 0.0) * zm_ref[...]                    # ReLU + block-diag mask
    psp = jnp.dot(u_ref[...], z.astype(jnp.bfloat16),
                  preferred_element_type=jnp.float32).astype(jnp.bfloat16) # bilinear up, (HW, 4cout)

    # ---- Bottleneck Conv3x3(pad=1) + BN(folded) + ReLU ----
    cout = o_ref.shape[-1]
    acc = jnp.zeros((HW, cout), jnp.float32)
    for dy in range(3):
        for dx in range(3):
            t = (jnp.dot(x, wx_ref[dy, dx], preferred_element_type=jnp.float32)
                 + jnp.dot(psp, wp_ref[dy, dx], preferred_element_type=jnp.float32))
            d = (dy - 1) * W + (dx - 1)          # flat source offset of this tap
            if d == 0:
                acc = acc + t                    # centre tap: no shift, no border
            else:
                t = pltpu.roll(t, (-d) % HW, axis=0)    # XLU sublane rotate (~free)
                acc = acc + t * tm_ref[dy * 3 + dx]     # zero out padded-border taps
    o_ref[0] = jnp.maximum(acc + shift_ref[...], 0.0).astype(o_ref.dtype)


def encoder_fused(x_flat, params):
    n, hw, cin = x_flat.shape
    h, w = params["hw"]
    P, U = params["P_cat"], params["U_cat"]
    W1, b1, zmask = params["W_cat"], params["b_cat"], params["z_mask"]
    wx, wp = params["w_x"], params["w_p"]
    tmask, shift = params["tap_mask"], params["shift"]
    sbb = P.shape[0]
    c4 = W1.shape[1]
    cout = wx.shape[-1]

    flops = n * (2 * sbb * hw * cin + 2 * sbb * cin * c4 + 2 * hw * sbb * c4
                 + 18 * hw * (cin + c4) * cout)
    bytes_accessed = (x_flat.size * 2 + n * hw * cout * 2
                      + 2 * (P.size + U.size + W1.size + wx.size + wp.size)
                      + 4 * (b1.size + zmask.size + tmask.size + shift.size))

    kern = functools.partial(_encoder_fused_kernel, H=h, W=w)
    return pl.pallas_call(
        kern,
        out_shape=jax.ShapeDtypeStruct((n, hw, cout), jnp.bfloat16),
        grid=(n,),
        in_specs=[
            pl.BlockSpec((1, hw, cin), lambda i: (i, 0, 0)),          # x (per image)
            pl.BlockSpec((sbb, hw), lambda i: (0, 0)),                # pool operator (resident)
            pl.BlockSpec((hw, sbb), lambda i: (0, 0)),                # upsample operator (resident)
            pl.BlockSpec((cin, c4), lambda i: (0, 0)),                # 1x1 conv weights (resident)
            pl.BlockSpec((1, c4), lambda i: (0, 0)),                  # folded BN bias
            pl.BlockSpec((sbb, c4), lambda i: (0, 0)),                # block-diag stage mask
            pl.BlockSpec((3, 3, cin, cout), lambda i: (0, 0, 0, 0)),  # 3x3 weights, x part (resident)
            pl.BlockSpec((3, 3, c4, cout), lambda i: (0, 0, 0, 0)),   # 3x3 weights, psp part (resident)
            pl.BlockSpec((9, hw, cout), lambda i: (0, 0, 0)),         # tap border masks (resident)
            pl.BlockSpec((1, cout), lambda i: (0, 0)),                # folded BN shift
        ],
        out_specs=pl.BlockSpec((1, hw, cout), lambda i: (i, 0, 0)),
        compiler_params=pltpu.CompilerParams(
            dimension_semantics=("parallel",),
            vmem_limit_bytes=_vmem_limit_bytes()),
        cost_estimate=pl.CostEstimate(
            flops=int(flops), transcendentals=0, bytes_accessed=int(bytes_accessed)),
    )(x_flat, P, U, W1, b1, zmask, wx, wp, tmask, shift)


# ----------------------------------------------------------------------------
# Parameters (deterministic synthetic init; BN folded; operator matrices cached)
# ----------------------------------------------------------------------------
def _fold_bn(key, cout):
    k1, k2, k3, k4 = jax.random.split(key, 4)
    gamma = 1.0 + 0.1 * jax.random.normal(k1, (cout,), jnp.float32)
    beta = 0.1 * jax.random.normal(k2, (cout,), jnp.float32)
    rmean = 0.05 * jax.random.normal(k3, (cout,), jnp.float32)
    rvar = 1.0 + 0.1 * jax.random.uniform(k4, (cout,), jnp.float32)
    scale = gamma / jnp.sqrt(rvar + _BN_EPS)
    shift = beta - rmean * scale
    return scale, shift


def init_encoder_params(key, in_channels_psp, bins, h, w):
    cin = in_channels_psp
    cout = cin // len(bins)
    c4 = cout * len(bins)

    # Pool / upsample operator matrices (stacked) + block-diagonal stage mask.
    P_blocks, U_blocks = [], []
    for b in bins:
        P_blocks.append(np.kron(_adaptive_pool_matrix(b, h), _adaptive_pool_matrix(b, w)))
        U_blocks.append(np.kron(_bilinear_matrix(h, b), _bilinear_matrix(w, b)))
    P_cat = np.concatenate(P_blocks, axis=0)            # (SBB, HW)
    U_cat = np.concatenate(U_blocks, axis=1)            # (HW, SBB)
    sbb = P_cat.shape[0]
    z_mask = np.zeros((sbb, c4), np.float32)
    r = 0
    for s, b in enumerate(bins):
        z_mask[r:r + b * b, s * cout:(s + 1) * cout] = 1.0
        r += b * b

    # Per-stage 1x1 conv weights with BN scale folded, concatenated over out-channels.
    W_cols, b_cols = [], []
    for _ in bins:
        key, kw, kbn = jax.random.split(key, 3)
        wstage = 0.05 * jax.random.normal(kw, (cin, cout), jnp.float32)
        scale, shift = _fold_bn(kbn, cout)
        W_cols.append(wstage * scale[None, :])
        b_cols.append(shift)
    W_cat = jnp.concatenate(W_cols, axis=1)
    b_cat = jnp.concatenate(b_cols)[None, :]

    # Bottleneck 3x3 conv, BN scale folded into the weights, split into x / psp parts
    # (the conv is linear in channels -> no concat tensor ever materialized).
    ctot = cin + c4
    key, kw, kbn = jax.random.split(key, 3)
    w33 = 0.05 * jax.random.normal(kw, (3, 3, ctot, cout), jnp.float32)
    scale, shift = _fold_bn(kbn, cout)
    w33 = w33 * scale[None, None, None, :]

    # 0/1 border masks for the 9 conv taps, defined at the *destination* pixel in
    # flattened (HW) space (tap (dy,dx) contributes in[y+dy-1, x+dx-1] to out[y,x]).
    tap_mask = np.zeros((9, h, w, cout), np.float32)
    for dy in range(3):
        for dx in range(3):
            sy, sx = dy - 1, dx - 1
            ys = slice(max(0, -sy), h - max(0, sy))
            xs = slice(max(0, -sx), w - max(0, sx))
            tap_mask[dy * 3 + dx, ys, xs, :] = 1.0
    tap_mask = tap_mask.reshape(9, h * w, cout)

    return {
        "hw": (h, w),
        "bins": tuple(bins),
        "P_cat": jnp.asarray(P_cat, jnp.bfloat16),
        "U_cat": jnp.asarray(U_cat, jnp.bfloat16),
        "W_cat": W_cat.astype(jnp.bfloat16),
        "b_cat": b_cat.astype(jnp.float32),
        "z_mask": jnp.asarray(z_mask, jnp.float32),
        "w_x": w33[:, :, :cin, :].astype(jnp.bfloat16),
        "w_p": w33[:, :, cin:, :].astype(jnp.bfloat16),
        "tap_mask": jnp.asarray(tap_mask, jnp.float32),
        "shift": shift[None, :].astype(jnp.float32),
    }


# ----------------------------------------------------------------------------
# Encoder forward (PSP head).  External interface is NCHW (PyTorch convention).
# ----------------------------------------------------------------------------
def encoder_forward(features_nchw, params):
    n, cin, h, w = features_nchw.shape
    x_flat = jnp.transpose(features_nchw, (0, 2, 3, 1)).reshape(n, h * w, cin)
    x_flat = x_flat.astype(jnp.bfloat16)
    out = encoder_fused(x_flat, params)                  # (n, HW, cout) bf16
    cout = out.shape[-1]
    return jnp.transpose(out.reshape(n, h, w, cout), (0, 3, 1, 2))


# Pure-JAX reference (same math / same bf16 rounding points, no Pallas).
def encoder_reference(features_nchw, params):
    f32 = lambda a: jnp.asarray(a, jnp.float32)
    n, cin, h, w = features_nchw.shape
    x = jnp.transpose(features_nchw, (0, 2, 3, 1)).reshape(n, h * w, cin).astype(jnp.bfloat16)

    P, U = f32(params["P_cat"]), f32(params["U_cat"])
    Wc, bc, M = f32(params["W_cat"]), params["b_cat"], params["z_mask"]
    pooled = jnp.einsum('ps,nsc->npc', P, f32(x))
    z = jnp.maximum(jnp.einsum('npc,cd->npd', f32(pooled.astype(jnp.bfloat16)), Wc) + bc, 0.0)
    z = (z * M).astype(jnp.bfloat16)
    psp = jnp.einsum('sp,npd->nsd', U, f32(z)).astype(jnp.bfloat16)   # (n, HW, 4*cout)

    xh = f32(x).reshape(n, h, w, cin)
    ph = f32(psp).reshape(n, h, w, -1)
    cat = jnp.concatenate([xh, ph], axis=-1)
    catp = jnp.pad(cat, ((0, 0), (1, 1), (1, 1), (0, 0)))
    w33 = jnp.concatenate([f32(params["w_x"]), f32(params["w_p"])], axis=2)
    cout = params["w_x"].shape[-1]
    acc = jnp.zeros((n, h, w, cout), jnp.float32)
    for dy in range(3):
        for dx in range(3):
            acc = acc + jnp.einsum('nijc,cd->nijd',
                                   catp[:, dy:dy + h, dx:dx + w, :], w33[dy, dx])
    y = jnp.maximum(acc + params["shift"][0], 0.0).astype(jnp.bfloat16)
    return jnp.transpose(y, (0, 3, 1, 2))


if __name__ == "__main__":
    # Scaled-down config: in_channels_psp=32 (real model: 512/2048), bins (1,2,3,6)
    # -> out_channels = 32 // 4 = 8.  Feature map 12x12 (divisible by all bins).
    # NOTE: at this scale all tiles are lane-padded (<128); tune at real scale.
    N, C_PSP, H, W = 2, 32, 12, 12
    BINS = (1, 2, 3, 6)
    key = jax.random.PRNGKey(0)
    kx, kp = jax.random.split(key)
    x = jax.random.normal(kx, (N, C_PSP, H, W), jnp.float32)
    params = init_encoder_params(kp, C_PSP, BINS, H, W)

    out = jax.block_until_ready(encoder_forward(x, params))
    assert out.shape == (N, C_PSP // len(BINS), H, W), out.shape

    ref = jax.block_until_ready(encoder_reference(x, params))
    np.testing.assert_allclose(np.asarray(out.astype(jnp.float32)),
                               np.asarray(ref.astype(jnp.float32)),
                               rtol=2e-2, atol=2e-2)

    print("KERNEL_OK")
</pallas_src>

<mosaic_0001>
module attributes {stable_mosaic.version = 11 : i64} {
  func.func @_encoder_fused_kernel(%arg0: i32, %arg1: memref<1x144x32xbf16, #tpu.memory_space<vmem>>, %arg2: memref<50x144xbf16, #tpu.memory_space<vmem>>, %arg3: memref<144x50xbf16, #tpu.memory_space<vmem>>, %arg4: memref<32x32xbf16, #tpu.memory_space<vmem>>, %arg5: memref<1x32xf32, #tpu.memory_space<vmem>>, %arg6: memref<50x32xf32, #tpu.memory_space<vmem>>, %arg7: memref<3x3x32x8xbf16, #tpu.memory_space<vmem>>, %arg8: memref<3x3x32x8xbf16, #tpu.memory_space<vmem>>, %arg9: memref<9x144x8xf32, #tpu.memory_space<vmem>>, %arg10: memref<1x8xf32, #tpu.memory_space<vmem>>, %arg11: memref<1x144x8xbf16, #tpu.memory_space<vmem>>) attributes {dimension_semantics = [#tpu.dimension_semantics<parallel>], iteration_bounds = array<i64: 2>, scalar_prefetch = 0 : i64, scratch_operands = 0 : i64, tpu.core_type = #tpu.core_type<tc>, window_params = [{transform_indices = @transform_0, window_bounds = array<i64: 1, 144, 32>}, {pipeline_mode = #tpu.pipeline_mode<synchronous>, transform_indices = @transform_1, window_bounds = array<i64: 50, 144>}, {pipeline_mode = #tpu.pipeline_mode<synchronous>, transform_indices = @transform_2, window_bounds = array<i64: 144, 50>}, {pipeline_mode = #tpu.pipeline_mode<synchronous>, transform_indices = @transform_3, window_bounds = array<i64: 32, 32>}, {pipeline_mode = #tpu.pipeline_mode<synchronous>, transform_indices = @transform_4, window_bounds = array<i64: 1, 32>}, {pipeline_mode = #tpu.pipeline_mode<synchronous>, transform_indices = @transform_5, window_bounds = array<i64: 50, 32>}, {pipeline_mode = #tpu.pipeline_mode<synchronous>, transform_indices = @transform_6, window_bounds = array<i64: 3, 3, 32, 8>}, {pipeline_mode = #tpu.pipeline_mode<synchronous>, transform_indices = @transform_7, window_bounds = array<i64: 3, 3, 32, 8>}, {pipeline_mode = #tpu.pipeline_mode<synchronous>, transform_indices = @transform_8, window_bounds = array<i64: 9, 144, 8>}, {pipeline_mode = #tpu.pipeline_mode<synchronous>, transform_indices = @transform_9, window_bounds = array<i64: 1, 8>}, {transform_indices = @transform_10, window_bounds = array<i64: 1, 144, 8>}]} {
    %c0 = arith.constant 0 : index
    %c0_0 = arith.constant 0 : index
    %c0_1 = arith.constant 0 : index
    %0 = vector.load %arg1[%c0, %c0_0, %c0_1] : memref<1x144x32xbf16, #tpu.memory_space<vmem>>, vector<1x144x32xbf16>
    %1 = vector.shape_cast %0 : vector<1x144x32xbf16> to vector<144x32xbf16>
    %c0_2 = arith.constant 0 : index
    %c0_3 = arith.constant 0 : index
    %2 = vector.load %arg2[%c0_2, %c0_3] : memref<50x144xbf16, #tpu.memory_space<vmem>>, vector<50x144xbf16>
    %cst = arith.constant dense<0.000000e+00> : vector<50x32xf32>
    %3 = tpu.matmul %2, %1, %cst {dimension_numbers = #tpu.dot_dimension_numbers<[1], [0], [0], [1], [0, 0, 1, 1], [], []>} : vector<50x144xbf16>, vector<144x32xbf16>, vector<50x32xf32> -> vector<50x32xf32>
    %4 = arith.truncf %3 : vector<50x32xf32> to vector<50x32xbf16>
    %c0_4 = arith.constant 0 : index
    %c0_5 = arith.constant 0 : index
    %5 = vector.load %arg4[%c0_4, %c0_5] : memref<32x32xbf16, #tpu.memory_space<vmem>>, vector<32x32xbf16>
    %cst_6 = arith.constant dense<0.000000e+00> : vector<50x32xf32>
    %6 = tpu.matmul %4, %5, %cst_6 {dimension_numbers = #tpu.dot_dimension_numbers<[1], [0], [0], [1], [0, 0, 1, 1], [], []>} : vector<50x32xbf16>, vector<32x32xbf16>, vector<50x32xf32> -> vector<50x32xf32>
    %c0_7 = arith.constant 0 : index
    %c0_8 = arith.constant 0 : index
    %7 = vector.load %arg5[%c0_7, %c0_8] : memref<1x32xf32, #tpu.memory_space<vmem>>, vector<1x32xf32>
    %8 = vector.broadcast %7 : vector<1x32xf32> to vector<50x32xf32>
    %9 = arith.addf %6, %8 : vector<50x32xf32>
    %cst_9 = arith.constant 0.000000e+00 : f32
    %10 = vector.broadcast %cst_9 : f32 to vector<50x32xf32>
    %11 = arith.maximumf %9, %10 : vector<50x32xf32>
    %c0_10 = arith.constant 0 : index
    %c0_11 = arith.constant 0 : index
    %12 = vector.load %arg6[%c0_10, %c0_11] : memref<50x32xf32, #tpu.memory_space<vmem>>, vector<50x32xf32>
    %13 = arith.mulf %11, %12 : vector<50x32xf32>
    %c0_12 = arith.constant 0 : index
    %c0_13 = arith.constant 0 : index
    %14 = vector.load %arg3[%c0_12, %c0_13] : memref<144x50xbf16, #tpu.memory_space<vmem>>, vector<144x50xbf16>
    %15 = arith.truncf %13 : vector<50x32xf32> to vector<50x32xbf16>
    %cst_14 = arith.constant dense<0.000000e+00> : vector<144x32xf32>
    %16 = tpu.matmul %14, %15, %cst_14 {dimension_numbers = #tpu.dot_dimension_numbers<[1], [0], [0], [1], [0, 0, 1, 1], [], []>} : vector<144x50xbf16>, vector<50x32xbf16>, vector<144x32xf32> -> vector<144x32xf32>
    %17 = arith.truncf %16 : vector<144x32xf32> to vector<144x32xbf16>
    %cst_15 = arith.constant 0.000000e+00 : f32
    %18 = vector.broadcast %cst_15 : f32 to vector<144x8xf32>
    %c0_16 = arith.constant 0 : index
    %c0_17 = arith.constant 0 : index
    %c0_18 = arith.constant 0 : index
    %c0_19 = arith.constant 0 : index
    %19 = vector.load %arg7[%c0_16, %c0_17, %c0_18, %c0_19] : memref<3x3x32x8xbf16, #tpu.memory_space<vmem>>, vector<1x1x32x8xbf16>
    %20 = vector.shape_cast %19 : vector<1x1x32x8xbf16> to vector<32x8xbf16>
    %cst_20 = arith.constant dense<0.000000e+00> : vector<144x8xf32>
    %21 = tpu.matmul %1, %20, %cst_20 {dimension_numbers = #tpu.dot_dimension_numbers<[1], [0], [0], [1], [0, 0, 1, 1], [], []>} : vector<144x32xbf16>, vector<32x8xbf16>, vector<144x8xf32> -> vector<144x8xf32>
    %c0_21 = arith.constant 0 : index
    %c0_22 = arith.constant 0 : index
    %c0_23 = arith.constant 0 : index
    %c0_24 = arith.constant 0 : index
    %22 = vector.load %arg8[%c0_21, %c0_22, %c0_23, %c0_24] : memref<3x3x32x8xbf16, #tpu.memory_space<vmem>>, vector<1x1x32x8xbf16>
    %23 = vector.shape_cast %22 : vector<1x1x32x8xbf16> to vector<32x8xbf16>
    %cst_25 = arith.constant dense<0.000000e+00> : vector<144x8xf32>
    %24 = tpu.matmul %17, %23, %cst_25 {dimension_numbers = #tpu.dot_dimension_numbers<[1], [0], [0], [1], [0, 0, 1, 1], [], []>} : vector<144x32xbf16>, vector<32x8xbf16>, vector<144x8xf32> -> vector<144x8xf32>
    %25 = arith.addf %21, %24 : vector<144x8xf32>
    %c13_i32 = arith.constant 13 : i32
    %26 = tpu.dynamic_rotate %25 by %c13_i32 dim 0 : vector<144x8xf32>, i32 -> vector<144x8xf32>
    %c0_26 = arith.constant 0 : index
    %c0_27 = arith.constant 0 : index
    %c0_28 = arith.constant 0 : index
    %27 = vector.load %arg9[%c0_26, %c0_27, %c0_28] : memref<9x144x8xf32, #tpu.memory_space<vmem>>, vector<1x144x8xf32>
    %28 = vector.shape_cast %27 : vector<1x144x8xf32> to vector<144x8xf32>
    %29 = arith.mulf %26, %28 : vector<144x8xf32>
    %30 = arith.addf %18, %29 : vector<144x8xf32>
    %c0_29 = arith.constant 0 : index
    %c1 = arith.constant 1 : index
    %c0_30 = arith.constant 0 : index
    %c0_31 = arith.constant 0 : index
    %31 = vector.load %arg7[%c0_29, %c1, %c0_30, %c0_31] : memref<3x3x32x8xbf16, #tpu.memory_space<vmem>>, vector<1x1x32x8xbf16>
    %32 = vector.shape_cast %31 : vector<1x1x32x8xbf16> to vector<32x8xbf16>
    %cst_32 = arith.constant dense<0.000000e+00> : vector<144x8xf32>
    %33 = tpu.matmul %1, %32, %cst_32 {dimension_numbers = #tpu.dot_dimension_numbers<[1], [0], [0], [1], [0, 0, 1, 1], [], []>} : vector<144x32xbf16>, vector<32x8xbf16>, vector<144x8xf32> -> vector<144x8xf32>
    %c0_33 = arith.constant 0 : index
    %c1_34 = arith.constant 1 : index
    %c0_35 = arith.constant 0 : index
    %c0_36 = arith.constant 0 : index
    %34 = vector.load %arg8[%c0_33, %c1_34, %c0_35, %c0_36] : memref<3x3x32x8xbf16, #tpu.memory_space<vmem>>, vector<1x1x32x8xbf16>
    %35 = vector.shape_cast %34 : vector<1x1x32x8xbf16> to vector<32x8xbf16>
    %cst_37 = arith.constant dense<0.000000e+00> : vector<144x8xf32>
    %36 = tpu.matmul %17, %35, %cst_37 {dimension_numbers = #tpu.dot_dimension_numbers<[1], [0], [0], [1], [0, 0, 1, 1], [], []>} : vector<144x32xbf16>, vector<32x8xbf16>, vector<144x8xf32> -> vector<144x8xf32>
    %37 = arith.addf %33, %36 : vector<144x8xf32>
    %c12_i32 = arith.constant 12 : i32
    %38 = tpu.dynamic_rotate %37 by %c12_i32 dim 0 : vector<144x8xf32>, i32 -> vector<144x8xf32>
    %c1_38 = arith.constant 1 : index
    %c0_39 = arith.constant 0 : index
    %c0_40 = arith.constant 0 : index
    %39 = vector.load %arg9[%c1_38, %c0_39, %c0_40] : memref<9x144x8xf32, #tpu.memory_space<vmem>>, vector<1x144x8xf32>
    %40 = vector.shape_cast %39 : vector<1x144x8xf32> to vector<144x8xf32>
    %41 = arith.mulf %38, %40 : vector<144x8xf32>
    %42 = arith.addf %30, %41 : vector<144x8xf32>
    %c0_41 = arith.constant 0 : index
    %c2 = arith.constant 2 : index
    %c0_42 = arith.constant 0 : index
    %c0_43 = arith.constant 0 : index
    %43 = vector.load %arg7[%c0_41, %c2, %c0_42, %c0_43] : memref<3x3x32x8xbf16, #tpu.memory_space<vmem>>, vector<1x1x32x8xbf16>
    %44 = vector.shape_cast %43 : vector<1x1x32x8xbf16> to vector<32x8xbf16>
    %cst_44 = arith.constant dense<0.000000e+00> : vector<144x8xf32>
    %45 = tpu.matmul %1, %44, %cst_44 {dimension_numbers = #tpu.dot_dimension_numbers<[1], [0], [0], [1], [0, 0, 1, 1], [], []>} : vector<144x32xbf16>, vector<32x8xbf16>, vector<144x8xf32> -> vector<144x8xf32>
    %c0_45 = arith.constant 0 : index
    %c2_46 = arith.constant 2 : index
    %c0_47 = arith.constant 0 : index
    %c0_48 = arith.constant 0 : index
    %46 = vector.load %arg8[%c0_45, %c2_46, %c0_47, %c0_48] : memref<3x3x32x8xbf16, #tpu.memory_space<vmem>>, vector<1x1x32x8xbf16>
    %47 = vector.shape_cast %46 : vector<1x1x32x8xbf16> to vector<32x8xbf16>
    %cst_49 = arith.constant dense<0.000000e+00> : vector<144x8xf32>
    %48 = tpu.matmul %17, %47, %cst_49 {dimension_numbers = #tpu.dot_dimension_numbers<[1], [0], [0], [1], [0, 0, 1, 1], [], []>} : vector<144x32xbf16>, vector<32x8xbf16>, vector<144x8xf32> -> vector<144x8xf32>
    %49 = arith.addf %45, %48 : vector<144x8xf32>
    %c11_i32 = arith.constant 11 : i32
    %50 = tpu.dynamic_rotate %49 by %c11_i32 dim 0 : vector<144x8xf32>, i32 -> vector<144x8xf32>
    %c2_50 = arith.constant 2 : index
    %c0_51 = arith.constant 0 : index
    %c0_52 = arith.constant 0 : index
    %51 = vector.load %arg9[%c2_50, %c0_51, %c0_52] : memref<9x144x8xf32, #tpu.memory_space<vmem>>, vector<1x144x8xf32>
    %52 = vector.shape_cast %51 : vector<1x144x8xf32> to vector<144x8xf32>
    %53 = arith.mulf %50, %52 : vector<144x8xf32>
    %54 = arith.addf %42, %53 : vector<144x8xf32>
    %c1_53 = arith.constant 1 : index
    %c0_54 = arith.constant 0 : index
    %c0_55 = arith.constant 0 : index
    %c0_56 = arith.constant 0 : index
    %55 = vector.load %arg7[%c1_53, %c0_54, %c0_55, %c0_56] : memref<3x3x32x8xbf16, #tpu.memory_space<vmem>>, vector<1x1x32x8xbf16>
    %56 = vector.shape_cast %55 : vector<1x1x32x8xbf16> to vector<32x8xbf16>
    %cst_57 = arith.constant dense<0.000000e+00> : vector<144x8xf32>
    %57 = tpu.matmul %1, %56, %cst_57 {dimension_numbers = #tpu.dot_dimension_numbers<[1], [0], [0], [1], [0, 0, 1, 1], [], []>} : vector<144x32xbf16>, vector<32x8xbf16>, vector<144x8xf32> -> vector<144x8xf32>
    %c1_58 = arith.constant 1 : index
    %c0_59 = arith.constant 0 : index
    %c0_60 = arith.constant 0 : index
    %c0_61 = arith.constant 0 : index
    %58 = vector.load %arg8[%c1_58, %c0_59, %c0_60, %c0_61] : memref<3x3x32x8xbf16, #tpu.memory_space<vmem>>, vector<1x1x32x8xbf16>
    %59 = vector.shape_cast %58 : vector<1x1x32x8xbf16> to vector<32x8xbf16>
    %cst_62 = arith.constant dense<0.000000e+00> : vector<144x8xf32>
    %60 = tpu.matmul %17, %59, %cst_62 {dimension_numbers = #tpu.dot_dimension_numbers<[1], [0], [0], [1], [0, 0, 1, 1], [], []>} : vector<144x32xbf16>, vector<32x8xbf16>, vector<144x8xf32> -> vector<144x8xf32>
    %61 = arith.addf %57, %60 : vector<144x8xf32>
    %c1_i32 = arith.constant 1 : i32
    %62 = tpu.dynamic_rotate %61 by %c1_i32 dim 0 : vector<144x8xf32>, i32 -> vector<144x8xf32>
    %c3 = arith.constant 3 : index
    %c0_63 = arith.constant 0 : index
    %c0_64 = arith.constant 0 : index
    %63 = vector.load %arg9[%c3, %c0_63, %c0_64] : memref<9x144x8xf32, #tpu.memory_space<vmem>>, vector<1x144x8xf32>
    %64 = vector.shape_cast %63 : vector<1x144x8xf32> to vector<144x8xf32>
    %65 = arith.mulf %62, %64 : vector<144x8xf32>
    %66 = arith.addf %54, %65 : vector<144x8xf32>
    %c1_65 = arith.constant 1 : index
    %c1_66 = arith.constant 1 : index
    %c0_67 = arith.constant 0 : index
    %c0_68 = arith.constant 0 : index
    %67 = vector.load %arg7[%c1_65, %c1_66, %c0_67, %c0_68] : memref<3x3x32x8xbf16, #tpu.memory_space<vmem>>, vector<1x1x32x8xbf16>
    %68 = vector.shape_cast %67 : vector<1x1x32x8xbf16> to vector<32x8xbf16>
    %cst_69 = arith.constant dense<0.000000e+00> : vector<144x8xf32>
    %69 = tpu.matmul %1, %68, %cst_69 {dimension_numbers = #tpu.dot_dimension_numbers<[1], [0], [0], [1], [0, 0, 1, 1], [], []>} : vector<144x32xbf16>, vector<32x8xbf16>, vector<144x8xf32> -> vector<144x8xf32>
    %c1_70 = arith.constant 1 : index
    %c1_71 = arith.constant 1 : index
    %c0_72 = arith.constant 0 : index
    %c0_73 = arith.constant 0 : index
    %70 = vector.load %arg8[%c1_70, %c1_71, %c0_72, %c0_73] : memref<3x3x32x8xbf16, #tpu.memory_space<vmem>>, vector<1x1x32x8xbf16>
    %71 = vector.shape_cast %70 : vector<1x1x32x8xbf16> to vector<32x8xbf16>
    %cst_74 = arith.constant dense<0.000000e+00> : vector<144x8xf32>
    %72 = tpu.matmul %17, %71, %cst_74 {dimension_numbers = #tpu.dot_dimension_numbers<[1], [0], [0], [1], [0, 0, 1, 1], [], []>} : vector<144x32xbf16>, vector<32x8xbf16>, vector<144x8xf32> -> vector<144x8xf32>
    %73 = arith.addf %69, %72 : vector<144x8xf32>
    %74 = arith.addf %66, %73 : vector<144x8xf32>
    %c1_75 = arith.constant 1 : index
    %c2_76 = arith.constant 2 : index
    %c0_77 = arith.constant 0 : index
    %c0_78 = arith.constant 0 : index
    %75 = vector.load %arg7[%c1_75, %c2_76, %c0_77, %c0_78] : memref<3x3x32x8xbf16, #tpu.memory_space<vmem>>, vector<1x1x32x8xbf16>
    %76 = vector.shape_cast %75 : vector<1x1x32x8xbf16> to vector<32x8xbf16>
    %cst_79 = arith.constant dense<0.000000e+00> : vector<144x8xf32>
    %77 = tpu.matmul %1, %76, %cst_79 {dimension_numbers = #tpu.dot_dimension_numbers<[1], [0], [0], [1], [0, 0, 1, 1], [], []>} : vector<144x32xbf16>, vector<32x8xbf16>, vector<144x8xf32> -> vector<144x8xf32>
    %c1_80 = arith.constant 1 : index
    %c2_81 = arith.constant 2 : index
    %c0_82 = arith.constant 0 : index
    %c0_83 = arith.constant 0 : index
    %78 = vector.load %arg8[%c1_80, %c2_81, %c0_82, %c0_83] : memref<3x3x32x8xbf16, #tpu.memory_space<vmem>>, vector<1x1x32x8xbf16>
    %79 = vector.shape_cast %78 : vector<1x1x32x8xbf16> to vector<32x8xbf16>
    %cst_84 = arith.constant dense<0.000000e+00> : vector<144x8xf32>
    %80 = tpu.matmul %17, %79, %cst_84 {dimension_numbers = #tpu.dot_dimension_numbers<[1], [0], [0], [1], [0, 0, 1, 1], [], []>} : vector<144x32xbf16>, vector<32x8xbf16>, vector<144x8xf32> -> vector<144x8xf32>
    %81 = arith.addf %77, %80 : vector<144x8xf32>
    %c143_i32 = arith.constant 143 : i32
    %82 = tpu.dynamic_rotate %81 by %c143_i32 dim 0 : vector<144x8xf32>, i32 -> vector<144x8xf32>
    %c5 = arith.constant 5 : index
    %c0_85 = arith.constant 0 : index
    %c0_86 = arith.constant 0 : index
    %83 = vector.load %arg9[%c5, %c0_85, %c0_86] : memref<9x144x8xf32, #tpu.memory_space<vmem>>, vector<1x144x8xf32>
    %84 = vector.shape_cast %83 : vector<1x144x8xf32> to vector<144x8xf32>
    %85 = arith.mulf %82, %84 : vector<144x8xf32>
    %86 = arith.addf %74, %85 : vector<144x8xf32>
    %c2_87 = arith.constant 2 : index
    %c0_88 = arith.constant 0 : index
    %c0_89 = arith.constant 0 : index
    %c0_90 = arith.constant 0 : index
    %87 = vector.load %arg7[%c2_87, %c0_88, %c0_89, %c0_90] : memref<3x3x32x8xbf16, #tpu.memory_space<vmem>>, vector<1x1x32x8xbf16>
    %88 = vector.shape_cast %87 : vector<1x1x32x8xbf16> to vector<32x8xbf16>
    %cst_91 = arith.constant dense<0.000000e+00> : vector<144x8xf32>
    %89 = tpu.matmul %1, %88, %cst_91 {dimension_numbers = #tpu.dot_dimension_numbers<[1], [0], [0], [1], [0, 0, 1, 1], [], []>} : vector<144x32xbf16>, vector<32x8xbf16>, vector<144x8xf32> -> vector<144x8xf32>
    %c2_92 = arith.constant 2 : index
    %c0_93 = arith.constant 0 : index
    %c0_94 = arith.constant 0 : index
    %c0_95 = arith.constant 0 : index
    %90 = vector.load %arg8[%c2_92, %c0_93, %c0_94, %c0_95] : memref<3x3x32x8xbf16, #tpu.memory_space<vmem>>, vector<1x1x32x8xbf16>
    %91 = vector.shape_cast %90 : vector<1x1x32x8xbf16> to vector<32x8xbf16>
    %cst_96 = arith.constant dense<0.000000e+00> : vector<144x8xf32>
    %92 = tpu.matmul %17, %91, %cst_96 {dimension_numbers = #tpu.dot_dimension_numbers<[1], [0], [0], [1], [0, 0, 1, 1], [], []>} : vector<144x32xbf16>, vector<32x8xbf16>, vector<144x8xf32> -> vector<144x8xf32>
    %93 = arith.addf %89, %92 : vector<144x8xf32>
    %c133_i32 = arith.constant 133 : i32
    %94 = tpu.dynamic_rotate %93 by %c133_i32 dim 0 : vector<144x8xf32>, i32 -> vector<144x8xf32>
    %c6 = arith.constant 6 : index
    %c0_97 = arith.constant 0 : index
    %c0_98 = arith.constant 0 : index
    %95 = vector.load %arg9[%c6, %c0_97, %c0_98] : memref<9x144x8xf32, #tpu.memory_space<vmem>>, vector<1x144x8xf32>
    %96 = vector.shape_cast %95 : vector<1x144x8xf32> to vector<144x8xf32>
    %97 = arith.mulf %94, %96 : vector<144x8xf32>
    %98 = arith.addf %86, %97 : vector<144x8xf32>
    %c2_99 = arith.constant 2 : index
    %c1_100 = arith.constant 1 : index
    %c0_101 = arith.constant 0 : index
    %c0_102 = arith.constant 0 : index
    %99 = vector.load %arg7[%c2_99, %c1_100, %c0_101, %c0_102] : memref<3x3x32x8xbf16, #tpu.memory_space<vmem>>, vector<1x1x32x8xbf16>
    %100 = vector.shape_cast %99 : vector<1x1x32x8xbf16> to vector<32x8xbf16>
    %cst_103 = arith.constant dense<0.000000e+00> : vector<144x8xf32>
    %101 = tpu.matmul %1, %100, %cst_103 {dimension_numbers = #tpu.dot_dimension_numbers<[1], [0], [0], [1], [0, 0, 1, 1], [], []>} : vector<144x32xbf16>, vector<32x8xbf16>, vector<144x8xf32> -> vector<144x8xf32>
    %c2_104 = arith.constant 2 : index
    %c1_105 = arith.constant 1 : index
    %c0_106 = arith.constant 0 : index
    %c0_107 = arith.constant 0 : index
    %102 = vector.load %arg8[%c2_104, %c1_105, %c0_106, %c0_107] : memref<3x3x32x8xbf16, #tpu.memory_space<vmem>>, vector<1x1x32x8xbf16>
    %103 = vector.shape_cast %102 : vector<1x1x32x8xbf16> to vector<32x8xbf16>
    %cst_108 = arith.constant dense<0.000000e+00> : vector<144x8xf32>
    %104 = tpu.matmul %17, %103, %cst_108 {dimension_numbers = #tpu.dot_dimension_numbers<[1], [0], [0], [1], [0, 0, 1, 1], [], []>} : vector<144x32xbf16>, vector<32x8xbf16>, vector<144x8xf32> -> vector<144x8xf32>
    %105 = arith.addf %101, %104 : vector<144x8xf32>
    %c132_i32 = arith.constant 132 : i32
    %106 = tpu.dynamic_rotate %105 by %c132_i32 dim 0 : vector<144x8xf32>, i32 -> vector<144x8xf32>
    %c7 = arith.constant 7 : index
    %c0_109 = arith.constant 0 : index
    %c0_110 = arith.constant 0 : index
    %107 = vector.load %arg9[%c7, %c0_109, %c0_110] : memref<9x144x8xf32, #tpu.memory_space<vmem>>, vector<1x144x8xf32>
    %108 = vector.shape_cast %107 : vector<1x144x8xf32> to vector<144x8xf32>
    %109 = arith.mulf %106, %108 : vector<144x8xf32>
    %110 = arith.addf %98, %109 : vector<144x8xf32>
    %c2_111 = arith.constant 2 : index
    %c2_112 = arith.constant 2 : index
    %c0_113 = arith.constant 0 : index
    %c0_114 = arith.constant 0 : index
    %111 = vector.load %arg7[%c2_111, %c2_112, %c0_113, %c0_114] : memref<3x3x32x8xbf16, #tpu.memory_space<vmem>>, vector<1x1x32x8xbf16>
    %112 = vector.shape_cast %111 : vector<1x1x32x8xbf16> to vector<32x8xbf16>
    %cst_115 = arith.constant dense<0.000000e+00> : vector<144x8xf32>
    %113 = tpu.matmul %1, %112, %cst_115 {dimension_numbers = #tpu.dot_dimension_numbers<[1], [0], [0], [1], [0, 0, 1, 1], [], []>} : vector<144x32xbf16>, vector<32x8xbf16>, vector<144x8xf32> -> vector<144x8xf32>
    %c2_116 = arith.constant 2 : index
    %c2_117 = arith.constant 2 : index
    %c0_118 = arith.constant 0 : index
    %c0_119 = arith.constant 0 : index
    %114 = vector.load %arg8[%c2_116, %c2_117, %c0_118, %c0_119] : memref<3x3x32x8xbf16, #tpu.memory_space<vmem>>, vector<1x1x32x8xbf16>
    %115 = vector.shape_cast %114 : vector<1x1x32x8xbf16> to vector<32x8xbf16>
    %cst_120 = arith.constant dense<0.000000e+00> : vector<144x8xf32>
    %116 = tpu.matmul %17, %115, %cst_120 {dimension_numbers = #tpu.dot_dimension_numbers<[1], [0], [0], [1], [0, 0, 1, 1], [], []>} : vector<144x32xbf16>, vector<32x8xbf16>, vector<144x8xf32> -> vector<144x8xf32>
    %117 = arith.addf %113, %116 : vector<144x8xf32>
    %c131_i32 = arith.constant 131 : i32
    %118 = tpu.dynamic_rotate %117 by %c131_i32 dim 0 : vector<144x8xf32>, i32 -> vector<144x8xf32>
    %c8 = arith.constant 8 : index
    %c0_121 = arith.constant 0 : index
    %c0_122 = arith.constant 0 : index
    %119 = vector.load %arg9[%c8, %c0_121, %c0_122] : memref<9x144x8xf32, #tpu.memory_space<vmem>>, vector<1x144x8xf32>
    %120 = vector.shape_cast %119 : vector<1x144x8xf32> to vector<144x8xf32>
    %121 = arith.mulf %118, %120 : vector<144x8xf32>
    %122 = arith.addf %110, %121 : vector<144x8xf32>
    %c0_123 = arith.constant 0 : index
    %c0_124 = arith.constant 0 : index
    %123 = vector.load %arg10[%c0_123, %c0_124] : memref<1x8xf32, #tpu.memory_space<vmem>>, vector<1x8xf32>
    %124 = vector.broadcast %123 : vector<1x8xf32> to vector<144x8xf32>
    %125 = arith.addf %122, %124 : vector<144x8xf32>
    %cst_125 = arith.constant 0.000000e+00 : f32
    %126 = vector.broadcast %cst_125 : f32 to vector<144x8xf32>
    %127 = arith.maximumf %125, %126 : vector<144x8xf32>
    %128 = arith.truncf %127 : vector<144x8xf32> to vector<144x8xbf16>
    %c0_126 = arith.constant 0 : index
    %c0_127 = arith.constant 0 : index
    %c0_128 = arith.constant 0 : index
    %129 = vector.load %arg11[%c0_126, %c0_127, %c0_128] : memref<1x144x8xbf16, #tpu.memory_space<vmem>>, vector<1x144x8xbf16>
    %130 = vector.shape_cast %129 : vector<1x144x8xbf16> to vector<144x8xbf16>
    %131 = vector.shape_cast %128 : vector<144x8xbf16> to vector<1x144x8xbf16>
    tpu.vector_store %arg11[%c0_126, %c0_127, %c0_128], %131 {strides = array<i32>} : memref<1x144x8xbf16, #tpu.memory_space<vmem>>, vector<1x144x8xbf16>,
    return
  }
  func.func @transform_0(%arg0: i32) -> (i32, i32, i32) {
    %c0_i32 = arith.constant 0 : i32
    %c0_i32_0 = arith.constant 0 : i32
    %c0_i32_1 = arith.constant 0 : i32
    return %arg0, %c0_i32, %c0_i32_0 : i32, i32, i32
  }
  func.func @transform_1(%arg0: i32) -> (i32, i32) {
    %c0_i32 = arith.constant 0 : i32
    %c0_i32_0 = arith.constant 0 : i32
    %c0_i32_1 = arith.constant 0 : i32
    return %c0_i32, %c0_i32_0 : i32, i32
  }
  func.func @transform_2(%arg0: i32) -> (i32, i32) {
    %c0_i32 = arith.constant 0 : i32
    %c0_i32_0 = arith.constant 0 : i32
    %c0_i32_1 = arith.constant 0 : i32
    return %c0_i32, %c0_i32_0 : i32, i32
  }
  func.func @transform_3(%arg0: i32) -> (i32, i32) {
    %c0_i32 = arith.constant 0 : i32
    %c0_i32_0 = arith.constant 0 : i32
    %c0_i32_1 = arith.constant 0 : i32
    return %c0_i32, %c0_i32_0 : i32, i32
  }
  func.func @transform_4(%arg0: i32) -> (i32, i32) {
    %c0_i32 = arith.constant 0 : i32
    %c0_i32_0 = arith.constant 0 : i32
    %c0_i32_1 = arith.constant 0 : i32
    return %c0_i32, %c0_i32_0 : i32, i32
  }
  func.func @transform_5(%arg0: i32) -> (i32, i32) {
    %c0_i32 = arith.constant 0 : i32
    %c0_i32_0 = arith.constant 0 : i32
    %c0_i32_1 = arith.constant 0 : i32
    return %c0_i32, %c0_i32_0 : i32, i32
  }
  func.func @transform_6(%arg0: i32) -> (i32, i32, i32, i32) {
    %c0_i32 = arith.constant 0 : i32
    %c0_i32_0 = arith.constant 0 : i32
    %c0_i32_1 = arith.constant 0 : i32
    %c0_i32_2 = arith.constant 0 : i32
    %c0_i32_3 = arith.constant 0 : i32
    return %c0_i32, %c0_i32_0, %c0_i32_1, %c0_i32_2 : i32, i32, i32, i32
  }
  func.func @transform_7(%arg0: i32) -> (i32, i32, i32, i32) {
    %c0_i32 = arith.constant 0 : i32
    %c0_i32_0 = arith.constant 0 : i32
    %c0_i32_1 = arith.constant 0 : i32
    %c0_i32_2 = arith.constant 0 : i32
    %c0_i32_3 = arith.constant 0 : i32
    return %c0_i32, %c0_i32_0, %c0_i32_1, %c0_i32_2 : i32, i32, i32, i32
  }
  func.func @transform_8(%arg0: i32) -> (i32, i32, i32) {
    %c0_i32 = arith.constant 0 : i32
    %c0_i32_0 = arith.constant 0 : i32
    %c0_i32_1 = arith.constant 0 : i32
    %c0_i32_2 = arith.constant 0 : i32
    return %c0_i32, %c0_i32_0, %c0_i32_1 : i32, i32, i32
  }
  func.func @transform_9(%arg0: i32) -> (i32, i32) {
    %c0_i32 = arith.constant 0 : i32
    %c0_i32_0 = arith.constant 0 : i32
    %c0_i32_1 = arith.constant 0 : i32
    return %c0_i32, %c0_i32_0 : i32, i32
  }
  func.func @transform_10(%arg0: i32) -> (i32, i32, i32) {
    %c0_i32 = arith.constant 0 : i32
    %c0_i32_0 = arith.constant 0 : i32
    %c0_i32_1 = arith.constant 0 : i32
    return %arg0, %c0_i32, %c0_i32_0 : i32, i32, i32
  }
}

</mosaic_0001>

<bundles_post_ra>
// kernel: tpu_custom_call.1
= control target key start
LH: loop header
LB: loop body
LE: loop exit
PB: predicated region body
PF: predicated region fallthrough
CT: control target
= control target key end

     0   :  { %s8433_s0 = inlined_call_operand.hbm [shape: bf16[2,144,32], index: 0, kind: input, shape index: {}]   ;;  %s8434_s1 = inlined_call_operand.hbm [shape: bf16[50,144], index: 1, kind: input, shape index: {}]   ;;  %s8435_s2 = inlined_call_operand.hbm [shape: bf16[144,50], index: 2, kind: input, shape index: {}]   ;;  %s8436_s3 = inlined_call_operand.hbm [shape: bf16[32,32], index: 3, kind: input, shape index: {}]   ;;  %s8437_s4 = inlined_call_operand.hbm [shape: f32[1,32], index: 4, kind: input, shape index: {}]   ;;  %s8438_s5 = inlined_call_operand.hbm [shape: f32[50,32], index: 5, kind: input, shape index: {}]   ;;  %s8439_s6 = inlined_call_operand.hbm [shape: bf16[3,3,32,8], index: 6, kind: input, shape index: {}]   ;;  %s8440_s7 = inlined_call_operand.hbm [shape: bf16[3,3,32,8], index: 7, kind: input, shape index: {}]   ;;  %s8441_s8 = inlined_call_operand.hbm [shape: f32[9,144,8], index: 8, kind: input, shape index: {}]   ;;  %s8442_s9 = inlined_call_operand.hbm [shape: f32[1,8], index: 9, kind: input, shape index: {}]   ;;  %s8443_s10 = inlined_call_operand.hbm [shape: bf16[2,144,8], index: 10, kind: output, shape index: {}]  }
   0x1   :  { %8456 = sst [smem:[#allocation28_spill]] %s8434_s1 }
   0x2   :  { %8457 = sst [smem:[#allocation29_spill]] %s8435_s2 }
   0x3   :  { %8458 = sst [smem:[#allocation30_spill]] %s8436_s3 }
   0x4   :  { %8459 = sst [smem:[#allocation31_spill]] %s8437_s4 }
   0x5   :  { %8460 = sst [smem:[#allocation32_spill]] %s8443_s10 }
   0x6   :  { %15 = vsyncpa [#allocation3], 0 }
   0x7   :  { %17 = vsyncpa [#allocation3 + $0x1], 0 }
   0x8   :  { %18 = vsyncpa [#allocation6], 0 }
   0x9   :  { %19 = vsyncpa [#allocation9], 0 }
   0xa   :  { %20 = vsyncpa [#allocation12], 0 }
   0xb   :  { %21 = vsyncpa [#allocation15], 0 }
   0xc   :  { %22 = vsyncpa [#allocation18], 0 }
   0xd   :  { %23 = vsyncpa [#allocation4], 0 }
   0xe   :  { %25 = vsyncpa [#allocation4 + $0x1], 0  ;;  %s6608_s13 = smov 0   ;;  %s6610_s14 = smov 0  }
   0xf   :  { %s6612_s15 = smov 0   ;;  %s6614_s16 = smov 0  }
  0x10 LB: > { %s6533_s17 = smov [#allocation5]   ;;  %s6629_s19 = sadd.s32 4294967295, %s6531_s16   ;;  %s6531_s16 = sphi %s6614_s16, %s8497_s16   ;;  %s6527_s15 = sphi %s6612_s15, %s8496_s15   ;;  %s6523_s14 = sphi %s6610_s14, %s8495_s14   ;;  %s6519_s13 = sphi %s6608_s13, %s8494_s13  }
  0x11   : > { %s289_s18 = sshll.u32 %s6533_s17, 4  ;;  %p4341_p0 = scmp.ge.s32.totalorder %s6531_s16, 1  ;;  %s6634_s18 = int_to_ptr.vmem [resolvable:$true] %s289_s18 }
  0x12   : > { %p8448_p1 = scmp.eq.s32.totalorder %s6629_s19, 0  ;;  %p277_p2 = scmp.lt.s32.totalorder %s6531_s16, 3 }
  0x13   : > { %s6534_s22 = smov [#allocation8]   ;;  %s6535_s24 = smov [#allocation11]  }
  0x14   : > { %p6636_p3 = pnand %p4341_p0, %p277_p2  ;;  %s315_s23 = sshll.u32 %s6534_s22, 4  ;;  %s6649_s23 = int_to_ptr.vmem [resolvable:$true] %s315_s23 }
  0x15   : > { %s6651_s25 = sshll.u32 %s6535_s24, 4  ;;  %s8464_s1 = sld [smem:[#allocation28_spill]]  ;;  %s340_s25 = int_to_ptr.vmem [resolvable:$true] %s6651_s25 }
  0x16   : > { %s8461_s20 = scalar_select %p6636_p3, 1, 0 }
  0x17   : > { %p5972_p5 = pneg %p6636_p3 }
  0x18   : > { %8462 = sst [smem:[#allocation27_spill]] %s8461_s20 }
  0x19   : > { %p6645_p6 = pnand %p5972_p5, %p8448_p1 }
  0x1b   : > { %s6163_s28 = scalar_lea.hbm %s8464_s1, 896  ;;  %p6661_p8 = pneg %p6645_p6 }
  0x1c   : > { %p6164_p7 = scmp.ne.s32.totalorder %s8464_s1, %s6163_s28  ;;  %p6170_p11 = scmp.lt.u32.totalorder %s6163_s28, %s8464_s1 }
  0x1e   : > { %p6166_p9 = pnand %p6661_p8, %p6164_p7 }
  0x20   : > { %p6167_p10 = pneg %p6166_p9 }
  0x22   : > { %p6172_p12 = pnand %p6170_p11, %p6167_p10 }
  0x24   : > { %6175 = shalt.err (!%p6172_p12)
}
  0x25   : > { %s6176_s22 = scalar_lea.vmem %s6634_s18, 896  ;;  %p6184_p5 = scmp.lt.s32.totalorder %s6634_s18, %s6634_s18 }
  0x26   : > { %p6177_p13 = scmp.ne.s32.totalorder %s6634_s18, %s6176_s22  ;;  %p6185_p4 = scmp.lt.s32.totalorder %s6176_s22, %s6176_s22 }
  0x28   : > { %p6179_p0 = pnand %p6177_p13, %p6661_p8  ;;  %p6186_p7 = por %p6185_p4, %p6184_p5 }
  0x2a   : > { %p6180_p2 = pneg %p6179_p0 }
  0x2c   : > { %p6187_p9 = pnand %p6186_p7, %p6180_p2 }
  0x2e   : > { %6190 = shalt.err (!%p6187_p9)
}
  0x2f   : > { %s8446_s24 = smov 128   ;;  %s8454_s26 = smov 8  }
  0x30   : > { %5975 = dma.hbm_to_vmem [thread:$0]  (!%p6645_p6), %s8464_s1, 896, %s6634_s18, [#allocation6], %s8446_s24, %s8446_s24, %s8454_s26  }
  0x31   : > { %s8466_s3 = sld [smem:[#allocation30_spill]] }
  0x37   : > { %s6191_s12 = scalar_lea.hbm %s8466_s3, 256 }
  0x38   : > { %p6192_p4 = scmp.ne.s32.totalorder %s8466_s3, %s6191_s12  ;;  %p6198_p12 = scmp.lt.u32.totalorder %s6191_s12, %s8466_s3 }
  0x3a   : > { %p6194_p10 = pnand %p6192_p4, %p6661_p8 }
  0x3c   : > { %p6195_p11 = pneg %p6194_p10 }
  0x3e   : > { %p6200_p13 = pnand %p6198_p12, %p6195_p11 }
  0x40   : > { %6203 = shalt.err (!%p6200_p13)
}
  0x41   : > { %s6204_s18 = scalar_lea.vmem %s6649_s23, 256  ;;  %p6212_p7 = scmp.lt.s32.totalorder %s6649_s23, %s6649_s23 }
  0x42   : > { %p6205_p0 = scmp.ne.s32.totalorder %s6649_s23, %s6204_s18  ;;  %p6213_p9 = scmp.lt.s32.totalorder %s6204_s18, %s6204_s18 }
  0x44   : > { %p6207_p2 = pnand %p6205_p0, %p6661_p8  ;;  %p6214_p4 = por %p6213_p9, %p6212_p7 }
  0x46   : > { %p6208_p5 = pneg %p6207_p2 }
  0x48   : > { %p6215_p10 = pnand %p6214_p4, %p6208_p5 }
  0x4a   : > { %6218 = shalt.err (!%p6215_p10)
}
  0x4b   : > { %s8450_s27 = smov 64   ;;  %s8452_s10 = smov 4  }
  0x4c   : > { %5981 = dma.hbm_to_vmem [thread:$0]  (!%p6645_p6), %s8466_s3, 256, %s6649_s23, [#allocation9], %s8450_s27, %s8450_s27, %s8452_s10  }
  0x4d   : > { %s6219_s12 = scalar_lea.hbm %s8438_s5, 896 }
  0x4e   : > { %p6220_p11 = scmp.ne.s32.totalorder %s8438_s5, %s6219_s12  ;;  %p6226_p0 = scmp.lt.u32.totalorder %s6219_s12, %s8438_s5 }
  0x50   : > { %p6222_p12 = pnand %p6220_p11, %p6661_p8 }
  0x52   : > { %p6223_p13 = pneg %p6222_p12 }
  0x54   : > { %p6228_p2 = pnand %p6226_p0, %p6223_p13 }
  0x56   : > { %6231 = shalt.err (!%p6228_p2)
}
  0x57   : > { %s6232_s20 = scalar_lea.vmem %s340_s25, 896  ;;  %p6240_p4 = scmp.lt.s32.totalorder %s340_s25, %s340_s25 }
  0x58   : > { %p6233_p5 = scmp.ne.s32.totalorder %s340_s25, %s6232_s20  ;;  %p6241_p10 = scmp.lt.s32.totalorder %s6232_s20, %s6232_s20 }
  0x5a   : > { %p6235_p7 = pnand %p6233_p5, %p6661_p8  ;;  %p6242_p1 = por %p6241_p10, %p6240_p4 }
  0x5c   : > { %p6236_p9 = pneg %p6235_p7 }
  0x5e   : > { %p6243_p3 = pnand %p6242_p1, %p6236_p9 }
  0x60   : > { %6246 = shalt.err (!%p6243_p3)
}
  0x61   : > { %s8467_s23 = smov 128   ;;  %s6540_s29 = smov [#allocation14]  }
  0x62   : > { %5987 = dma.hbm_to_vmem [thread:$0]  (!%p6645_p6), %s8438_s5, 896, %s340_s25, [#allocation12], %s8467_s23, %s8467_s23, %s8454_s26  }
  0x63   : > { %s365_s30 = sshll.u32 %s6540_s29, 4  ;;  %s6541_s12 = smov [#allocation7]   ;;  %s366_s30 = int_to_ptr.vmem [resolvable:$true] %s365_s30 }
  0x64   : > { %s302_s17 = sshll.u32 %s6541_s12, 4  ;;  %s6247_s20 = scalar_lea.hbm %s8440_s7, 2304  ;;  %s303_s17 = int_to_ptr.vmem [resolvable:$true] %s302_s17 }
  0x65   : > { %p6248_p1 = scmp.ne.s32.totalorder %s8440_s7, %s6247_s20  ;;  %p6254_p12 = scmp.lt.u32.totalorder %s6247_s20, %s8440_s7 }
  0x67   : > { %p6250_p3 = pnand %p6248_p1, %p6661_p8 }
  0x69   : > { %p6251_p11 = pneg %p6250_p3 }
  0x6b   : > { %p6256_p13 = pnand %p6254_p12, %p6251_p11 }
  0x6d   : > { %6259 = shalt.err (!%p6256_p13)
}
  0x6e   : > { %s6260_s25 = scalar_lea.vmem %s366_s30, 2304  ;;  %p6268_p7 = scmp.lt.s32.totalorder %s366_s30, %s366_s30 }
  0x6f   : > { %p6261_p0 = scmp.ne.s32.totalorder %s366_s30, %s6260_s25  ;;  %p6269_p9 = scmp.lt.s32.totalorder %s6260_s25, %s6260_s25 }
  0x71   : > { %p6263_p2 = pnand %p6261_p0, %p6661_p8  ;;  %p6270_p4 = por %p6269_p9, %p6268_p7 }
  0x73   : > { %p6264_p5 = pneg %p6263_p2 }
  0x75   : > { %p6271_p10 = pnand %p6270_p4, %p6264_p5 }
  0x77   : > { %6274 = shalt.err (!%p6271_p10)
}
  0x78   : > { %s8468_s27 = smov 4   ;;  %s8469_s10 = smov 64  }
  0x79   : > { %5993 = dma.hbm_to_vmem [thread:$0]  (!%p6645_p6), %s8440_s7, 2304, %s366_s30, [#allocation15], %s8469_s10, %s8469_s10, %s8468_s27  }
  0x7a   : > { %s8470_s2 = sld [smem:[#allocation29_spill]] }
  0x80   : > { %s6275_s22 = scalar_lea.hbm %s8470_s2, 1152 }
  0x81   : > { %p6276_p1 = scmp.ne.s32.totalorder %s8470_s2, %s6275_s22  ;;  %p6282_p12 = scmp.lt.u32.totalorder %s6275_s22, %s8470_s2 }
  0x83   : > { %p6278_p3 = pnand %p6276_p1, %p6661_p8 }
  0x85   : > { %p6279_p11 = pneg %p6278_p3 }
  0x87   : > { %p6284_p13 = pnand %p6282_p12, %p6279_p11 }
  0x89   : > { %6287 = shalt.err (!%p6284_p13)
}
  0x8a   : > { %s6288_s1 = scalar_lea.vmem %s303_s17, 1152  ;;  %p6296_p7 = scmp.lt.s32.totalorder %s303_s17, %s303_s17 }
  0x8b   : > { %p6289_p0 = scmp.ne.s32.totalorder %s303_s17, %s6288_s1  ;;  %p6297_p9 = scmp.lt.s32.totalorder %s6288_s1, %s6288_s1 }
  0x8d   : > { %p6291_p2 = pnand %p6289_p0, %p6661_p8  ;;  %p6298_p4 = por %p6297_p9, %p6296_p7 }
  0x8f   : > { %p6292_p5 = pneg %p6291_p2 }
  0x91   : > { %p6299_p10 = pnand %p6298_p4, %p6292_p5 }
  0x93   : > { %6302 = shalt.err (!%p6299_p10)
}
  0x94   : > { %5978 = dma.hbm_to_vmem [thread:$0]  (!%p6645_p6), %s8470_s2, 1152, %s303_s17, [#allocation6], %s8469_s10, %s8469_s10, %s8468_s27  }
  0x95   : > { %s6542_s29 = smov [#allocation10]   ;;  %s6543_s22 = smov [#allocation13]  }
  0x96   : > { %s329_s12 = sshll.u32 %s6542_s29, 4  ;;  %s352_s18 = sshll.u32 %s6543_s22, 4  ;;  %s330_s12 = int_to_ptr.vmem [resolvable:$true] %s329_s12  ;;  %s353_s18 = int_to_ptr.vmem [resolvable:$true] %s352_s18 }
  0x97   : > { %s8471_s4 = sld [smem:[#allocation31_spill]] }
  0x9d   : > { %s6303_s25 = scalar_lea.hbm %s8471_s4, 16 }
  0x9e   : > { %p6304_p1 = scmp.ne.s32.totalorder %s8471_s4, %s6303_s25  ;;  %p6310_p12 = scmp.lt.u32.totalorder %s6303_s25, %s8471_s4 }
  0xa0   : > { %p6306_p3 = pnand %p6304_p1, %p6661_p8 }
  0xa2   : > { %p6307_p11 = pneg %p6306_p3 }
  0xa4   : > { %p6312_p13 = pnand %p6310_p12, %p6307_p11 }
  0xa6   : > { %6315 = shalt.err (!%p6312_p13)
}
  0xa7   : > { %s6316_s17 = scalar_lea.vmem %s330_s12, 16  ;;  %s6323_s28 = scalar_lea.vmem %s330_s12, 32 }
  0xa8   : > { %p6317_p0 = scmp.ne.s32.totalorder %s330_s12, %s6316_s17  ;;  %p6324_p7 = scmp.lt.s32.totalorder %s330_s12, %s330_s12 }
  0xa9   : > { %p6325_p9 = scmp.lt.s32.totalorder %s6323_s28, %s6316_s17 }
  0xaa   : > { %p6319_p2 = pnand %p6317_p0, %p6661_p8 }
  0xab   : > { %p6326_p4 = por %p6325_p9, %p6324_p7 }
  0xac   : > { %p6320_p5 = pneg %p6319_p2 }
  0xae   : > { %p6327_p10 = pnand %p6326_p4, %p6320_p5 }
  0xb0   : > { %6330 = shalt.err (!%p6327_p10)
}
  0xb1   : > { %5984 = dma.hbm_to_vmem [thread:$0]  (!%p6645_p6), %s8471_s4, 16, %s330_s12, [#allocation9]  }
  0xb2   : > { %s6331_s20 = scalar_lea.hbm %s8439_s6, 2304 }
  0xb3   : > { %p6332_p1 = scmp.ne.s32.totalorder %s8439_s6, %s6331_s20  ;;  %p6338_p12 = scmp.lt.u32.totalorder %s6331_s20, %s8439_s6 }
  0xb5   : > { %p6334_p3 = pnand %p6332_p1, %p6661_p8 }
  0xb7   : > { %p6335_p11 = pneg %p6334_p3 }
  0xb9   : > { %p6340_p13 = pnand %p6338_p12, %p6335_p11 }
  0xbb   : > { %6343 = shalt.err (!%p6340_p13)
}
  0xbc   : > { %s6344_s17 = scalar_lea.vmem %s353_s18, 2304  ;;  %p6352_p7 = scmp.lt.s32.totalorder %s353_s18, %s353_s18 }
  0xbd   : > { %p6345_p0 = scmp.ne.s32.totalorder %s353_s18, %s6344_s17  ;;  %p6353_p9 = scmp.lt.s32.totalorder %s6344_s17, %s6344_s17 }
  0xbf   : > { %p6347_p2 = pnand %p6345_p0, %p6661_p8  ;;  %p6354_p4 = por %p6353_p9, %p6352_p7 }
  0xc1   : > { %p6348_p5 = pneg %p6347_p2 }
  0xc3   : > { %p6355_p10 = pnand %p6354_p4, %p6348_p5 }
  0xc5   : > { %6358 = shalt.err (!%p6355_p10)
}
  0xc6   : > { %5990 = dma.hbm_to_vmem [thread:$0]  (!%p6645_p6), %s8439_s6, 2304, %s353_s18, [#allocation12], %s8469_s10, %s8469_s10, %s8468_s27  }
  0xc7   : > { %s6544_s26 = smov [#allocation16]   ;;  %s6545_s3 = smov [#allocation17]  }
  0xc8   : > { %s378_s29 = sshll.u32 %s6544_s26, 4  ;;  %s392_s22 = sshll.u32 %s6545_s3, 4  ;;  %s379_s29 = int_to_ptr.vmem [resolvable:$true] %s378_s29  ;;  %s393_s22 = int_to_ptr.vmem [resolvable:$true] %s392_s22 }
  0xc9   : > { %s6359_s25 = scalar_lea.hbm %s8441_s8, 20736 }
  0xca   : > { %p6360_p1 = scmp.ne.s32.totalorder %s8441_s8, %s6359_s25  ;;  %p6366_p12 = scmp.lt.u32.totalorder %s6359_s25, %s8441_s8 }
  0xcc   : > { %p6362_p3 = pnand %p6360_p1, %p6661_p8 }
  0xce   : > { %p6363_p11 = pneg %p6362_p3 }
  0xd0   : > { %p6368_p13 = pnand %p6366_p12, %p6363_p11 }
  0xd2   : > { %6371 = shalt.err (!%p6368_p13)
}
  0xd3   : > { %s6372_s18 = scalar_lea.vmem %s379_s29, 20736  ;;  %p6380_p7 = scmp.lt.s32.totalorder %s379_s29, %s379_s29 }
  0xd4   : > { %p6373_p0 = scmp.ne.s32.totalorder %s379_s29, %s6372_s18  ;;  %p6381_p9 = scmp.lt.s32.totalorder %s6372_s18, %s6372_s18 }
  0xd6   : > { %p6375_p2 = pnand %p6373_p0, %p6661_p8  ;;  %p6382_p4 = por %p6381_p9, %p6380_p7 }
  0xd8   : > { %p6376_p5 = pneg %p6375_p2 }
  0xda   : > { %p6383_p10 = pnand %p6382_p4, %p6376_p5 }
  0xdc   : > { %6386 = shalt.err (!%p6383_p10)
}
  0xdd   : > { %s8472_s28 = smov 8   ;;  %s6387_s25 = scalar_lea.hbm %s8442_s9, 16 }
  0xde   : > { %5996 = dma.hbm_to_vmem [thread:$0]  (!%p6645_p6), %s8441_s8, 20736, %s379_s29, [#allocation15], %s8467_s23, %s8467_s23, %s8472_s28  }
  0xdf   : > { %p6388_p1 = scmp.ne.s32.totalorder %s8442_s9, %s6387_s25  ;;  %p6394_p12 = scmp.lt.u32.totalorder %s6387_s25, %s8442_s9 }
  0xe1   : > { %p6390_p3 = pnand %p6388_p1, %p6661_p8 }
  0xe3   : > { %p6391_p11 = pneg %p6390_p3 }
  0xe5   : > { %p6396_p13 = pnand %p6394_p12, %p6391_p11 }
  0xe7   : > { %6399 = shalt.err (!%p6396_p13)
}
  0xe8   : > { %s6400_s18 = scalar_lea.vmem %s393_s22, 16  ;;  %s6407_s23 = scalar_lea.vmem %s393_s22, 32 }
  0xe9   : > { %p6401_p0 = scmp.ne.s32.totalorder %s393_s22, %s6400_s18  ;;  %p6408_p7 = scmp.lt.s32.totalorder %s393_s22, %s393_s22 }
  0xea   : > { %p6409_p9 = scmp.lt.s32.totalorder %s6407_s23, %s6400_s18 }
  0xeb   : > { %p6403_p2 = pnand %p6401_p0, %p6661_p8 }
  0xec   : > { %p6410_p4 = por %p6409_p9, %p6408_p7 }
  0xed   : > { %p6404_p5 = pneg %p6403_p2 }
  0xef   : > { %p6411_p10 = pnand %p6410_p4, %p6404_p5 }
  0xf1   : > { %6414 = shalt.err (!%p6411_p10)
}
  0xf2   : > { %5999 = dma.hbm_to_vmem [thread:$0]  (!%p6645_p6), %s8442_s9, 16, %s393_s22, [#allocation18]  }
  0xf3   : > { %s4340_s11 = sadd.s32 4294967294, %s6531_s16   ;;  %s6855_s21 = sadd.s32 1, %s6531_s16  }
  0xf4   : > { %s38_s26 = sadd.s32 1, %s6527_s15  ;;  %s35_s3 = ssub.s32 %s6531_s16, %s6855_s21 }
  0xf5   : > { %p45_p8 = scmp.ne.s32.totalorder %s6527_s15, %s6523_s14  ;;  %p36_p1 = scmp.eq.s32.totalorder %s35_s3, 0 }
  0xf6   : > { %p46_p3 = scmp.eq.s32.totalorder %s6531_s16, 0  ;;  %p51_p11 = scmp.ne.s32.totalorder %s6523_s14, %s6519_s13 }
  0xf7   : > { %p264_p12 = scmp.eq.s32.totalorder %s6629_s19, 1  ;;  %p8473_p0 = scmp.eq.s32.totalorder %s6629_s19, 0 }
  0xf8   : > { %s6867_s20 = scalar_select %p36_p1, %s6527_s15, %s38_s26  }
  0xf9   : > { %p47_p13 = por %p46_p3, %p45_p8  ;;  %p6871_p2 = por %p8473_p0, %p51_p11 }
  0xfa   : > { %p6875_p6 = por %p264_p12, %p45_p8  ;;  %p270_p5 = scmp.eq.s32.totalorder %s4340_s11, 1 }
  0xfb   : > { %p6017_p7 = scmp.lt.s32.totalorder %s6531_s16, 2  ;;  %s403_s25 = sand.u32 1, %s6527_s15  }
  0xfc   : > { %s8475_s22 = scalar_select %p6875_p6, 1, 0 }
  0xfd   : > { %p6881_p9 = por %p270_p5, %p51_p11  ;;  %s5928_s30 = smul.u32 72, %s403_s25 }
  0xfe   : > { %p6885_p4 = pnand %p6017_p7, %p47_p13  ;;  %s5929_s12 = smul.u32 1152, %s6531_s16 }
  0xff   : > { %s8476_s1 = scalar_select %p6881_p9, 1, 0 }
 0x100   : > { %s6893_s29 = scalar_lea.hbm %s8433_s0, %s5929_s12  ;;  %s407_s28 = scalar_lea.vmem [#allocation2], %s5928_s30 }
 0x101   : > { %s414_s11 = sshll.u32 %s407_s28, 4  ;;  %s6897_s26 = scalar_lea.sflag [#allocation3], %s403_s25  ;;  %s6895_s11 = int_to_ptr.vmem [resolvable:$true] %s414_s11 }
 0x102   : > { %s6415_s3 = scalar_lea.hbm %s6893_s29, 1152  ;;  %p6417_p8 = pneg %p6885_p4 }
 0x103   : > { %p6416_p10 = scmp.ne.s32.totalorder %s6893_s29, %s6415_s3  ;;  %s6420_s23 = scalar_lea.hbm %s8433_s0, 2304 }
 0x104   : > { %p6421_p11 = scmp.lt.u32.totalorder %s6893_s29, %s8433_s0  ;;  %p6422_p12 = scmp.lt.u32.totalorder %s6420_s23, %s6415_s3 }
 0x105   : > { %p6418_p1 = pnand %p6417_p8, %p6416_p10  ;;  %p6424_p0 = scmp.lt.u32.totalorder %s6415_s3, %s6893_s29 }
 0x106   : > { %p6423_p13 = por %p6422_p12, %p6421_p11 }
 0x107   : > { %p6419_p3 = pneg %p6418_p1 }
 0x108   : > { %p6425_p5 = por %p6424_p0, %p6423_p13 }
 0x10a   : > { %p6426_p7 = pnand %p6425_p5, %p6419_p3 }
 0x10c   : > { %6429 = shalt.err (!%p6426_p7)
}
 0x10d   : > { %s6430_s25 = scalar_lea.vmem %s6895_s11, 1152  ;;  %s6546_s30 = smov [#allocation2]  }
 0x10e   : > { %p6431_p10 = scmp.ne.s32.totalorder %s6895_s11, %s6430_s25  ;;  %s6435_s28 = sshll.u32 %s6546_s30, 4  ;;  %s6436_s28 = int_to_ptr.vmem [resolvable:$false] %s6435_s28 }
 0x10f   : > { %s6437_s2 = scalar_lea.vmem %s6436_s28, 2304  ;;  %p6438_p6 = scmp.lt.s32.totalorder %s6895_s11, %s6436_s28 }
 0x110   : > { %p6433_p1 = pnand %p6431_p10, %p6417_p8  ;;  %p6439_p11 = scmp.lt.s32.totalorder %s6437_s2, %s6430_s25 }
 0x112   : > { %p6434_p9 = pneg %p6433_p1  ;;  %p6440_p12 = por %p6439_p11, %p6438_p6 }
 0x114   : > { %p6441_p13 = pnand %p6440_p12, %p6434_p9 }
 0x116   : > { %6444 = shalt.err (!%p6441_p13)
}
 0x117   : > { %6003 = dma.hbm_to_vmem [thread:$0]  (!%p6885_p4), %s6893_s29, 1152, %s6895_s11, %s6897_s26, %s8469_s10, %s8469_s10, %s8468_s27  }
 0x118   : > { %s8478_s4 = sld [smem:[#allocation27_spill]] }
 0x11e   : > { %p8479_p8 = scmp.ne.s32.totalorder %s8478_s4, 0 }
 0x11f   : > { %s6931_s3 = sand.u32 (!%p8479_p8), 1, %s6523_s14  }
 0x120   : > { %426 = sbr.rel (%p8479_p8) target bundleno = 1918 (0x77e), region = 60  ;;  %s429_s18 = scalar_lea.sflag (!%p8479_p8), [#allocation3], %s6931_s3 }
 0x121   : > { %s5930_s12 = smul.u32 (!%p8479_p8), 72, %s6931_s3 }
 0x123   : > { %s6937_s17 = scalar_lea.vmem (!%p8479_p8), [#allocation2], %s5930_s12 }
 0x127   : > { %6490 = dma.done.wait (%p6871_p2), %s429_s18, 1152  }
 0x128   : > { %6492 = vsyncadd (%p6871_p2), %s429_s18, 4294966144  ;;  %p8480_p6 = scmp.eq.s32.totalorder %s6629_s19, 0 }
 0x12a   : > { %6494 = dma.done.wait (%p8480_p6), [#allocation6], 2048   ;;  %p8481_p9 = pmov %p8480_p6 }
 0x12b   : > { %p8482_p4 = pmov %p8480_p6 }
 0x12c   : > { %6496 = vsyncadd (%p8481_p9), [#allocation6], 4294965248 }
 0x12d   : > { %6498 = dma.done.wait (%p8482_p4), [#allocation9], 272   ;;  %p8483_p3 = pmov %p8482_p4 }
 0x12f   : > { %6500 = vsyncadd (%p8483_p3), [#allocation9], 4294967024  ;;  %p8484_p0 = pmov %p8483_p3 }
 0x131   : > { %6502 = dma.done.wait (%p8484_p0), [#allocation12], 3200   ;;  %p8485_p5 = pmov %p8484_p0 }
 0x132   : > { %p8486_p2 = pmov %p8484_p0 }
 0x133   : > { %6504 = vsyncadd (%p8485_p5), [#allocation12], 4294964096 }
 0x134   : > { %6506 = dma.done.wait (%p8486_p2), [#allocation15], 23040   ;;  %p8487_p7 = pmov %p8484_p0 }
 0x135   : > { %p8488_p10 = pmov %p8484_p0 }
 0x136   : > { %6508 = vsyncadd (%p8487_p7), [#allocation15], 4294944256 }
 0x137   : > { %6510 = dma.done.wait (%p8488_p10), [#allocation18], 16   ;;  %p8489_p1 = pmov %p8484_p0 }
 0x138   : > { %v6547_v0 = vmov 0   ;;  %v6964_v1 = vld [vmem:[%s6937_s17] sm:$0xff]   ;;  %v6968_v2 = vld [vmem:[%s6937_s17 + $0x8] sm:$0xff]   ;;  %v6972_v3 = vld [vmem:[%s6937_s17 + $0x10] sm:$0xff]   ;;  %vm618_vm0 = vcmask 130048   ;;  %vm722_vm1 = vcmask 261120  }
 0x139   : > { %6512 = vsyncadd (%p8489_p1), [#allocation18], 4294967280  ;;  %631 = vmatprep.subr.bf16.mxu0 %v6547_v0  ;;  %v6975_v4 = vld [vmem:[%s6937_s17 + $0x18] sm:$0xff]   ;;  %v6981_v6 = vld [vmem:[%s6937_s17 + $0x20] sm:$0xff]   ;;  %v6548_v41 = vmov 0.0   ;;  %vm6549_vm2 = vmmov 0  }
 0x13a   : > { %632 = vmatpush1.bf16.msra.mxu0 %v6964_v1  ;;  %v6089_v5 = vld [vmem:[#allocation5 + $0x4] ss:$8 sps:$4 sm:$0xff]   ;;  %v6996_v10 = vld [vmem:[%s6937_s17 + $0x40] sm:$0xff]   ;;  %v6087_v12 = vld [vmem:[#allocation5] ss:$8 sps:$4 sm:$0xff]   ;;  %4876 = vmatprep.subr.bf16.mxu1 %v6548_v41  ;;  %vm915_vm3 = vcmask 1040384  }
 0x13b   : > { %633 = vmatprep.subr.bf16.mxu0 %v6547_v0  ;;  %4380 = vmatprep.mubr.msk.bf16.mxu0 %vm618_vm0, %v6089_v5  ;;  %v6984_v7 = vld [vmem:[%s6937_s17 + $0x28] sm:$0xff]   ;;  %v6988_v8 = vld [vmem:[%s6937_s17 + $0x30] sm:$0xff]   ;;  %v6992_v9 = vld [vmem:[%s6937_s17 + $0x38] sm:$0xff]   ;;  %vm887_vm4 = vcmask 408576   ;;  %vm4148_vm10 = vcmask 60416   ;;  %s8248_s27 = scalar_lea.vmem [#allocation19], %s5930_s12 }
 0x13c   : > { %v6098_v11 = vld [vmem:[#allocation8] sm:$0xff]   ;;  %v6090_v13 = vld [vmem:[#allocation5 + $0x14] ss:$8 sps:$4 sm:$0xff]   ;;  %v6092_v14 = vld [vmem:[#allocation5 + $0x10] ss:$8 sps:$4 sm:$0xff]   ;;  %4884 = vmatprep.mubr.msk.bf16.mxu1 %vm6549_vm2, %v6548_v41  ;;  %s5931_s10 = smul.u32 1152, %s6629_s19 }
 0x13d   : > { %v6093_v15 = vld [vmem:[#allocation5 + $0x24] ss:$8 sps:$4 sm:$0xff]   ;;  %v530_v16 = vld [vmem:[#allocation5 + $0x30] sm:$0x11]  ;;  %v6095_v17 = vld [vmem:[#allocation5 + $0x20] ss:$8 sps:$4 sm:$0xff]  }
 0x13e   : > { %634 = vmatpush1.bf16.msra.mxu0 %v6968_v2  ;;  %v4370_v18 = vcombine.high %v530_v16, %v530_v16  ;;  %v4369_v19 = vcombine.low %v530_v16, %v530_v16  ;;  %v6099_v20 = vld [vmem:[#allocation8 + $0x8] sm:$0xff]   ;;  %v6111_v42 = vld [vmem:[#allocation14] sm:$0xff]   ;;  %v4384_v44 = vld [vmem:[#allocation10] ss:$0 sm:$0xff]  ;;  %s4181_s24 = sshll.u32 %s8248_s27, 4  ;;  %s8490_s26 = sld [smem:[#allocation32_spill]]  ;;  %s8385_s24 = int_to_ptr.vmem [resolvable:$true] %s4181_s24 }
 0x13f   : > { %635 = vmatprep.subr.bf16.mxu0 %v6547_v0  ;;  %v6112_v43 = vld [vmem:[#allocation14 + $0x8] sm:$0xff]   ;;  %v809_v55 = vld [vmem:[#allocation11 + $0x18] sm:$0xff]  ;;  %v806_v57 = vld [vmem:[#allocation11] sm:$0xff]  ;;  %s4168_s19 = scalar_lea.sflag [#allocation4], %s6931_s3  ;;  %s6445_s25 = scalar_lea.vmem %s8385_s24, 1152 }
 0x140   : > { %v808_v53 = vld [vmem:[#allocation11 + $0x10] sm:$0xff]  ;;  %v807_v59 = vld [vmem:[#allocation11 + $0x8] sm:$0xff]  ;;  %p6446_p11 = scmp.ne.s32.totalorder %s8385_s24, %s6445_s25  ;;  %p8491_p12 = scmp.ne.s32.totalorder %s8475_s22, 0 }
 0x141   : > { %s6550_s30 = smov [#allocation19]  }
 0x142   : > { %636 = vmatpush1.bf16.msra.mxu0 %v6972_v3  ;;  %p6447_p13 = pnand %p6446_p11, %p8491_p12  ;;  %s6449_s28 = sshll.u32 %s6550_s30, 4  ;;  %s6450_s28 = int_to_ptr.vmem [resolvable:$false] %s6449_s28 }
 0x143   : > { %637 = vmatprep.subr.bf16.mxu0 %v6547_v0  ;;  %s6451_s2 = scalar_lea.vmem %s6450_s28, 2304  ;;  %p6452_p6 = scmp.lt.s32.totalorder %s8385_s24, %s6450_s28 }
 0x144   : > { %s8383_s23 = scalar_lea.hbm %s8490_s26, %s5931_s10  ;;  %p6448_p8 = pneg %p6447_p13 }
 0x145   : > { %p6453_p9 = scmp.lt.s32.totalorder %s6451_s2, %s6445_s25 }
 0x146   : > { %638 = vmatpush1.bf16.msra.mxu0 %v6975_v4 }
 0x147   : > { %639 = vmatprep.subr.bf16.mxu0 %v6547_v0  ;;  %p6454_p4 = por %p6453_p9, %p6452_p6 }
 0x149   : > { %p6455_p3 = pnand %p6454_p4, %p6448_p8 }
 0x14a   : > { %640 = vmatpush1.bf16.msra.mxu0 %v6981_v6 }
 0x14b   : > { %641 = vmatprep.subr.bf16.mxu0 %v6547_v0 }
 0x14e   : > { %642 = vmatpush1.bf16.msra.mxu0 %v6984_v7 }
 0x14f   : > { %643 = vmatprep.subr.bf16.mxu0 %v6547_v0 }
 0x152   : > { %644 = vmatpush1.bf16.msra.mxu0 %v6988_v8 }
 0x153   : > { %645 = vmatprep.subr.bf16.mxu0 %v6547_v0 }
 0x156   : > { %646 = vmatpush1.bf16.msra.mxu0 %v6992_v9 }
 0x157   : > { %647 = vmatprep.subr.bf16.mxu0 %v6547_v0 }
 0x15a   : > { %648 = vmatpush1.bf16.msra.mxu0 %v6996_v10 }
 0x15b   : > { %4864 = vmatprep.subr.bf16.mxu0 %v6098_v11 }
 0x15d   : > { %664 = vmatmul.mubr.bf16.vlgmr.msra.gmra.mrb[0].mxu0 %v6087_v12 }
 0x15e   : > { %4381 = vmatprep.mubr.msk.bf16.mxu0 %vm618_vm0, %v6090_v13  ;;  %4865 = vmatpush3.bf16.msra.mxu0 %v6098_v11 }
 0x15f   : > { %4866 = vmatprep.subr.bf16.mxu0 %v6099_v20 }
 0x162   : > { %4867 = vmatpush3.bf16.msra.mxu0 %v6099_v20 }
 0x163   : > { %4920 = vmatprep.subr.bf16.mxu0 %v6548_v41 }
 0x165   : > { %672 = vmatmul.mubr.bf16.gmra.mrb[4].mxu0 %v6092_v14 }
 0x166   : > { %4382 = vmatprep.mubr.msk.bf16.mxu0 %vm618_vm0, %v6093_v15 }
 0x16d   : > { %680 = vmatmul.mubr.bf16.gmra.mrb[8].mxu0 %v6095_v17 }
 0x16e   : > { %4383 = vmatprep.mubr.msk.bf16.mxu0 %vm618_vm0, %v4370_v18 }
 0x175   : > { %688 = vmatmul.mubr.bf16.gmra.mrb[12].mxu0 %v4369_v19  ;;  %v812_v19 = vld [vmem:[#allocation11 + $0x30] sm:$0x3] }
 0x230   : > { %v665_v21 = vpop.f32.mrb[0].mxu0 }
 0x231   : > { %v667_v22 = vpop.f32.mrb[1].mxu0 }
 0x232   : > { %v668_v23 = vpop.f32.mrb[2].mxu0  ;;  %v810_v22 = vld [vmem:[#allocation11 + $0x20] sm:$0xff] }
 0x233   : > { %v695_v24 = vpack.c.bf16 %v668_v23, %v665_v21  ;;  %v670_v25 = vpop.f32.mrb[3].mxu0  ;;  %v811_v23 = vld [vmem:[#allocation11 + $0x28] sm:$0xff] }
 0x235   : > { %4868 = vmatprep.mubr.msk.bf16.mxu0 %vm722_vm1, %v695_v24 }
 0x238   : > { %v673_v26 = vpop.f32.mrb[4].mxu0 }
 0x239   : > { %v675_v27 = vpop.f32.mrb[5].mxu0 }
 0x23a   : > { %v676_v28 = vpop.f32.mrb[6].mxu0 }
 0x23b   : > { %v696_v29 = vpack.c.bf16 %v676_v28, %v673_v26  ;;  %v678_v30 = vpop.f32.mrb[7].mxu0 }
 0x23d   : > { %4869 = vmatmul.mubr.msk.bf16.vlgmr.msra.gmra.mrb[16].mxu0 %vm722_vm1, %v696_v29 }
 0x23e   : > { %4921 = vmatpush3.bf16.msra.mxu0 %v6111_v42  ;;  %v6108_v42 = vld [vmem:[#allocation7 + $0x40] sm:$0xff]  }
 0x23f   : > { %4922 = vmatprep.subr.bf16.mxu0 %v6548_v41 }
 0x240   : > { %v681_v31 = vpop.f32.mrb[8].mxu0 }
 0x241   : > { %v683_v32 = vpop.f32.mrb[9].mxu0 }
 0x242   : > { %v684_v33 = vpop.f32.mrb[10].mxu0  ;;  %4923 = vmatpush3.bf16.msra.mxu0 %v6112_v43  ;;  %v6109_v32 = vld [vmem:[#allocation14 + $0x10] sm:$0xff]  }
 0x243   : > { %v697_v34 = vpack.c.bf16 %v684_v33, %v681_v31  ;;  %v686_v35 = vpop.f32.mrb[11].mxu0  ;;  %4960 = vmatprep.subr.bf16.mxu0 %v6548_v41  ;;  %v6100_v31 = vld [vmem:[#allocation7] sm:$0xff]  }
 0x244   : > { %v6110_v33 = vld [vmem:[#allocation14 + $0x18] sm:$0xff]   ;;  %v6102_v35 = vld [vmem:[#allocation7 + $0x10] sm:$0xff]  }
 0x245   : > { %4872 = vmatprep.mubr.msk.bf16.mxu0 %vm722_vm1, %v697_v34  ;;  %v6101_v34 = vld [vmem:[#allocation7 + $0x8] sm:$0xff]  }
 0x248   : > { %v689_v36 = vpop.f32.mrb[12].mxu0 }
 0x249   : > { %v698_v37 = vpack.c.bf16 %v689_v36, %v689_v36  ;;  %v691_v38 = vpop.f32.mrb[13].mxu0  ;;  %v6103_v36 = vld [vmem:[#allocation7 + $0x18] sm:$0xff]  }
 0x24a   : > { %v692_v39 = vpop.f32.mrb[14].mxu0  ;;  %v6105_v38 = vld [vmem:[#allocation7 + $0x28] sm:$0xff]  }
 0x24b   : > { %v693_v40 = vpop.f32.mrb[15].mxu0  ;;  %4873 = vmatmul.mubr.msk.bf16.gmra.mrb[20].mxu0 %vm722_vm1, %v698_v37  ;;  %v6104_v37 = vld [vmem:[#allocation7 + $0x20] sm:$0xff]   ;;  %v6106_v39 = vld [vmem:[#allocation7 + $0x30] sm:$0xff]  }
 0x24c   : > { %4924 = vmatprep.mubr.msk.bf16.mxu0 %vm6549_vm2, %v6548_v41  ;;  %v6107_v40 = vld [vmem:[#allocation7 + $0x38] sm:$0xff]  }
 0x310   : > { %v4870_v45 = vpop.f32.mrb[16].mxu0 }
 0x311   : > { %v778_v46 = vadd.f32 %v4870_v45, %v4384_v44  ;;  %v769_v47 = vpop.f32.mrb[17].mxu0 }
 0x312   : > { %v770_v48 = vadd.f32 %v4384_v44, %v769_v47  ;;  %v4871_v49 = vpop.f32.mrb[18].mxu0  ;;  %v6114_v47 = vld [vmem:[#allocation13 + $0x10] sm:$0xff]  }
 0x313   : > { %v801_v50 = vmax.f32 %v778_v46, 0.0  ;;  %v781_v51 = vadd.f32 %v4871_v49, %v4384_v44  ;;  %v772_v52 = vpop.f32.mrb[19].mxu0  ;;  %v6113_v46 = vld [vmem:[#allocation13] sm:$0xff]  }
 0x314   : > { %v799_v54 = vmax.f32 %v770_v48, 0.0  ;;  %v773_v56 = vadd.f32 %v4384_v44, %v772_v52 }
 0x315   : > { %v802_v58 = vmax.f32 %v781_v51, 0.0  ;;  %v815_v61 = vmul.f32 %v808_v53, %v801_v50  ;;  %v6115_v50 = vld [vmem:[#allocation13 + $0x8] sm:$0xff]   ;;  %v6116_v51 = vld [vmem:[#allocation13 + $0x18] sm:$0xff]  }
 0x316   : > { %v800_v60 = vmax.f32 %v773_v56, 0.0  ;;  %v813_v63 = vmul.f32 %v806_v57, %v799_v54 }
 0x317   : > { %v816_v62 = vmul.f32 %v809_v55, %v802_v58 }
 0x318   : > { %v814_v0 = vmul.f32 %v807_v59, %v800_v60 }
 0x319   : > { %v839_v5 = vpack.c.bf16 %v816_v62, %v815_v61 }
 0x31a   : > { %v838_v11 = vpack.c.bf16 %v814_v0, %v813_v63 }
 0x31c   : > { %4877 = vmatpush3.bf16.msra.mxu1 %v838_v11 }
 0x31d   : > { %4878 = vmatprep.subr.bf16.mxu1 %v6548_v41 }
 0x31e   : > { %v4874_v12 = vpop.f32.mrb[20].mxu0 }
 0x31f   : > { %v794_v13 = vadd.f32 %v4874_v12, %v4384_v44  ;;  %v785_v14 = vpop.f32.mrb[21].mxu0 }
 0x320   : > { %v786_v15 = vadd.f32 %v4384_v44, %v785_v14  ;;  %v4875_v16 = vpop.f32.mrb[22].mxu0  ;;  %4879 = vmatpush3.bf16.msra.mxu1 %v839_v5 }
 0x321   : > { %v805_v17 = vmax.f32 %v794_v13, 0.0  ;;  %v788_v18 = vpop.f32.mrb[23].mxu0  ;;  %4880 = vmatprep.subr.bf16.mxu1 %v6548_v41 }
 0x322   : > { %v803_v20 = vmax.f32 %v786_v15, 0.0  ;;  %v789_v21 = vadd.f32 %v4384_v44, %v788_v18 }
 0x323   : > { %v819_v25 = vmul.f32 %v812_v19, %v805_v17 }
 0x324   : > { %v804_v24 = vmax.f32 %v789_v21, 0.0  ;;  %v817_v26 = vmul.f32 %v810_v22, %v803_v20 }
 0x325   : > { %v841_v29 = vpack.c.bf16 %v819_v25, %v819_v25 }
 0x326   : > { %v818_v27 = vmul.f32 %v811_v23, %v804_v24 }
 0x327   : > { %v917_v30 = vsel %vm915_vm3, %v841_v29, 0 }
 0x328   : > { %v840_v28 = vpack.c.bf16 %v818_v27, %v817_v26 }
 0x32a   : > { %4881 = vmatpush3.bf16.msra.mxu1 %v840_v28 }
 0x32b   : > { %4882 = vmatprep.subr.bf16.mxu1 %v6548_v41 }
 0x32e   : > { %4883 = vmatpush3.bf16.msra.mxu1 %v917_v30 }
 0x32f   : > { %5000 = vmatprep.subr.bf16.mxu1 %v6548_v41 }
 0x331   : > { %4885 = vmatmul.mubr.msk.bf16.vlgmr.msra.gmra.mrb[0].mxu1 %vm887_vm4, %v6100_v31 }
 0x332   : > { %4888 = vmatprep.mubr.msk.bf16.mxu1 %vm6549_vm2, %v6548_v41  ;;  %5001 = vmatpush3.bf16.msra.mxu1 %v6109_v32 }
 0x333   : > { %5002 = vmatprep.subr.bf16.mxu1 %v6548_v41 }
 0x336   : > { %5003 = vmatpush3.bf16.msra.mxu1 %v6110_v33 }
 0x337   : > { %5040 = vmatprep.subr.bf16.mxu1 %v6548_v41 }
 0x339   : > { %4889 = vmatmul.mubr.msk.bf16.gmra.mrb[4].mxu1 %vm887_vm4, %v6101_v34 }
 0x33a   : > { %4892 = vmatprep.mubr.msk.bf16.mxu1 %vm6549_vm2, %v6548_v41 }
 0x341   : > { %4893 = vmatmul.mubr.msk.bf16.gmra.mrb[8].mxu1 %vm887_vm4, %v6102_v35 }
 0x342   : > { %4896 = vmatprep.mubr.msk.bf16.mxu1 %vm6549_vm2, %v6548_v41 }
 0x349   : > { %4897 = vmatmul.mubr.msk.bf16.gmra.mrb[12].mxu1 %vm887_vm4, %v6103_v36 }
 0x34a   : > { %4900 = vmatprep.mubr.msk.bf16.mxu1 %vm6549_vm2, %v6548_v41 }
 0x351   : > { %4901 = vmatmul.mubr.msk.bf16.gmra.mrb[16].mxu1 %vm887_vm4, %v6104_v37  ;;  %v6117_v37 = vld [vmem:[#allocation14 + $0x20] sm:$0xff]  }
 0x352   : > { %4904 = vmatprep.mubr.msk.bf16.mxu1 %vm6549_vm2, %v6548_v41 }
 0x359   : > { %4905 = vmatmul.mubr.msk.bf16.gmra.mrb[20].mxu1 %vm887_vm4, %v6105_v38  ;;  %v6118_v38 = vld [vmem:[#allocation14 + $0x30] sm:$0xff]  }
 0x35a   : > { %4908 = vmatprep.mubr.msk.bf16.mxu1 %vm6549_vm2, %v6548_v41 }
 0x361   : > { %4909 = vmatmul.mubr.msk.bf16.gmra.mrb[24].mxu1 %vm887_vm4, %v6106_v39  ;;  %v6119_v39 = vld [vmem:[#allocation14 + $0x28] sm:$0xff]  }
 0x362   : > { %4912 = vmatprep.mubr.msk.bf16.mxu1 %vm6549_vm2, %v6548_v41 }
 0x369   : > { %4913 = vmatmul.mubr.msk.bf16.gmra.mrb[28].mxu1 %vm887_vm4, %v6107_v40  ;;  %v6120_v40 = vld [vmem:[#allocation14 + $0x38] sm:$0xff]  }
 0x36a   : > { %4916 = vmatprep.mubr.msk.bf16.mxu1 %vm6549_vm2, %v6548_v41 }
 0x371   : > { %4917 = vmatmul.mubr.msk.bf16.gmra.mrb[32].mxu1 %vm887_vm4, %v6108_v42  ;;  %v6121_v42 = vld [vmem:[#allocation13 + $0x20] sm:$0xff]  }
 0x372   : > { %5004 = vmatprep.mubr.msk.bf16.mxu1 %vm6549_vm2, %v6548_v41 }
 0x404   : > { %v953_v43 = vpop.f32.mrb[0].mxu1 }
 0x405   : > { %v4886_v44 = vpop.f32.mrb[1].mxu1 }
 0x406   : > { %v956_v45 = vpop.f32.mrb[2].mxu1  ;;  %v6123_v44 = vld [vmem:[#allocation13 + $0x28] sm:$0xff]  }
 0x407   : > { %v7048_v48 = vpack.c.bf16 %v956_v45, %v953_v43  ;;  %v4887_v49 = vpop.f32.mrb[3].mxu1  ;;  %v6122_v43 = vld [vmem:[#allocation13 + $0x30] sm:$0xff]   ;;  %v6124_v45 = vld [vmem:[#allocation13 + $0x38] sm:$0xff]  }
 0x408   : > { %v6127_v49 = vld [vmem:[#allocation14 + $0x48] sm:$0xff]  }
 0x409   : > { %4925 = vmatmul.mubr.msk.bf16.vlgmr.msra.gmra.mrb[24].mxu0 %vm722_vm1, %v7048_v48  ;;  %5005 = vmatmul.mubr.msk.bf16.vlgmr.msra.gmra.mrb[36].mxu1 %vm722_vm1, %v7048_v48 }
 0x40a   : > { %4961 = vmatpush3.bf16.msra.mxu0 %v6113_v46  ;;  %5041 = vmatpush3.bf16.msra.mxu1 %v6114_v47  ;;  %v6125_v46 = vld [vmem:[#allocation14 + $0x40] sm:$0xff]   ;;  %v6126_v47 = vld [vmem:[#allocation13 + $0x40] sm:$0xff]  }
 0x40b   : > { %4928 = vmatprep.mubr.msk.bf16.mxu0 %vm6549_vm2, %v6548_v41  ;;  %5008 = vmatprep.mubr.msk.bf16.mxu1 %vm6549_vm2, %v6548_v41 }
 0x40c   : > { %v961_v52 = vpop.f32.mrb[4].mxu1  ;;  %4962 = vmatprep.subr.bf16.mxu0 %v6548_v41  ;;  %5042 = vmatprep.subr.bf16.mxu1 %v6548_v41 }
 0x40d   : > { %v4890_v53 = vpop.f32.mrb[5].mxu1 }
 0x40e   : > { %v964_v54 = vpop.f32.mrb[6].mxu1  ;;  %4963 = vmatpush3.bf16.msra.mxu0 %v6115_v50  ;;  %5043 = vmatpush3.bf16.msra.mxu1 %v6116_v51  ;;  %v6128_v50 = vld [vmem:[#allocation13 + $0x48] sm:$0xff]   ;;  %v1706_v51 = vld [vmem:[#allocation16 + $0xa0] sm:$0xff]  ;;  %v6130_v53 = vld [vmem:[#allocation14 + $0x60] sm:$0xff]  }
 0x40f   : > { %v7060_v55 = vpack.c.bf16 %v964_v54, %v961_v52  ;;  %v4891_v56 = vpop.f32.mrb[7].mxu1  ;;  %5080 = vmatprep.subr.bf16.mxu0 %v6548_v41  ;;  %5160 = vmatprep.subr.bf16.mxu1 %v6548_v41  ;;  %v6129_v52 = vld [vmem:[#allocation14 + $0x50] sm:$0xff]  }
 0x411   : > { %4929 = vmatmul.mubr.msk.bf16.gmra.mrb[28].mxu0 %vm722_vm1, %v7060_v55  ;;  %5009 = vmatmul.mubr.msk.bf16.gmra.mrb[40].mxu1 %vm722_vm1, %v7060_v55 }
 0x412   : > { %4932 = vmatprep.mubr.msk.bf16.mxu0 %vm6549_vm2, %v6548_v41  ;;  %5012 = vmatprep.mubr.msk.bf16.mxu1 %vm6549_vm2, %v6548_v41 }
 0x414   : > { %v969_v57 = vpop.f32.mrb[8].mxu1 }
 0x415   : > { %v4894_v58 = vpop.f32.mrb[9].mxu1 }
 0x416   : > { %v972_v59 = vpop.f32.mrb[10].mxu1 }
 0x417   : > { %v7072_v60 = vpack.c.bf16 %v972_v59, %v969_v57  ;;  %v4895_v61 = vpop.f32.mrb[11].mxu1 }
 0x419   : > { %4933 = vmatmul.mubr.msk.bf16.gmra.mrb[32].mxu0 %vm722_vm1, %v7072_v60  ;;  %5013 = vmatmul.mubr.msk.bf16.gmra.mrb[44].mxu1 %vm722_vm1, %v7072_v60 }
 0x41a   : > { %4936 = vmatprep.mubr.msk.bf16.mxu0 %vm6549_vm2, %v6548_v41  ;;  %5016 = vmatprep.mubr.msk.bf16.mxu1 %vm6549_vm2, %v6548_v41 }
 0x41c   : > { %v977_v62 = vpop.f32.mrb[12].mxu1 }
 0x41d   : > { %v4898_v63 = vpop.f32.mrb[13].mxu1 }
 0x41e   : > { %v980_v0 = vpop.f32.mrb[14].mxu1 }
 0x41f   : > { %v7082_v5 = vpack.c.bf16 %v980_v0, %v977_v62  ;;  %v4899_v11 = vpop.f32.mrb[15].mxu1  ;;  %v7391_v0 = vld [vmem:[%s6937_s17] sm:$0xff]  }
 0x421   : > { %4937 = vmatmul.mubr.msk.bf16.gmra.mrb[36].mxu0 %vm722_vm1, %v7082_v5  ;;  %5017 = vmatmul.mubr.msk.bf16.gmra.mrb[48].mxu1 %vm722_vm1, %v7082_v5 }
 0x422   : > { %4940 = vmatprep.mubr.msk.bf16.mxu0 %vm6549_vm2, %v6548_v41  ;;  %5020 = vmatprep.mubr.msk.bf16.mxu1 %vm6549_vm2, %v6548_v41 }
 0x424   : > { %v985_v12 = vpop.f32.mrb[16].mxu1 }
 0x425   : > { %v4902_v13 = vpop.f32.mrb[17].mxu1 }
 0x426   : > { %v988_v14 = vpop.f32.mrb[18].mxu1  ;;  %v6131_v13 = vld [vmem:[#allocation14 + $0x58] sm:$0xff]  }
 0x427   : > { %v7092_v15 = vpack.c.bf16 %v988_v14, %v985_v12  ;;  %v4903_v16 = vpop.f32.mrb[19].mxu1  ;;  %v6132_v14 = vld [vmem:[#allocation14 + $0x68] sm:$0xff]  }
 0x429   : > { %4941 = vmatmul.mubr.msk.bf16.gmra.mrb[40].mxu0 %vm722_vm1, %v7092_v15  ;;  %5021 = vmatmul.mubr.msk.bf16.gmra.mrb[52].mxu1 %vm722_vm1, %v7092_v15 }
 0x42a   : > { %4944 = vmatprep.mubr.msk.bf16.mxu0 %vm6549_vm2, %v6548_v41  ;;  %5024 = vmatprep.mubr.msk.bf16.mxu1 %vm6549_vm2, %v6548_v41 }
 0x42c   : > { %v993_v17 = vpop.f32.mrb[20].mxu1 }
 0x42d   : > { %v4906_v18 = vpop.f32.mrb[21].mxu1 }
 0x42e   : > { %v996_v19 = vpop.f32.mrb[22].mxu1 }
 0x42f   : > { %v7102_v20 = vpack.c.bf16 %v996_v19, %v993_v17  ;;  %v4907_v21 = vpop.f32.mrb[23].mxu1 }
 0x430   : > { %v1371_v21 = vld [vmem:[#allocation16 + $0x18] sm:$0xff] }
 0x431   : > { %4945 = vmatmul.mubr.msk.bf16.gmra.mrb[44].mxu0 %vm722_vm1, %v7102_v20  ;;  %5025 = vmatmul.mubr.msk.bf16.gmra.mrb[56].mxu1 %vm722_vm1, %v7102_v20 }
 0x432   : > { %4948 = vmatprep.mubr.msk.bf16.mxu0 %vm6549_vm2, %v6548_v41  ;;  %5028 = vmatprep.mubr.msk.bf16.mxu1 %vm6549_vm2, %v6548_v41 }
 0x434   : > { %v1001_v22 = vpop.f32.mrb[24].mxu1 }
 0x435   : > { %v4910_v23 = vpop.f32.mrb[25].mxu1 }
 0x436   : > { %v1004_v24 = vpop.f32.mrb[26].mxu1  ;;  %v1707_v23 = vld [vmem:[#allocation16 + $0xa8] sm:$0xff] }
 0x437   : > { %v7112_v25 = vpack.c.bf16 %v1004_v24, %v1001_v22  ;;  %v4911_v26 = vpop.f32.mrb[27].mxu1 }
 0x439   : > { %4949 = vmatmul.mubr.msk.bf16.gmra.mrb[48].mxu0 %vm722_vm1, %v7112_v25  ;;  %5029 = vmatmul.mubr.msk.bf16.gmra.mrb[60].mxu1 %vm722_vm1, %v7112_v25 }
 0x43a   : > { %4952 = vmatprep.mubr.msk.bf16.mxu0 %vm6549_vm2, %v6548_v41  ;;  %5032 = vmatprep.mubr.msk.bf16.mxu1 %vm6549_vm2, %v6548_v41 }
 0x43c   : > { %v1009_v27 = vpop.f32.mrb[28].mxu1 }
 0x43d   : > { %v4914_v28 = vpop.f32.mrb[29].mxu1 }
 0x43e   : > { %v1012_v29 = vpop.f32.mrb[30].mxu1 }
 0x43f   : > { %v7122_v30 = vpack.c.bf16 %v1012_v29, %v1009_v27  ;;  %v4915_v31 = vpop.f32.mrb[31].mxu1 }
 0x441   : > { %4953 = vmatmul.mubr.msk.bf16.gmra.mrb[52].mxu0 %vm722_vm1, %v7122_v30  ;;  %5033 = vmatmul.mubr.msk.bf16.gmra.mrb[64].mxu1 %vm722_vm1, %v7122_v30 }
 0x442   : > { %4956 = vmatprep.mubr.msk.bf16.mxu0 %vm6549_vm2, %v6548_v41  ;;  %5036 = vmatprep.mubr.msk.bf16.mxu1 %vm6549_vm2, %v6548_v41 }
 0x444   : > { %v1017_v32 = vpop.f32.mrb[32].mxu1 }
 0x445   : > { %v4918_v33 = vpop.f32.mrb[33].mxu1 }
 0x446   : > { %v1020_v34 = vpop.f32.mrb[34].mxu1  ;;  %v1372_v33 = vld [vmem:[#allocation16 + $0x20] sm:$0xff] }
 0x447   : > { %v7132_v35 = vpack.c.bf16 %v1020_v34, %v1017_v32  ;;  %v4919_v36 = vpop.f32.mrb[35].mxu1 }
 0x448   : > { %v1708_v36 = vld [vmem:[#allocation16 + $0xb0] sm:$0xff] }
 0x449   : > { %4957 = vmatmul.mubr.msk.bf16.gmra.mrb[56].mxu0 %vm722_vm1, %v7132_v35  ;;  %5037 = vmatmul.mubr.msk.bf16.gmra.mrb[68].mxu1 %vm722_vm1, %v7132_v35 }
 0x44a   : > { %4964 = vmatprep.mubr.msk.bf16.mxu0 %vm6549_vm2, %v6548_v41  ;;  %5044 = vmatprep.mubr.msk.bf16.mxu1 %vm6549_vm2, %v6548_v41 }
 0x451   : > { %4965 = vmatmul.mubr.msk.bf16.vlgmr.msra.gmra.mrb[24].mxu0 %vm722_vm1, %v6964_v1  ;;  %5045 = vmatmul.mubr.msk.bf16.vlgmr.msra.gmra.mrb[36].mxu1 %vm722_vm1, %v6964_v1 }
 0x452   : > { %5081 = vmatpush3.bf16.msra.mxu0 %v6117_v37  ;;  %5161 = vmatpush3.bf16.msra.mxu1 %v6118_v38 }
 0x453   : > { %4968 = vmatprep.mubr.msk.bf16.mxu0 %vm6549_vm2, %v6548_v41  ;;  %5048 = vmatprep.mubr.msk.bf16.mxu1 %vm6549_vm2, %v6548_v41 }
 0x454   : > { %5082 = vmatprep.subr.bf16.mxu0 %v6548_v41  ;;  %5162 = vmatprep.subr.bf16.mxu1 %v6548_v41 }
 0x456   : > { %5083 = vmatpush3.bf16.msra.mxu0 %v6119_v39  ;;  %5163 = vmatpush3.bf16.msra.mxu1 %v6120_v40 }
 0x457   : > { %5120 = vmatprep.subr.bf16.mxu0 %v6548_v41  ;;  %5200 = vmatprep.subr.bf16.mxu1 %v6548_v41 }
 0x459   : > { %4969 = vmatmul.mubr.msk.bf16.gmra.mrb[28].mxu0 %vm722_vm1, %v6968_v2  ;;  %5049 = vmatmul.mubr.msk.bf16.gmra.mrb[40].mxu1 %vm722_vm1, %v6968_v2 }
 0x45a   : > { %4972 = vmatprep.mubr.msk.bf16.mxu0 %vm6549_vm2, %v6548_v41  ;;  %5052 = vmatprep.mubr.msk.bf16.mxu1 %vm6549_vm2, %v6548_v41 }
 0x461   : > { %4973 = vmatmul.mubr.msk.bf16.gmra.mrb[32].mxu0 %vm722_vm1, %v6972_v3  ;;  %5053 = vmatmul.mubr.msk.bf16.gmra.mrb[44].mxu1 %vm722_vm1, %v6972_v3 }
 0x462   : > { %4976 = vmatprep.mubr.msk.bf16.mxu0 %vm6549_vm2, %v6548_v41  ;;  %5056 = vmatprep.mubr.msk.bf16.mxu1 %vm6549_vm2, %v6548_v41 }
 0x469   : > { %4977 = vmatmul.mubr.msk.bf16.gmra.mrb[36].mxu0 %vm722_vm1, %v6975_v4  ;;  %5057 = vmatmul.mubr.msk.bf16.gmra.mrb[48].mxu1 %vm722_vm1, %v6975_v4 }
 0x46a   : > { %4980 = vmatprep.mubr.msk.bf16.mxu0 %vm6549_vm2, %v6548_v41  ;;  %5060 = vmatprep.mubr.msk.bf16.mxu1 %vm6549_vm2, %v6548_v41 }
 0x471   : > { %4981 = vmatmul.mubr.msk.bf16.gmra.mrb[40].mxu0 %vm722_vm1, %v6981_v6  ;;  %5061 = vmatmul.mubr.msk.bf16.gmra.mrb[52].mxu1 %vm722_vm1, %v6981_v6 }
 0x472   : > { %4984 = vmatprep.mubr.msk.bf16.mxu0 %vm6549_vm2, %v6548_v41  ;;  %5064 = vmatprep.mubr.msk.bf16.mxu1 %vm6549_vm2, %v6548_v41 }
 0x479   : > { %4985 = vmatmul.mubr.msk.bf16.gmra.mrb[44].mxu0 %vm722_vm1, %v6984_v7  ;;  %5065 = vmatmul.mubr.msk.bf16.gmra.mrb[56].mxu1 %vm722_vm1, %v6984_v7 }
 0x47a   : > { %4988 = vmatprep.mubr.msk.bf16.mxu0 %vm6549_vm2, %v6548_v41  ;;  %5068 = vmatprep.mubr.msk.bf16.mxu1 %vm6549_vm2, %v6548_v41 }
 0x481   : > { %4989 = vmatmul.mubr.msk.bf16.gmra.mrb[48].mxu0 %vm722_vm1, %v6988_v8  ;;  %5069 = vmatmul.mubr.msk.bf16.gmra.mrb[60].mxu1 %vm722_vm1, %v6988_v8 }
 0x482   : > { %4992 = vmatprep.mubr.msk.bf16.mxu0 %vm6549_vm2, %v6548_v41  ;;  %5072 = vmatprep.mubr.msk.bf16.mxu1 %vm6549_vm2, %v6548_v41 }
 0x489   : > { %4993 = vmatmul.mubr.msk.bf16.gmra.mrb[52].mxu0 %vm722_vm1, %v6992_v9  ;;  %5073 = vmatmul.mubr.msk.bf16.gmra.mrb[64].mxu1 %vm722_vm1, %v6992_v9 }
 0x48a   : > { %4996 = vmatprep.mubr.msk.bf16.mxu0 %vm6549_vm2, %v6548_v41  ;;  %5076 = vmatprep.mubr.msk.bf16.mxu1 %vm6549_vm2, %v6548_v41 }
 0x491   : > { %4997 = vmatmul.mubr.msk.bf16.gmra.mrb[56].mxu0 %vm722_vm1, %v6996_v10  ;;  %5077 = vmatmul.mubr.msk.bf16.gmra.mrb[68].mxu1 %vm722_vm1, %v6996_v10 }
 0x492   : > { %5084 = vmatprep.mubr.msk.bf16.mxu0 %vm6549_vm2, %v6548_v41  ;;  %5164 = vmatprep.mubr.msk.bf16.mxu1 %vm6549_vm2, %v6548_v41 }
 0x499   : > { %5085 = vmatmul.mubr.msk.bf16.vlgmr.msra.gmra.mrb[60].mxu0 %vm722_vm1, %v7048_v48  ;;  %5165 = vmatmul.mubr.msk.bf16.vlgmr.msra.gmra.mrb[72].mxu1 %vm722_vm1, %v7048_v48 }
 0x49a   : > { %5121 = vmatpush3.bf16.msra.mxu0 %v6121_v42  ;;  %5201 = vmatpush3.bf16.msra.mxu1 %v6122_v43 }
 0x49b   : > { %5088 = vmatprep.mubr.msk.bf16.mxu0 %vm6549_vm2, %v6548_v41  ;;  %5168 = vmatprep.mubr.msk.bf16.mxu1 %vm6549_vm2, %v6548_v41 }
 0x49c   : > { %5122 = vmatprep.subr.bf16.mxu0 %v6548_v41  ;;  %5202 = vmatprep.subr.bf16.mxu1 %v6548_v41 }
 0x49e   : > { %5123 = vmatpush3.bf16.msra.mxu0 %v6123_v44  ;;  %5203 = vmatpush3.bf16.msra.mxu1 %v6124_v45  ;;  %v7416_v44 = vld [vmem:[%s6937_s17 + $0x8] sm:$0xff]  }
 0x49f   : > { %5240 = vmatprep.subr.bf16.mxu0 %v6548_v41  ;;  %5280 = vmatprep.subr.bf16.mxu1 %v6548_v41 }
 0x4a1   : > { %5089 = vmatmul.mubr.msk.bf16.gmra.mrb[64].mxu0 %vm722_vm1, %v7060_v55  ;;  %5169 = vmatmul.mubr.msk.bf16.gmra.mrb[76].mxu1 %vm722_vm1, %v7060_v55 }
 0x4a2   : > { %5092 = vmatprep.mubr.msk.bf16.mxu0 %vm6549_vm2, %v6548_v41  ;;  %5172 = vmatprep.mubr.msk.bf16.mxu1 %vm6549_vm2, %v6548_v41 }
 0x4a9   : > { %5093 = vmatmul.mubr.msk.bf16.gmra.mrb[68].mxu0 %vm722_vm1, %v7072_v60  ;;  %5173 = vmatmul.mubr.msk.bf16.gmra.mrb[80].mxu1 %vm722_vm1, %v7072_v60 }
 0x4aa   : > { %5096 = vmatprep.mubr.msk.bf16.mxu0 %vm6549_vm2, %v6548_v41  ;;  %5176 = vmatprep.mubr.msk.bf16.mxu1 %vm6549_vm2, %v6548_v41 }
 0x4b1   : > { %5097 = vmatmul.mubr.msk.bf16.gmra.mrb[72].mxu0 %vm722_vm1, %v7082_v5  ;;  %5177 = vmatmul.mubr.msk.bf16.gmra.mrb[84].mxu1 %vm722_vm1, %v7082_v5 }
 0x4b2   : > { %5100 = vmatprep.mubr.msk.bf16.mxu0 %vm6549_vm2, %v6548_v41  ;;  %5180 = vmatprep.mubr.msk.bf16.mxu1 %vm6549_vm2, %v6548_v41 }
 0x4b9   : > { %5101 = vmatmul.mubr.msk.bf16.gmra.mrb[76].mxu0 %vm722_vm1, %v7092_v15  ;;  %5181 = vmatmul.mubr.msk.bf16.gmra.mrb[88].mxu1 %vm722_vm1, %v7092_v15 }
 0x4ba   : > { %5104 = vmatprep.mubr.msk.bf16.mxu0 %vm6549_vm2, %v6548_v41  ;;  %5184 = vmatprep.mubr.msk.bf16.mxu1 %vm6549_vm2, %v6548_v41 }
 0x4c1   : > { %5105 = vmatmul.mubr.msk.bf16.gmra.mrb[80].mxu0 %vm722_vm1, %v7102_v20  ;;  %5185 = vmatmul.mubr.msk.bf16.gmra.mrb[92].mxu1 %vm722_vm1, %v7102_v20 }
 0x4c2   : > { %5108 = vmatprep.mubr.msk.bf16.mxu0 %vm6549_vm2, %v6548_v41  ;;  %5188 = vmatprep.mubr.msk.bf16.mxu1 %vm6549_vm2, %v6548_v41 }
 0x4c9   : > { %5109 = vmatmul.mubr.msk.bf16.gmra.mrb[84].mxu0 %vm722_vm1, %v7112_v25  ;;  %5189 = vmatmul.mubr.msk.bf16.gmra.mrb[96].mxu1 %vm722_vm1, %v7112_v25 }
 0x4ca   : > { %5112 = vmatprep.mubr.msk.bf16.mxu0 %vm6549_vm2, %v6548_v41  ;;  %5192 = vmatprep.mubr.msk.bf16.mxu1 %vm6549_vm2, %v6548_v41 }
 0x4d1   : > { %5113 = vmatmul.mubr.msk.bf16.gmra.mrb[88].mxu0 %vm722_vm1, %v7122_v30  ;;  %5193 = vmatmul.mubr.msk.bf16.gmra.mrb[100].mxu1 %vm722_vm1, %v7122_v30 }
 0x4d2   : > { %5116 = vmatprep.mubr.msk.bf16.mxu0 %vm6549_vm2, %v6548_v41  ;;  %5196 = vmatprep.mubr.msk.bf16.mxu1 %vm6549_vm2, %v6548_v41 }
 0x4d9   : > { %5117 = vmatmul.mubr.msk.bf16.gmra.mrb[92].mxu0 %vm722_vm1, %v7132_v35  ;;  %5197 = vmatmul.mubr.msk.bf16.gmra.mrb[104].mxu1 %vm722_vm1, %v7132_v35 }
 0x4da   : > { %5124 = vmatprep.mubr.msk.bf16.mxu0 %vm6549_vm2, %v6548_v41  ;;  %5204 = vmatprep.mubr.msk.bf16.mxu1 %vm6549_vm2, %v6548_v41 }
 0x4e1   : > { %5125 = vmatmul.mubr.msk.bf16.vlgmr.msra.gmra.mrb[60].mxu0 %vm722_vm1, %v6964_v1  ;;  %5205 = vmatmul.mubr.msk.bf16.vlgmr.msra.gmra.mrb[72].mxu1 %vm722_vm1, %v6964_v1  ;;  %v1347_v1 = vlaneseq }
 0x4e2   : > { %5241 = vmatpush3.bf16.msra.mxu0 %v6125_v46  ;;  %5281 = vmatpush3.bf16.msra.mxu1 %v6126_v47 }
 0x4e3   : > { %5128 = vmatprep.mubr.msk.bf16.mxu0 %vm6549_vm2, %v6548_v41  ;;  %5208 = vmatprep.mubr.msk.bf16.mxu1 %vm6549_vm2, %v6548_v41 }
 0x4e4   : > { %5242 = vmatprep.subr.bf16.mxu0 %v6548_v41  ;;  %5282 = vmatprep.subr.bf16.mxu1 %v6548_v41 }
 0x4e6   : > { %5243 = vmatpush3.bf16.msra.mxu0 %v6127_v49  ;;  %5283 = vmatpush3.bf16.msra.mxu1 %v6128_v50 }
 0x4e7   : > { %5320 = vmatprep.subr.bf16.mxu0 %v6548_v41  ;;  %5400 = vmatprep.subr.bf16.mxu1 %v6548_v41 }
 0x4e9   : > { %5129 = vmatmul.mubr.msk.bf16.gmra.mrb[64].mxu0 %vm722_vm1, %v6968_v2  ;;  %5209 = vmatmul.mubr.msk.bf16.gmra.mrb[76].mxu1 %vm722_vm1, %v6968_v2  ;;  %v7366_v2 = vshrl.u32 %v1347_v1, 7 }
 0x4ea   : > { %5132 = vmatprep.mubr.msk.bf16.mxu0 %vm6549_vm2, %v6548_v41  ;;  %5212 = vmatprep.mubr.msk.bf16.mxu1 %vm6549_vm2, %v6548_v41 }
 0x4eb   : > { %vm1349_vm5 = vcmp.lt.s32.totalorder %v7366_v2, 5  ;;  %vm1684_vm6 = vcmp.lt.s32.totalorder %v7366_v2, 4  ;;  %vm2020_vm7 = vcmp.lt.s32.totalorder %v7366_v2, 3  ;;  %vm2356_vm8 = vcmp.lt.s32.totalorder %v7366_v2, 1 }
 0x4ec   : > { %vm2954_vm9 = vcmp.lt.s32.totalorder %v7366_v2, 7 }
 0x4f1   : > { %5133 = vmatmul.mubr.msk.bf16.gmra.mrb[68].mxu0 %vm722_vm1, %v6972_v3  ;;  %5213 = vmatmul.mubr.msk.bf16.gmra.mrb[80].mxu1 %vm722_vm1, %v6972_v3 }
 0x4f2   : > { %5136 = vmatprep.mubr.msk.bf16.mxu0 %vm6549_vm2, %v6548_v41  ;;  %5216 = vmatprep.mubr.msk.bf16.mxu1 %vm6549_vm2, %v6548_v41 }
 0x4f9   : > { %5137 = vmatmul.mubr.msk.bf16.gmra.mrb[72].mxu0 %vm722_vm1, %v6975_v4  ;;  %5217 = vmatmul.mubr.msk.bf16.gmra.mrb[84].mxu1 %vm722_vm1, %v6975_v4 }
 0x4fa   : > { %5140 = vmatprep.mubr.msk.bf16.mxu0 %vm6549_vm2, %v6548_v41  ;;  %5220 = vmatprep.mubr.msk.bf16.mxu1 %vm6549_vm2, %v6548_v41 }
 0x501   : > { %5141 = vmatmul.mubr.msk.bf16.gmra.mrb[76].mxu0 %vm722_vm1, %v6981_v6  ;;  %5221 = vmatmul.mubr.msk.bf16.gmra.mrb[88].mxu1 %vm722_vm1, %v6981_v6 }
 0x502   : > { %5144 = vmatprep.mubr.msk.bf16.mxu0 %vm6549_vm2, %v6548_v41  ;;  %5224 = vmatprep.mubr.msk.bf16.mxu1 %vm6549_vm2, %v6548_v41 }
 0x509   : > { %5145 = vmatmul.mubr.msk.bf16.gmra.mrb[80].mxu0 %vm722_vm1, %v6984_v7  ;;  %5225 = vmatmul.mubr.msk.bf16.gmra.mrb[92].mxu1 %vm722_vm1, %v6984_v7 }
 0x50a   : > { %5148 = vmatprep.mubr.msk.bf16.mxu0 %vm6549_vm2, %v6548_v41  ;;  %5228 = vmatprep.mubr.msk.bf16.mxu1 %vm6549_vm2, %v6548_v41 }
 0x511   : > { %5149 = vmatmul.mubr.msk.bf16.gmra.mrb[84].mxu0 %vm722_vm1, %v6988_v8  ;;  %5229 = vmatmul.mubr.msk.bf16.gmra.mrb[96].mxu1 %vm722_vm1, %v6988_v8  ;;  %v1370_v8 = vld [vmem:[#allocation16 + $0x10] sm:$0xff] }
 0x512   : > { %5152 = vmatprep.mubr.msk.bf16.mxu0 %vm6549_vm2, %v6548_v41  ;;  %5232 = vmatprep.mubr.msk.bf16.mxu1 %vm6549_vm2, %v6548_v41 }
 0x519   : > { %5153 = vmatmul.mubr.msk.bf16.gmra.mrb[88].mxu0 %vm722_vm1, %v6992_v9  ;;  %5233 = vmatmul.mubr.msk.bf16.gmra.mrb[100].mxu1 %vm722_vm1, %v6992_v9 }
 0x51a   : > { %5156 = vmatprep.mubr.msk.bf16.mxu0 %vm6549_vm2, %v6548_v41  ;;  %5236 = vmatprep.mubr.msk.bf16.mxu1 %vm6549_vm2, %v6548_v41 }
 0x521   : > { %5157 = vmatmul.mubr.msk.bf16.gmra.mrb[92].mxu0 %vm722_vm1, %v6996_v10  ;;  %5237 = vmatmul.mubr.msk.bf16.gmra.mrb[104].mxu1 %vm722_vm1, %v6996_v10 }
 0x522   : > { %5244 = vmatprep.mubr.msk.bf16.mxu0 %vm6549_vm2, %v6548_v41  ;;  %5284 = vmatprep.mubr.msk.bf16.mxu1 %vm6549_vm2, %v6548_v41 }
 0x524   : > { %v7372_v3 = vpop.f32.mrb[24].mxu0  ;;  %v7374_v4 = vpop.f32.mrb[36].mxu1 }
 0x525   : > { %v4966_v6 = vpop.f32.mrb[25].mxu0  ;;  %v5046_v7 = vpop.f32.mrb[37].mxu1  ;;  %v1329_v54 = vrot.slane %v7372_v3, 3  ;;  %v1666_v56 = vrot.slane %v7374_v4, 4  ;;  %v7587_v3 = vld [vmem:[%s6937_s17 + $0x40] sm:$0xff]  }
 0x526   : > { %v1261_v9 = vpop.f32.mrb[26].mxu0  ;;  %v1598_v10 = vpop.f32.mrb[38].mxu1  ;;  %v1373_v7 = vld [vmem:[#allocation16 + $0x28] sm:$0xff] }
 0x527   : > { %v1330_v57 = vrot.slane %v1261_v9, 3  ;;  %v1667_v58 = vrot.slane %v1598_v10, 4  ;;  %v4967_v59 = vpop.f32.mrb[27].mxu0  ;;  %v5047_v61 = vpop.f32.mrb[39].mxu1  ;;  %v1709_v9 = vld [vmem:[#allocation16 + $0xb8] sm:$0xff] }
 0x528   : > { %v1374_v61 = vld [vmem:[#allocation16 + $0x30] sm:$0xff] }
 0x529   : > { %v1366_v62 = vsel %vm1349_vm5, %v1329_v54, %v1330_v57  ;;  %v1701_v63 = vsel %vm1684_vm6, %v1666_v56, %v1667_v58  ;;  %5245 = vmatmul.mubr.msk.bf16.vlgmr.msra.gmra.mrb[96].mxu0 %vm722_vm1, %v7048_v48  ;;  %5285 = vmatmul.mubr.msk.bf16.vlgmr.msra.gmra.mrb[108].mxu1 %vm722_vm1, %v7391_v0 }
 0x52a   : > { %v1388_v11 = vmul.f32 %v1370_v8, %v1366_v62  ;;  %v1724_v12 = vmul.f32 %v1706_v51, %v1701_v63  ;;  %5321 = vmatpush3.bf16.msra.mxu0 %v6129_v52  ;;  %5401 = vmatpush3.bf16.msra.mxu1 %v6130_v53  ;;  %v1710_v63 = vld [vmem:[#allocation16 + $0xc0] sm:$0xff] }
 0x52b   : > { %5248 = vmatprep.mubr.msk.bf16.mxu0 %vm6549_vm2, %v6548_v41  ;;  %5288 = vmatprep.mubr.msk.bf16.mxu1 %vm6549_vm2, %v6548_v41 }
 0x52c   : > { %v7399_v16 = vadd.f32 %v1724_v12, %v1388_v11  ;;  %v1266_v17 = vpop.f32.mrb[28].mxu0  ;;  %v1603_v18 = vpop.f32.mrb[40].mxu1  ;;  %5322 = vmatprep.subr.bf16.mxu0 %v6548_v41  ;;  %5402 = vmatprep.subr.bf16.mxu1 %v6548_v41 }
 0x52d   : > { %v1331_v19 = vrot.slane %v1266_v17, 3  ;;  %v1668_v22 = vrot.slane %v1603_v18, 4  ;;  %v4970_v24 = vpop.f32.mrb[29].mxu0  ;;  %v5050_v26 = vpop.f32.mrb[41].mxu1 }
 0x52e   : > { %v1269_v27 = vpop.f32.mrb[30].mxu0  ;;  %v1606_v28 = vpop.f32.mrb[42].mxu1  ;;  %5323 = vmatpush3.bf16.msra.mxu0 %v6131_v13  ;;  %5403 = vmatpush3.bf16.msra.mxu1 %v6132_v14 }
 0x52f   : > { %v1365_v29 = vsel %vm1349_vm5, %v1330_v57, %v1331_v19  ;;  %v1700_v31 = vsel %vm1684_vm6, %v1667_v58, %v1668_v22  ;;  %v1332_v32 = vrot.slane %v1269_v27, 3  ;;  %v1669_v34 = vrot.slane %v1606_v28, 4  ;;  %v4971_v37 = vpop.f32.mrb[31].mxu0  ;;  %v5051_v38 = vpop.f32.mrb[43].mxu1  ;;  %5360 = vmatprep.subr.bf16.mxu0 %v6548_v41  ;;  %5440 = vmatprep.subr.bf16.mxu1 %v6548_v41 }
 0x530   : > { %v1389_v39 = vmul.f32 %v1371_v21, %v1365_v29  ;;  %v1725_v40 = vmul.f32 %v1707_v23, %v1700_v31  ;;  %v1375_v29 = vld [vmem:[#allocation16 + $0x38] sm:$0xff] }
 0x531   : > { %v1364_v42 = vsel %vm1349_vm5, %v1331_v19, %v1332_v32  ;;  %v1699_v43 = vsel %vm1684_vm6, %v1668_v22, %v1669_v34  ;;  %5249 = vmatmul.mubr.msk.bf16.gmra.mrb[100].mxu0 %vm722_vm1, %v7060_v55  ;;  %5289 = vmatmul.mubr.msk.bf16.gmra.mrb[112].mxu1 %vm722_vm1, %v7416_v44  ;;  %v7439_v19 = vld [vmem:[%s6937_s17 + $0x10] sm:$0xff]  }
 0x532   : > { %v7420_v45 = vadd.f32 %v1725_v40, %v1389_v39  ;;  %v1390_v46 = vmul.f32 %v1372_v33, %v1364_v42  ;;  %v1726_v47 = vmul.f32 %v1708_v36, %v1699_v43  ;;  %5252 = vmatprep.mubr.msk.bf16.mxu0 %vm6549_vm2, %v6548_v41  ;;  %5292 = vmatprep.mubr.msk.bf16.mxu1 %vm6549_vm2, %v6548_v41  ;;  %v1376_v42 = vld [vmem:[#allocation16 + $0x40] sm:$0xff] }
 0x534   : > { %v7426_v49 = vadd.f32 %v1726_v47, %v1390_v46  ;;  %v1274_v50 = vpop.f32.mrb[32].mxu0  ;;  %v1611_v1 = vpop.f32.mrb[44].mxu1  ;;  %v1712_v46 = vld [vmem:[#allocation16 + $0xd0] sm:$0xff] }
 0x535   : > { %v1333_v6 = vrot.slane %v1274_v50, 3  ;;  %v1670_v8 = vrot.slane %v1611_v1, 4  ;;  %v4974_v10 = vpop.f32.mrb[33].mxu0  ;;  %v5054_v51 = vpop.f32.mrb[45].mxu1 }
 0x536   : > { %v1277_v52 = vpop.f32.mrb[34].mxu0  ;;  %v1614_v53 = vpop.f32.mrb[46].mxu1 }
 0x537   : > { %v1363_v57 = vsel %vm1349_vm5, %v1332_v32, %v1333_v6  ;;  %v1698_v58 = vsel %vm1684_vm6, %v1669_v34, %v1670_v8  ;;  %v1334_v59 = vrot.slane %v1277_v52, 3  ;;  %v1671_v62 = vrot.slane %v1614_v53, 4  ;;  %v4975_v11 = vpop.f32.mrb[35].mxu0  ;;  %v5055_v12 = vpop.f32.mrb[47].mxu1  ;;  %v1711_v32 = vld [vmem:[#allocation16 + $0xc8] sm:$0xff] }
 0x538   : > { %v1391_v13 = vmul.f32 %v1373_v7, %v1363_v57  ;;  %v1727_v14 = vmul.f32 %v1709_v9, %v1698_v58  ;;  %v7462_v9 = vld [vmem:[%s6937_s17 + $0x18] sm:$0xff]  }
 0x539   : > { %v1362_v17 = vsel %vm1349_vm5, %v1333_v6, %v1334_v59  ;;  %v1697_v18 = vsel %vm1684_vm6, %v1670_v8, %v1671_v62  ;;  %5253 = vmatmul.mubr.msk.bf16.gmra.mrb[104].mxu0 %vm722_vm1, %v7072_v60  ;;  %5293 = vmatmul.mubr.msk.bf16.gmra.mrb[116].mxu1 %vm722_vm1, %v7439_v19 }
 0x53a   : > { %v7443_v21 = vadd.f32 %v1727_v14, %v1391_v13  ;;  %v1392_v22 = vmul.f32 %v1374_v61, %v1362_v17  ;;  %v1728_v23 = vmul.f32 %v1710_v63, %v1697_v18  ;;  %5256 = vmatprep.mubr.msk.bf16.mxu0 %vm6549_vm2, %v6548_v41  ;;  %5296 = vmatprep.mubr.msk.bf16.mxu1 %vm6549_vm2, %v6548_v41  ;;  %v1377_v61 = vld [vmem:[#allocation16 + $0x48] sm:$0xff]  ;;  %v1713_v63 = vld [vmem:[#allocation16 + $0xd8] sm:$0xff] }
 0x53c   : > { %v7449_v24 = vadd.f32 %v1728_v23, %v1392_v22  ;;  %v1282_v26 = vpop.f32.mrb[36].mxu0  ;;  %v1619_v27 = vpop.f32.mrb[48].mxu1  ;;  %v1378_v23 = vld [vmem:[#allocation16 + $0x50] sm:$0xff] }
 0x53d   : > { %v1335_v28 = vrot.slane %v1282_v26, 3  ;;  %v1672_v31 = vrot.slane %v1619_v27, 4  ;;  %v4978_v33 = vpop.f32.mrb[37].mxu0  ;;  %v5058_v34 = vpop.f32.mrb[49].mxu1  ;;  %v1714_v27 = vld [vmem:[#allocation16 + $0xe0] sm:$0xff] }
 0x53e   : > { %v1285_v36 = vpop.f32.mrb[38].mxu0  ;;  %v1622_v37 = vpop.f32.mrb[50].mxu1 }
 0x53f   : > { %v1361_v38 = vsel %vm1349_vm5, %v1334_v59, %v1335_v28  ;;  %v1696_v39 = vsel %vm1684_vm6, %v1671_v62, %v1672_v31  ;;  %v1336_v40 = vrot.slane %v1285_v36, 3  ;;  %v1673_v43 = vrot.slane %v1622_v37, 4  ;;  %v4979_v47 = vpop.f32.mrb[39].mxu0  ;;  %v5059_v50 = vpop.f32.mrb[51].mxu1  ;;  %v7485_v36 = vld [vmem:[%s6937_s17 + $0x20] sm:$0xff]  }
 0x540   : > { %v1393_v1 = vmul.f32 %v1375_v29, %v1361_v38  ;;  %v1729_v6 = vmul.f32 %v1711_v32, %v1696_v39  ;;  %v1379_v47 = vld [vmem:[#allocation16 + $0x58] sm:$0xff] }
 0x541   : > { %v1360_v7 = vsel %vm1349_vm5, %v1335_v28, %v1336_v40  ;;  %v1695_v8 = vsel %vm1684_vm6, %v1672_v31, %v1673_v43  ;;  %5257 = vmatmul.mubr.msk.bf16.gmra.mrb[108].mxu0 %vm722_vm1, %v7082_v5  ;;  %5297 = vmatmul.mubr.msk.bf16.gmra.mrb[120].mxu1 %vm722_vm1, %v7462_v9 }
 0x542   : > { %v7466_v10 = vadd.f32 %v1729_v6, %v1393_v1  ;;  %v1394_v51 = vmul.f32 %v1376_v42, %v1360_v7  ;;  %v1730_v52 = vmul.f32 %v1712_v46, %v1695_v8  ;;  %5260 = vmatprep.mubr.msk.bf16.mxu0 %vm6549_vm2, %v6548_v41  ;;  %5300 = vmatprep.mubr.msk.bf16.mxu1 %vm6549_vm2, %v6548_v41  ;;  %v1715_v1 = vld [vmem:[#allocation16 + $0xe8] sm:$0xff] }
 0x544   : > { %v7472_v53 = vadd.f32 %v1730_v52, %v1394_v51  ;;  %v1290_v57 = vpop.f32.mrb[40].mxu0  ;;  %v1627_v58 = vpop.f32.mrb[52].mxu1 }
 0x545   : > { %v1337_v59 = vrot.slane %v1290_v57, 3  ;;  %v1674_v62 = vrot.slane %v1627_v58, 4  ;;  %v4982_v11 = vpop.f32.mrb[41].mxu0  ;;  %v5062_v12 = vpop.f32.mrb[53].mxu1 }
 0x546   : > { %v1293_v13 = vpop.f32.mrb[42].mxu0  ;;  %v1630_v14 = vpop.f32.mrb[54].mxu1 }
 0x547   : > { %v1359_v17 = vsel %vm1349_vm5, %v1336_v40, %v1337_v59  ;;  %v1694_v18 = vsel %vm1684_vm6, %v1673_v43, %v1674_v62  ;;  %v1338_v22 = vrot.slane %v1293_v13, 3  ;;  %v1675_v26 = vrot.slane %v1630_v14, 4  ;;  %v4983_v28 = vpop.f32.mrb[43].mxu0  ;;  %v5063_v29 = vpop.f32.mrb[55].mxu1 }
 0x548   : > { %v1395_v31 = vmul.f32 %v1377_v61, %v1359_v17  ;;  %v1731_v32 = vmul.f32 %v1713_v63, %v1694_v18  ;;  %v7508_v18 = vld [vmem:[%s6937_s17 + $0x28] sm:$0xff]  }
 0x549   : > { %v1358_v33 = vsel %vm1349_vm5, %v1337_v59, %v1338_v22  ;;  %v1693_v34 = vsel %vm1684_vm6, %v1674_v62, %v1675_v26  ;;  %5261 = vmatmul.mubr.msk.bf16.gmra.mrb[112].mxu0 %vm722_vm1, %v7092_v15  ;;  %5301 = vmatmul.mubr.msk.bf16.gmra.mrb[124].mxu1 %vm722_vm1, %v7485_v36  ;;  %v1380_v59 = vld [vmem:[#allocation16 + $0x60] sm:$0xff]  ;;  %v1716_v62 = vld [vmem:[#allocation16 + $0xf0] sm:$0xff] }
 0x54a   : > { %v7489_v37 = vadd.f32 %v1731_v32, %v1395_v31  ;;  %v1396_v38 = vmul.f32 %v1378_v23, %v1358_v33  ;;  %v1732_v39 = vmul.f32 %v1714_v27, %v1693_v34  ;;  %5264 = vmatprep.mubr.msk.bf16.mxu0 %vm6549_vm2, %v6548_v41  ;;  %5304 = vmatprep.mubr.msk.bf16.mxu1 %vm6549_vm2, %v6548_v41  ;;  %v1381_v32 = vld [vmem:[#allocation16 + $0x68] sm:$0xff]  ;;  %v1717_v34 = vld [vmem:[#allocation16 + $0xf8] sm:$0xff] }
 0x54c   : > { %v7495_v40 = vadd.f32 %v1732_v39, %v1396_v38  ;;  %v1298_v42 = vpop.f32.mrb[44].mxu0  ;;  %v1635_v43 = vpop.f32.mrb[56].mxu1 }
 0x54d   : > { %v1339_v46 = vrot.slane %v1298_v42, 3  ;;  %v1676_v50 = vrot.slane %v1635_v43, 4  ;;  %v4986_v6 = vpop.f32.mrb[45].mxu0  ;;  %v5066_v7 = vpop.f32.mrb[57].mxu1 }
 0x54e   : > { %v1301_v8 = vpop.f32.mrb[46].mxu0  ;;  %v1638_v51 = vpop.f32.mrb[58].mxu1  ;;  %v1718_v7 = vld [vmem:[#allocation16 + $0x100] sm:$0xff] }
 0x54f   : > { %v1357_v52 = vsel %vm1349_vm5, %v1338_v22, %v1339_v46  ;;  %v1692_v57 = vsel %vm1684_vm6, %v1675_v26, %v1676_v50  ;;  %v1340_v58 = vrot.slane %v1301_v8, 3  ;;  %v1677_v61 = vrot.slane %v1638_v51, 4  ;;  %v4987_v63 = vpop.f32.mrb[47].mxu0  ;;  %v5067_v11 = vpop.f32.mrb[59].mxu1 }
 0x550   : > { %v1397_v12 = vmul.f32 %v1379_v47, %v1357_v52  ;;  %v1733_v13 = vmul.f32 %v1715_v1, %v1692_v57  ;;  %v1382_v1 = vld [vmem:[#allocation16 + $0x70] sm:$0xff] }
 0x551   : > { %v1356_v14 = vsel %vm1349_vm5, %v1339_v46, %v1340_v58  ;;  %v1691_v17 = vsel %vm1684_vm6, %v1676_v50, %v1677_v61  ;;  %5265 = vmatmul.mubr.msk.bf16.gmra.mrb[116].mxu0 %vm722_vm1, %v7102_v20  ;;  %5305 = vmatmul.mubr.msk.bf16.gmra.mrb[128].mxu1 %vm722_vm1, %v7508_v18 }
 0x552   : > { %v7512_v22 = vadd.f32 %v1733_v13, %v1397_v12  ;;  %v1398_v23 = vmul.f32 %v1380_v59, %v1356_v14  ;;  %v1734_v26 = vmul.f32 %v1716_v62, %v1691_v17  ;;  %5268 = vmatprep.mubr.msk.bf16.mxu0 %vm6549_vm2, %v6548_v41  ;;  %5308 = vmatprep.mubr.msk.bf16.mxu1 %vm6549_vm2, %v6548_v41 }
 0x554   : > { %v7518_v27 = vadd.f32 %v1734_v26, %v1398_v23  ;;  %v1306_v28 = vpop.f32.mrb[48].mxu0  ;;  %v1643_v29 = vpop.f32.mrb[60].mxu1  ;;  %v1383_v23 = vld [vmem:[#allocation16 + $0x78] sm:$0xff] }
 0x555   : > { %v1341_v31 = vrot.slane %v1306_v28, 3  ;;  %v1678_v33 = vrot.slane %v1643_v29, 4  ;;  %v4990_v38 = vpop.f32.mrb[49].mxu0  ;;  %v5070_v39 = vpop.f32.mrb[61].mxu1  ;;  %v1719_v28 = vld [vmem:[#allocation16 + $0x108] sm:$0xff] }
 0x556   : > { %v1309_v42 = vpop.f32.mrb[50].mxu0  ;;  %v1646_v43 = vpop.f32.mrb[62].mxu1 }
 0x557   : > { %v1355_v46 = vsel %vm1349_vm5, %v1340_v58, %v1341_v31  ;;  %v1690_v47 = vsel %vm1684_vm6, %v1677_v61, %v1678_v33  ;;  %v1342_v50 = vrot.slane %v1309_v42, 3  ;;  %v1679_v6 = vrot.slane %v1646_v43, 4  ;;  %v4991_v8 = vpop.f32.mrb[51].mxu0  ;;  %v5071_v51 = vpop.f32.mrb[63].mxu1  ;;  %v7531_v58 = vld [vmem:[%s6937_s17 + $0x30] sm:$0xff]  }
 0x558   : > { %v1399_v52 = vmul.f32 %v1381_v32, %v1355_v46  ;;  %v1735_v57 = vmul.f32 %v1717_v34, %v1690_v47  ;;  %v1384_v42 = vld [vmem:[#allocation16 + $0x80] sm:$0xff]  ;;  %v1720_v46 = vld [vmem:[#allocation16 + $0x110] sm:$0xff] }
 0x559   : > { %v1354_v59 = vsel %vm1349_vm5, %v1341_v31, %v1342_v50  ;;  %v1689_v62 = vsel %vm1684_vm6, %v1678_v33, %v1679_v6  ;;  %5269 = vmatmul.mubr.msk.bf16.gmra.mrb[120].mxu0 %vm722_vm1, %v7112_v25  ;;  %5309 = vmatmul.mubr.msk.bf16.gmra.mrb[132].mxu1 %vm722_vm1, %v7531_v58 }
 0x55a   : > { %v7535_v61 = vadd.f32 %v1735_v57, %v1399_v52  ;;  %v1400_v63 = vmul.f32 %v1382_v1, %v1354_v59  ;;  %v1736_v11 = vmul.f32 %v1718_v7, %v1689_v62  ;;  %5272 = vmatprep.mubr.msk.bf16.mxu0 %vm6549_vm2, %v6548_v41  ;;  %5312 = vmatprep.mubr.msk.bf16.mxu1 %vm6549_vm2, %v6548_v41 }
 0x55c   : > { %v7541_v12 = vadd.f32 %v1736_v11, %v1400_v63  ;;  %v1314_v13 = vpop.f32.mrb[52].mxu0  ;;  %v1651_v14 = vpop.f32.mrb[64].mxu1 }
 0x55d   : > { %v1343_v17 = vrot.slane %v1314_v13, 3  ;;  %v1680_v26 = vrot.slane %v1651_v14, 4  ;;  %v4994_v29 = vpop.f32.mrb[53].mxu0  ;;  %v5074_v31 = vpop.f32.mrb[65].mxu1  ;;  %v1385_v14 = vld [vmem:[#allocation16 + $0x88] sm:$0xff] }
 0x55e   : > { %v1317_v32 = vpop.f32.mrb[54].mxu0  ;;  %v1654_v33 = vpop.f32.mrb[66].mxu1  ;;  %v1368_v31 = vld [vmem:[#allocation16] sm:$0xff] }
 0x55f   : > { %v1353_v34 = vsel %vm1349_vm5, %v1342_v50, %v1343_v17  ;;  %v1688_v38 = vsel %vm1684_vm6, %v1679_v6, %v1680_v26  ;;  %v1344_v39 = vrot.slane %v1317_v32, 3  ;;  %v1681_v43 = vrot.slane %v1654_v33, 4  ;;  %v4995_v47 = vpop.f32.mrb[55].mxu0  ;;  %v5075_v1 = vpop.f32.mrb[67].mxu1  ;;  %v7554_v50 = vld [vmem:[%s6937_s17 + $0x38] sm:$0xff]  }
 0x560   : > { %v1401_v7 = vmul.f32 %v1383_v23, %v1353_v34  ;;  %v1737_v8 = vmul.f32 %v1719_v28, %v1688_v38  ;;  %v1721_v23 = vld [vmem:[#allocation16 + $0x118] sm:$0xff]  ;;  %v1704_v47 = vld [vmem:[#allocation16 + $0x90] sm:$0xff] }
 0x561   : > { %v1352_v51 = vsel %vm1349_vm5, %v1343_v17, %v1344_v39  ;;  %v1687_v52 = vsel %vm1684_vm6, %v1680_v26, %v1681_v43  ;;  %5273 = vmatmul.mubr.msk.bf16.gmra.mrb[124].mxu0 %vm722_vm1, %v7122_v30  ;;  %5313 = vmatmul.mubr.msk.bf16.gmra.mrb[136].mxu1 %vm722_vm1, %v7554_v50 }
 0x562   : > { %v7558_v6 = vadd.f32 %v1737_v8, %v1401_v7  ;;  %v1402_v57 = vmul.f32 %v1384_v42, %v1352_v51  ;;  %v1738_v59 = vmul.f32 %v1720_v46, %v1687_v52  ;;  %5276 = vmatprep.mubr.msk.bf16.mxu0 %vm6549_vm2, %v6548_v41  ;;  %5316 = vmatprep.mubr.msk.bf16.mxu1 %vm6549_vm2, %v6548_v41  ;;  %v1369_v42 = vld [vmem:[#allocation16 + $0x8] sm:$0xff]  ;;  %v1705_v52 = vld [vmem:[#allocation16 + $0x98] sm:$0xff] }
 0x564   : > { %v7564_v62 = vadd.f32 %v1738_v59, %v1402_v57  ;;  %v1322_v63 = vpop.f32.mrb[56].mxu0  ;;  %v1659_v11 = vpop.f32.mrb[68].mxu1 }
 0x565   : > { %v1345_v13 = vrot.slane %v1322_v63, 3  ;;  %v1682_v17 = vrot.slane %v1659_v11, 4  ;;  %v4998_v26 = vpop.f32.mrb[57].mxu0  ;;  %v5078_v28 = vpop.f32.mrb[69].mxu1 }
 0x566   : > { %v1325_v29 = vpop.f32.mrb[58].mxu0  ;;  %v1662_v32 = vpop.f32.mrb[70].mxu1  ;;  %v6135_v26 = vld [vmem:[#allocation13 + $0x58] sm:$0xff]   ;;  %v6136_v28 = vld [vmem:[#allocation13 + $0x68] sm:$0xff]  }
 0x567   : > { %v1351_v33 = vsel %vm1349_vm5, %v1344_v39, %v1345_v13  ;;  %v1686_v34 = vsel %vm1684_vm6, %v1681_v43, %v1682_v17  ;;  %v1346_v38 = vrot.slane %v1325_v29, 3  ;;  %v1683_v46 = vrot.slane %v1662_v32, 4  ;;  %v4999_v1 = vpop.f32.mrb[59].mxu0  ;;  %v5079_v7 = vpop.f32.mrb[71].mxu1 }
 0x568   : > { %v1403_v8 = vmul.f32 %v1385_v14, %v1351_v33  ;;  %v1739_v51 = vmul.f32 %v1721_v23, %v1686_v34  ;;  %v6134_v23 = vld [vmem:[#allocation13 + $0x60] sm:$0xff]  }
 0x569   : > { %v1350_v57 = vsel %vm1349_vm5, %v1345_v13, %v1346_v38  ;;  %v1367_v39 = vsel %vm1349_vm5, %v1346_v38, %v1329_v54  ;;  %v1685_v43 = vsel %vm1684_vm6, %v1682_v17, %v1683_v46  ;;  %v1702_v59 = vsel %vm1684_vm6, %v1683_v46, %v1666_v56  ;;  %5277 = vmatmul.mubr.msk.bf16.gmra.mrb[128].mxu0 %vm722_vm1, %v7132_v35  ;;  %v6133_v17 = vld [vmem:[#allocation13 + $0x50] sm:$0xff]   ;;  %v6137_v46 = vld [vmem:[#allocation14 + $0x70] sm:$0xff]  }
 0x56a   : > { %v7584_v63 = vadd.f32 %v1739_v51, %v1403_v8  ;;  %v1386_v11 = vmul.f32 %v1368_v31, %v1350_v57  ;;  %v1387_v13 = vmul.f32 %v1369_v42, %v1367_v39  ;;  %v1722_v14 = vmul.f32 %v1704_v47, %v1685_v43  ;;  %5317 = vmatmul.mubr.msk.bf16.gmra.mrb[140].mxu1 %vm722_vm1, %v7587_v3  ;;  %v2042_v38 = vld [vmem:[#allocation16 + $0x130] sm:$0xff] }
 0x56b   : > { %v1723_v54 = vmul.f32 %v1705_v52, %v1702_v59  ;;  %5324 = vmatprep.mubr.msk.bf16.mxu0 %vm6549_vm2, %v6548_v41  ;;  %5404 = vmatprep.mubr.msk.bf16.mxu1 %vm6549_vm2, %v6548_v41  ;;  %v6138_v47 = vld [vmem:[#allocation14 + $0x80] sm:$0xff]  }
 0x56c   : > { %v7595_v4 = vadd.f32 %v1722_v14, %v1386_v11  ;;  %v6139_v11 = vld [vmem:[#allocation14 + $0x78] sm:$0xff]  }
 0x56d   : > { %v7597_v56 = vadd.f32 %v1723_v54, %v1387_v13  ;;  %v6140_v13 = vld [vmem:[#allocation14 + $0x88] sm:$0xff]  }
 0x571   : > { %5325 = vmatmul.mubr.msk.bf16.vlgmr.msra.gmra.mrb[132].mxu0 %vm722_vm1, %v7048_v48 }
 0x572   : > { %5361 = vmatpush3.bf16.msra.mxu0 %v6133_v17  ;;  %5405 = vmatmul.mubr.msk.bf16.vlgmr.msra.gmra.mrb[144].mxu1 %vm722_vm1, %v7048_v48 }
 0x573   : > { %5441 = vmatpush3.bf16.msra.mxu1 %v6134_v23  ;;  %5328 = vmatprep.mubr.msk.bf16.mxu0 %vm6549_vm2, %v6548_v41 }
 0x574   : > { %5408 = vmatprep.mubr.msk.bf16.mxu1 %vm6549_vm2, %v6548_v41  ;;  %5362 = vmatprep.subr.bf16.mxu0 %v6548_v41 }
 0x575   : > { %5442 = vmatprep.subr.bf16.mxu1 %v6548_v41 }
 0x576   : > { %5363 = vmatpush3.bf16.msra.mxu0 %v6135_v26  ;;  %v2043_v26 = vld [vmem:[#allocation16 + $0x138] sm:$0xff] }
 0x577   : > { %5443 = vmatpush3.bf16.msra.mxu1 %v6136_v28  ;;  %5480 = vmatprep.subr.bf16.mxu0 %v6548_v41 }
 0x578   : > { %5560 = vmatprep.subr.bf16.mxu1 %v6548_v41 }
 0x579   : > { %5329 = vmatmul.mubr.msk.bf16.gmra.mrb[136].mxu0 %vm722_vm1, %v7060_v55 }
 0x57a   : > { %5409 = vmatmul.mubr.msk.bf16.gmra.mrb[148].mxu1 %vm722_vm1, %v7060_v55  ;;  %5332 = vmatprep.mubr.msk.bf16.mxu0 %vm6549_vm2, %v6548_v41 }
 0x57b   : > { %5412 = vmatprep.mubr.msk.bf16.mxu1 %vm6549_vm2, %v6548_v41 }
 0x581   : > { %5333 = vmatmul.mubr.msk.bf16.gmra.mrb[140].mxu0 %vm722_vm1, %v7072_v60 }
 0x582   : > { %5413 = vmatmul.mubr.msk.bf16.gmra.mrb[152].mxu1 %vm722_vm1, %v7072_v60  ;;  %5336 = vmatprep.mubr.msk.bf16.mxu0 %vm6549_vm2, %v6548_v41 }
 0x583   : > { %5416 = vmatprep.mubr.msk.bf16.mxu1 %vm6549_vm2, %v6548_v41 }
 0x589   : > { %5337 = vmatmul.mubr.msk.bf16.gmra.mrb[144].mxu0 %vm722_vm1, %v7082_v5 }
 0x58a   : > { %5417 = vmatmul.mubr.msk.bf16.gmra.mrb[156].mxu1 %vm722_vm1, %v7082_v5  ;;  %5340 = vmatprep.mubr.msk.bf16.mxu0 %vm6549_vm2, %v6548_v41 }
 0x58b   : > { %5420 = vmatprep.mubr.msk.bf16.mxu1 %vm6549_vm2, %v6548_v41 }
 0x591   : > { %5341 = vmatmul.mubr.msk.bf16.gmra.mrb[148].mxu0 %vm722_vm1, %v7092_v15 }
 0x592   : > { %5421 = vmatmul.mubr.msk.bf16.gmra.mrb[160].mxu1 %vm722_vm1, %v7092_v15  ;;  %5344 = vmatprep.mubr.msk.bf16.mxu0 %vm6549_vm2, %v6548_v41 }
 0x593   : > { %5424 = vmatprep.mubr.msk.bf16.mxu1 %vm6549_vm2, %v6548_v41 }
 0x599   : > { %5345 = vmatmul.mubr.msk.bf16.gmra.mrb[152].mxu0 %vm722_vm1, %v7102_v20 }
 0x59a   : > { %5425 = vmatmul.mubr.msk.bf16.gmra.mrb[164].mxu1 %vm722_vm1, %v7102_v20  ;;  %5348 = vmatprep.mubr.msk.bf16.mxu0 %vm6549_vm2, %v6548_v41 }
 0x59b   : > { %5428 = vmatprep.mubr.msk.bf16.mxu1 %vm6549_vm2, %v6548_v41 }
 0x5a1   : > { %5349 = vmatmul.mubr.msk.bf16.gmra.mrb[156].mxu0 %vm722_vm1, %v7112_v25 }
 0x5a2   : > { %5429 = vmatmul.mubr.msk.bf16.gmra.mrb[168].mxu1 %vm722_vm1, %v7112_v25  ;;  %5352 = vmatprep.mubr.msk.bf16.mxu0 %vm6549_vm2, %v6548_v41 }
 0x5a3   : > { %5432 = vmatprep.mubr.msk.bf16.mxu1 %vm6549_vm2, %v6548_v41 }
 0x5a9   : > { %5353 = vmatmul.mubr.msk.bf16.gmra.mrb[160].mxu0 %vm722_vm1, %v7122_v30 }
 0x5aa   : > { %5433 = vmatmul.mubr.msk.bf16.gmra.mrb[172].mxu1 %vm722_vm1, %v7122_v30  ;;  %5356 = vmatprep.mubr.msk.bf16.mxu0 %vm6549_vm2, %v6548_v41 }
 0x5ab   : > { %5436 = vmatprep.mubr.msk.bf16.mxu1 %vm6549_vm2, %v6548_v41 }
 0x5b1   : > { %5357 = vmatmul.mubr.msk.bf16.gmra.mrb[164].mxu0 %vm722_vm1, %v7132_v35 }
 0x5b2   : > { %5437 = vmatmul.mubr.msk.bf16.gmra.mrb[176].mxu1 %vm722_vm1, %v7132_v35  ;;  %5364 = vmatprep.mubr.msk.bf16.mxu0 %vm6549_vm2, %v6548_v41 }
 0x5b3   : > { %5444 = vmatprep.mubr.msk.bf16.mxu1 %vm6549_vm2, %v6548_v41 }
 0x5b4   : > { %v7675_v29 = vpop.f32.mrb[60].mxu0  ;;  %v7677_v31 = vpop.f32.mrb[72].mxu1 }
 0x5b5   : > { %v5126_v32 = vpop.f32.mrb[61].mxu0  ;;  %v5206_v33 = vpop.f32.mrb[73].mxu1  ;;  %v2002_v1 = vrot.slane %v7675_v29, 5  ;;  %v2338_v7 = vrot.slane %v7677_v31, 7 }
 0x5b6   : > { %v1934_v34 = vpop.f32.mrb[62].mxu0  ;;  %v2270_v42 = vpop.f32.mrb[74].mxu1 }
 0x5b7   : > { %v2003_v8 = vrot.slane %v1934_v34, 5  ;;  %v2339_v51 = vrot.slane %v2270_v42, 7  ;;  %v5127_v52 = vpop.f32.mrb[63].mxu0  ;;  %v5207_v57 = vpop.f32.mrb[75].mxu1 }
 0x5b8   : > { %v2044_v52 = vld [vmem:[#allocation16 + $0x140] sm:$0xff]  ;;  %v2379_v57 = vld [vmem:[#allocation16 + $0x1c8] sm:$0xff] }
 0x5b9   : > { %v2037_v39 = vsel %vm2020_vm7, %v2002_v1, %v2003_v8  ;;  %v7691_v43 = vsel %vm2356_vm8, %v2338_v7, %v2339_v51  ;;  %5365 = vmatmul.mubr.msk.bf16.vlgmr.msra.gmra.mrb[132].mxu0 %vm722_vm1, %v7391_v0 }
 0x5ba   : > { %v2060_v59 = vmul.f32 %v2042_v38, %v2037_v39  ;;  %5445 = vmatmul.mubr.msk.bf16.vlgmr.msra.gmra.mrb[144].mxu1 %vm722_vm1, %v7391_v0  ;;  %5481 = vmatpush3.bf16.msra.mxu0 %v6137_v46  ;;  %v2378_v0 = vld [vmem:[#allocation16 + $0x1c0] sm:$0xff] }
 0x5bb   : > { %5561 = vmatpush3.bf16.msra.mxu1 %v6138_v47  ;;  %5368 = vmatprep.mubr.msk.bf16.mxu0 %vm6549_vm2, %v6548_v41 }
 0x5bc   : > { %v1939_v14 = vpop.f32.mrb[64].mxu0  ;;  %v2275_v54 = vpop.f32.mrb[76].mxu1  ;;  %5448 = vmatprep.mubr.msk.bf16.mxu1 %vm6549_vm2, %v6548_v41  ;;  %5482 = vmatprep.subr.bf16.mxu0 %v6548_v41  ;;  %v2078_v17 = vadd.f32 %v2060_v59, %v7399_v16 }
 0x5bd   : > { %v2004_v23 = vrot.slane %v1939_v14, 5  ;;  %v2340_v28 = vrot.slane %v2275_v54, 7  ;;  %v5130_v32 = vpop.f32.mrb[65].mxu0  ;;  %v5210_v33 = vpop.f32.mrb[77].mxu1  ;;  %5562 = vmatprep.subr.bf16.mxu1 %v6548_v41 }
 0x5be   : > { %v1942_v34 = vpop.f32.mrb[66].mxu0  ;;  %v2278_v38 = vpop.f32.mrb[78].mxu1  ;;  %5483 = vmatpush3.bf16.msra.mxu0 %v6139_v11 }
 0x5bf   : > { %v2036_v42 = vsel %vm2020_vm7, %v2003_v8, %v2004_v23  ;;  %v2372_v46 = vsel %vm2356_vm8, %v2339_v51, %v2340_v28  ;;  %v2005_v47 = vrot.slane %v1942_v34, 5  ;;  %v2341_v16 = vrot.slane %v2278_v38, 7  ;;  %v5131_v39 = vpop.f32.mrb[67].mxu0  ;;  %v5211_v59 = vpop.f32.mrb[79].mxu1  ;;  %5563 = vmatpush3.bf16.msra.mxu1 %v6140_v13  ;;  %5520 = vmatprep.subr.bf16.mxu0 %v6548_v41  ;;  %v2045_v34 = vld [vmem:[#allocation16 + $0x148] sm:$0xff] }
 0x5c0   : > { %v2061_v14 = vmul.f32 %v2043_v26, %v2036_v42  ;;  %v2396_v54 = vmul.f32 %v2378_v0, %v2372_v46  ;;  %5600 = vmatprep.subr.bf16.mxu1 %v6548_v41  ;;  %v2380_v42 = vld [vmem:[#allocation16 + $0x1d0] sm:$0xff] }
 0x5c1   : > { %v2035_v11 = vsel %vm2020_vm7, %v2004_v23, %v2005_v47  ;;  %v2371_v8 = vsel %vm2356_vm8, %v2340_v28, %v2341_v16  ;;  %5369 = vmatmul.mubr.msk.bf16.gmra.mrb[136].mxu0 %vm722_vm1, %v7416_v44 }
 0x5c2   : > { %v2062_v51 = vmul.f32 %v2044_v52, %v2035_v11  ;;  %v2397_v32 = vmul.f32 %v2379_v57, %v2371_v8  ;;  %5449 = vmatmul.mubr.msk.bf16.gmra.mrb[148].mxu1 %vm722_vm1, %v7416_v44  ;;  %5372 = vmatprep.mubr.msk.bf16.mxu0 %vm6549_vm2, %v6548_v41  ;;  %v7720_v13 = vadd.f32 %v2396_v54, %v2078_v17 }
 0x5c3   : > { %5452 = vmatprep.mubr.msk.bf16.mxu1 %vm6549_vm2, %v6548_v41  ;;  %v2079_v23 = vadd.f32 %v2061_v14, %v7420_v45  ;;  %v2046_v14 = vld [vmem:[#allocation16 + $0x150] sm:$0xff] }
 0x5c4   : > { %v1947_v26 = vpop.f32.mrb[68].mxu0  ;;  %v2283_v28 = vpop.f32.mrb[80].mxu1  ;;  %v2080_v0 = vadd.f32 %v2062_v51, %v7426_v49  ;;  %v2381_v49 = vld [vmem:[#allocation16 + $0x1d8] sm:$0xff] }
 0x5c5   : > { %v2006_v33 = vrot.slane %v1947_v26, 5  ;;  %v2342_v38 = vrot.slane %v2283_v28, 7  ;;  %v5134_v46 = vpop.f32.mrb[69].mxu0  ;;  %v5214_v44 = vpop.f32.mrb[81].mxu1  ;;  %v7726_v52 = vadd.f32 %v2397_v32, %v2079_v23 }
 0x5c6   : > { %v1950_v57 = vpop.f32.mrb[70].mxu0  ;;  %v2286_v17 = vpop.f32.mrb[82].mxu1  ;;  %v2047_v44 = vld [vmem:[#allocation16 + $0x158] sm:$0xff] }
 0x5c7   : > { %v2034_v39 = vsel %vm2020_vm7, %v2005_v47, %v2006_v33  ;;  %v2370_v45 = vsel %vm2356_vm8, %v2341_v16, %v2342_v38  ;;  %v2007_v59 = vrot.slane %v1950_v57, 5  ;;  %v2343_v54 = vrot.slane %v2286_v17, 7  ;;  %v5135_v11 = vpop.f32.mrb[71].mxu0  ;;  %v5215_v8 = vpop.f32.mrb[83].mxu1  ;;  %v2382_v17 = vld [vmem:[#allocation16 + $0x1e0] sm:$0xff] }
 0x5c8   : > { %v2063_v51 = vmul.f32 %v2045_v34, %v2034_v39  ;;  %v2398_v26 = vmul.f32 %v2380_v42, %v2370_v45  ;;  %v2048_v8 = vld [vmem:[#allocation16 + $0x160] sm:$0xff] }
 0x5c9   : > { %v2033_v32 = vsel %vm2020_vm7, %v2006_v33, %v2007_v59  ;;  %v2369_v23 = vsel %vm2356_vm8, %v2342_v38, %v2343_v54  ;;  %5373 = vmatmul.mubr.msk.bf16.gmra.mrb[140].mxu0 %vm722_vm1, %v7439_v19 }
 0x5ca   : > { %v2064_v47 = vmul.f32 %v2046_v14, %v2033_v32  ;;  %v2399_v28 = vmul.f32 %v2381_v49, %v2369_v23  ;;  %5453 = vmatmul.mubr.msk.bf16.gmra.mrb[152].mxu1 %vm722_vm1, %v7439_v19  ;;  %5376 = vmatprep.mubr.msk.bf16.mxu0 %vm6549_vm2, %v6548_v41  ;;  %v7742_v16 = vadd.f32 %v2398_v26, %v2080_v0 }
 0x5cb   : > { %5456 = vmatprep.mubr.msk.bf16.mxu1 %vm6549_vm2, %v6548_v41  ;;  %v2081_v33 = vadd.f32 %v2063_v51, %v7443_v21 }
 0x5cc   : > { %v1955_v34 = vpop.f32.mrb[72].mxu0  ;;  %v2291_v38 = vpop.f32.mrb[84].mxu1  ;;  %v2082_v42 = vadd.f32 %v2064_v47, %v7449_v24  ;;  %v2383_v24 = vld [vmem:[#allocation16 + $0x1e8] sm:$0xff] }
 0x5cd   : > { %v2008_v46 = vrot.slane %v1955_v34, 5  ;;  %v2344_v57 = vrot.slane %v2291_v38, 7  ;;  %v5138_v39 = vpop.f32.mrb[73].mxu0  ;;  %v5218_v19 = vpop.f32.mrb[85].mxu1  ;;  %v7748_v45 = vadd.f32 %v2399_v28, %v2081_v33 }
 0x5ce   : > { %v1958_v14 = vpop.f32.mrb[74].mxu0  ;;  %v2294_v0 = vpop.f32.mrb[86].mxu1  ;;  %v2049_v39 = vld [vmem:[#allocation16 + $0x168] sm:$0xff] }
 0x5cf   : > { %v2032_v49 = vsel %vm2020_vm7, %v2007_v59, %v2008_v46  ;;  %v2368_v21 = vsel %vm2356_vm8, %v2343_v54, %v2344_v57  ;;  %v2009_v11 = vrot.slane %v1958_v14, 5  ;;  %v2345_v51 = vrot.slane %v2294_v0, 7  ;;  %v5139_v26 = vpop.f32.mrb[75].mxu0  ;;  %v5219_v32 = vpop.f32.mrb[87].mxu1  ;;  %v2384_v14 = vld [vmem:[#allocation16 + $0x1f0] sm:$0xff] }
 0x5d0   : > { %v2065_v23 = vmul.f32 %v2047_v44, %v2032_v49  ;;  %v2400_v47 = vmul.f32 %v2382_v17, %v2368_v21  ;;  %v2050_v26 = vld [vmem:[#allocation16 + $0x170] sm:$0xff] }
 0x5d1   : > { %v2031_v28 = vsel %vm2020_vm7, %v2008_v46, %v2009_v11  ;;  %v2367_v33 = vsel %vm2356_vm8, %v2344_v57, %v2345_v51  ;;  %5377 = vmatmul.mubr.msk.bf16.gmra.mrb[144].mxu0 %vm722_vm1, %v7462_v9 }
 0x5d2   : > { %v2066_v59 = vmul.f32 %v2048_v8, %v2031_v28  ;;  %v2401_v34 = vmul.f32 %v2383_v24, %v2367_v33  ;;  %5457 = vmatmul.mubr.msk.bf16.gmra.mrb[156].mxu1 %vm722_vm1, %v7462_v9  ;;  %5380 = vmatprep.mubr.msk.bf16.mxu0 %vm6549_vm2, %v6548_v41  ;;  %v7764_v54 = vadd.f32 %v2400_v47, %v2082_v42 }
 0x5d3   : > { %5460 = vmatprep.mubr.msk.bf16.mxu1 %vm6549_vm2, %v6548_v41  ;;  %v2083_v38 = vadd.f32 %v2065_v23, %v7466_v10 }
 0x5d4   : > { %v1963_v46 = vpop.f32.mrb[76].mxu0  ;;  %v2299_v44 = vpop.f32.mrb[88].mxu1  ;;  %v2084_v57 = vadd.f32 %v2066_v59, %v7472_v53  ;;  %v2385_v53 = vld [vmem:[#allocation16 + $0x1f8] sm:$0xff] }
 0x5d5   : > { %v2010_v17 = vrot.slane %v1963_v46, 5  ;;  %v2346_v19 = vrot.slane %v2299_v44, 7  ;;  %v5142_v0 = vpop.f32.mrb[77].mxu0  ;;  %v5222_v9 = vpop.f32.mrb[89].mxu1  ;;  %v7770_v49 = vadd.f32 %v2401_v34, %v2083_v38 }
 0x5d6   : > { %v1966_v21 = vpop.f32.mrb[78].mxu0  ;;  %v2302_v42 = vpop.f32.mrb[90].mxu1  ;;  %v2386_v9 = vld [vmem:[#allocation16 + $0x200] sm:$0xff] }
 0x5d7   : > { %v2030_v8 = vsel %vm2020_vm7, %v2009_v11, %v2010_v17  ;;  %v2366_v10 = vsel %vm2356_vm8, %v2345_v51, %v2346_v19  ;;  %v2011_v24 = vrot.slane %v1966_v21, 5  ;;  %v2347_v32 = vrot.slane %v2302_v42, 7  ;;  %v5143_v23 = vpop.f32.mrb[79].mxu0  ;;  %v5223_v47 = vpop.f32.mrb[91].mxu1 }
 0x5d8   : > { %v2067_v28 = vmul.f32 %v2049_v39, %v2030_v8  ;;  %v2402_v33 = vmul.f32 %v2384_v14, %v2366_v10  ;;  %v2051_v14 = vld [vmem:[#allocation16 + $0x178] sm:$0xff] }
 0x5d9   : > { %v2029_v59 = vsel %vm2020_vm7, %v2010_v17, %v2011_v24  ;;  %v2365_v34 = vsel %vm2356_vm8, %v2346_v19, %v2347_v32  ;;  %5381 = vmatmul.mubr.msk.bf16.gmra.mrb[148].mxu0 %vm722_vm1, %v7485_v36 }
 0x5da   : > { %v2068_v11 = vmul.f32 %v2050_v26, %v2029_v59  ;;  %v2403_v38 = vmul.f32 %v2385_v53, %v2365_v34  ;;  %5461 = vmatmul.mubr.msk.bf16.gmra.mrb[160].mxu1 %vm722_vm1, %v7485_v36  ;;  %5384 = vmatprep.mubr.msk.bf16.mxu0 %vm6549_vm2, %v6548_v41  ;;  %v7786_v51 = vadd.f32 %v2402_v33, %v2084_v57  ;;  %v2052_v53 = vld [vmem:[#allocation16 + $0x180] sm:$0xff] }
 0x5db   : > { %5464 = vmatprep.mubr.msk.bf16.mxu1 %vm6549_vm2, %v6548_v41  ;;  %v2085_v46 = vadd.f32 %v2067_v28, %v7489_v37 }
 0x5dc   : > { %v1971_v44 = vpop.f32.mrb[80].mxu0  ;;  %v2307_v17 = vpop.f32.mrb[92].mxu1  ;;  %v2086_v39 = vadd.f32 %v2068_v11, %v7495_v40  ;;  %v2387_v40 = vld [vmem:[#allocation16 + $0x208] sm:$0xff] }
 0x5dd   : > { %v2012_v19 = vrot.slane %v1971_v44, 5  ;;  %v2348_v0 = vrot.slane %v2307_v17, 7  ;;  %v5146_v21 = vpop.f32.mrb[81].mxu0  ;;  %v5226_v36 = vpop.f32.mrb[93].mxu1  ;;  %v7792_v42 = vadd.f32 %v2403_v38, %v2085_v46 }
 0x5de   : > { %v1974_v8 = vpop.f32.mrb[82].mxu0  ;;  %v2310_v57 = vpop.f32.mrb[94].mxu1  ;;  %v2388_v21 = vld [vmem:[#allocation16 + $0x210] sm:$0xff] }
 0x5df   : > { %v2028_v10 = vsel %vm2020_vm7, %v2011_v24, %v2012_v19  ;;  %v2364_v37 = vsel %vm2356_vm8, %v2347_v32, %v2348_v0  ;;  %v2013_v26 = vrot.slane %v1974_v8, 5  ;;  %v2349_v23 = vrot.slane %v2310_v57, 7  ;;  %v5147_v47 = vpop.f32.mrb[83].mxu0  ;;  %v5227_v28 = vpop.f32.mrb[95].mxu1 }
 0x5e0   : > { %v2069_v33 = vmul.f32 %v2051_v14, %v2028_v10  ;;  %v2404_v59 = vmul.f32 %v2386_v9, %v2364_v37 }
 0x5e1   : > { %v2027_v34 = vsel %vm2020_vm7, %v2012_v19, %v2013_v26  ;;  %v2363_v11 = vsel %vm2356_vm8, %v2348_v0, %v2349_v23  ;;  %5385 = vmatmul.mubr.msk.bf16.gmra.mrb[152].mxu0 %vm722_vm1, %v7508_v18  ;;  %v2053_v0 = vld [vmem:[#allocation16 + $0x188] sm:$0xff] }
 0x5e2   : > { %v2070_v24 = vmul.f32 %v2052_v53, %v2027_v34  ;;  %v2405_v38 = vmul.f32 %v2387_v40, %v2363_v11  ;;  %5465 = vmatmul.mubr.msk.bf16.gmra.mrb[164].mxu1 %vm722_vm1, %v7508_v18  ;;  %5388 = vmatprep.mubr.msk.bf16.mxu0 %vm6549_vm2, %v6548_v41  ;;  %v7808_v32 = vadd.f32 %v2404_v59, %v2086_v39  ;;  %v2054_v53 = vld [vmem:[#allocation16 + $0x190] sm:$0xff] }
 0x5e3   : > { %5468 = vmatprep.mubr.msk.bf16.mxu1 %vm6549_vm2, %v6548_v41  ;;  %v2087_v46 = vadd.f32 %v2069_v33, %v7512_v22 }
 0x5e4   : > { %v1979_v44 = vpop.f32.mrb[84].mxu0  ;;  %v2315_v17 = vpop.f32.mrb[96].mxu1  ;;  %v2088_v19 = vadd.f32 %v2070_v24, %v7518_v27  ;;  %v2389_v27 = vld [vmem:[#allocation16 + $0x218] sm:$0xff] }
 0x5e5   : > { %v2014_v14 = vrot.slane %v1979_v44, 5  ;;  %v2350_v9 = vrot.slane %v2315_v17, 7  ;;  %v5150_v36 = vpop.f32.mrb[85].mxu0  ;;  %v5230_v18 = vpop.f32.mrb[97].mxu1  ;;  %v7814_v8 = vadd.f32 %v2405_v38, %v2087_v46 }
 0x5e6   : > { %v1982_v57 = vpop.f32.mrb[86].mxu0  ;;  %v2318_v39 = vpop.f32.mrb[98].mxu1 }
 0x5e7   : > { %v2026_v10 = vsel %vm2020_vm7, %v2013_v26, %v2014_v14  ;;  %v2362_v22 = vsel %vm2356_vm8, %v2349_v23, %v2350_v9  ;;  %v2015_v37 = vrot.slane %v1982_v57, 5  ;;  %v2351_v40 = vrot.slane %v2318_v39, 7  ;;  %v5151_v47 = vpop.f32.mrb[87].mxu0  ;;  %v5231_v28 = vpop.f32.mrb[99].mxu1 }
 0x5e8   : > { %v2071_v33 = vmul.f32 %v2053_v0, %v2026_v10  ;;  %v2406_v59 = vmul.f32 %v2388_v21, %v2362_v22  ;;  %v2055_v0 = vld [vmem:[#allocation16 + $0x198] sm:$0xff]  ;;  %v2390_v21 = vld [vmem:[#allocation16 + $0x220] sm:$0xff] }
 0x5e9   : > { %v2025_v34 = vsel %vm2020_vm7, %v2014_v14, %v2015_v37  ;;  %v2361_v11 = vsel %vm2356_vm8, %v2350_v9, %v2351_v40  ;;  %5389 = vmatmul.mubr.msk.bf16.gmra.mrb[156].mxu0 %vm722_vm1, %v7531_v58  ;;  %v2056_v22 = vld [vmem:[#allocation16 + $0x1a0] sm:$0xff] }
 0x5ea   : > { %v2072_v26 = vmul.f32 %v2054_v53, %v2025_v34  ;;  %v2407_v24 = vmul.f32 %v2389_v27, %v2361_v11  ;;  %5469 = vmatmul.mubr.msk.bf16.gmra.mrb[168].mxu1 %vm722_vm1, %v7531_v58  ;;  %5392 = vmatprep.mubr.msk.bf16.mxu0 %vm6549_vm2, %v6548_v41  ;;  %v7830_v23 = vadd.f32 %v2406_v59, %v2088_v19 }
 0x5eb   : > { %5472 = vmatprep.mubr.msk.bf16.mxu1 %vm6549_vm2, %v6548_v41  ;;  %v2089_v38 = vadd.f32 %v2071_v33, %v7535_v61 }
 0x5ec   : > { %v1987_v46 = vpop.f32.mrb[88].mxu0  ;;  %v2323_v44 = vpop.f32.mrb[100].mxu1  ;;  %v2090_v17 = vadd.f32 %v2072_v26, %v7541_v12  ;;  %v2391_v12 = vld [vmem:[#allocation16 + $0x228] sm:$0xff] }
 0x5ed   : > { %v2016_v14 = vrot.slane %v1987_v46, 5  ;;  %v2352_v9 = vrot.slane %v2323_v44, 7  ;;  %v5154_v36 = vpop.f32.mrb[89].mxu0  ;;  %v5234_v58 = vpop.f32.mrb[101].mxu1  ;;  %v7836_v18 = vadd.f32 %v2407_v24, %v2089_v38 }
 0x5ee   : > { %v1990_v57 = vpop.f32.mrb[90].mxu0  ;;  %v2326_v19 = vpop.f32.mrb[102].mxu1 }
 0x5ef   : > { %v2024_v39 = vsel %vm2020_vm7, %v2015_v37, %v2016_v14  ;;  %v2360_v61 = vsel %vm2356_vm8, %v2351_v40, %v2352_v9  ;;  %v2017_v10 = vrot.slane %v1990_v57, 5  ;;  %v2353_v53 = vrot.slane %v2326_v19, 7  ;;  %v5155_v27 = vpop.f32.mrb[91].mxu0  ;;  %v5235_v47 = vpop.f32.mrb[103].mxu1 }
 0x5f0   : > { %v2073_v28 = vmul.f32 %v2055_v0, %v2024_v39  ;;  %v2408_v33 = vmul.f32 %v2390_v21, %v2360_v61  ;;  %v2041_v61 = vld [vmem:[#allocation16 + $0x128] sm:$0xff] }
 0x5f1   : > { %v2023_v59 = vsel %vm2020_vm7, %v2016_v14, %v2017_v10  ;;  %v2359_v34 = vsel %vm2356_vm8, %v2352_v9, %v2353_v53  ;;  %5393 = vmatmul.mubr.msk.bf16.gmra.mrb[160].mxu0 %vm722_vm1, %v7554_v50  ;;  %v2057_v14 = vld [vmem:[#allocation16 + $0x1a8] sm:$0xff]  ;;  %v2392_v9 = vld [vmem:[#allocation16 + $0x230] sm:$0xff] }
 0x5f2   : > { %v2074_v37 = vmul.f32 %v2056_v22, %v2023_v59  ;;  %v2409_v11 = vmul.f32 %v2391_v12, %v2359_v34  ;;  %5473 = vmatmul.mubr.msk.bf16.gmra.mrb[172].mxu1 %vm722_vm1, %v7554_v50  ;;  %5396 = vmatprep.mubr.msk.bf16.mxu0 %vm6549_vm2, %v6548_v41  ;;  %v7852_v40 = vadd.f32 %v2408_v33, %v2090_v17  ;;  %v2040_v17 = vld [vmem:[#allocation16 + $0x120] sm:$0xff]  ;;  %v2393_v22 = vld [vmem:[#allocation16 + $0x238] sm:$0xff] }
 0x5f3   : > { %5476 = vmatprep.mubr.msk.bf16.mxu1 %vm6549_vm2, %v6548_v41  ;;  %v2091_v26 = vadd.f32 %v2073_v28, %v7558_v6  ;;  %v2377_v33 = vld [vmem:[#allocation16 + $0x1b8] sm:$0xff] }
 0x5f4   : > { %v1995_v24 = vpop.f32.mrb[92].mxu0  ;;  %v2331_v38 = vpop.f32.mrb[104].mxu1  ;;  %v2092_v46 = vadd.f32 %v2074_v37, %v7564_v62  ;;  %v2376_v37 = vld [vmem:[#allocation16 + $0x1b0] sm:$0xff] }
 0x5f5   : > { %v2018_v44 = vrot.slane %v1995_v24, 5  ;;  %v2354_v0 = vrot.slane %v2331_v38, 7  ;;  %v5158_v21 = vpop.f32.mrb[93].mxu0  ;;  %v5238_v50 = vpop.f32.mrb[105].mxu1  ;;  %v7858_v36 = vadd.f32 %v2409_v11, %v2091_v26 }
 0x5f6   : > { %v1998_v58 = vpop.f32.mrb[94].mxu0  ;;  %v2334_v57 = vpop.f32.mrb[106].mxu1 }
 0x5f7   : > { %v2022_v19 = vsel %vm2020_vm7, %v2017_v10, %v2018_v44  ;;  %v2358_v6 = vsel %vm2356_vm8, %v2353_v53, %v2354_v0  ;;  %v2019_v39 = vrot.slane %v1998_v58, 5  ;;  %v2355_v62 = vrot.slane %v2334_v57, 7  ;;  %v5159_v12 = vpop.f32.mrb[95].mxu0  ;;  %v5239_v27 = vpop.f32.mrb[107].mxu1 }
 0x5f8   : > { %v2075_v47 = vmul.f32 %v2057_v14, %v2022_v19  ;;  %v2410_v28 = vmul.f32 %v2392_v9, %v2358_v6  ;;  %v6141_v19 = vld [vmem:[#allocation13 + $0x70] sm:$0xff]  }
 0x5f9   : > { %v2021_v59 = vsel %vm2020_vm7, %v2018_v44, %v2019_v39  ;;  %v2038_v10 = vsel %vm2020_vm7, %v2019_v39, %v2002_v1  ;;  %v2357_v53 = vsel %vm2356_vm8, %v2354_v0, %v2355_v62  ;;  %v2374_v34 = vsel %vm2356_vm8, %v2355_v62, %v2338_v7  ;;  %5397 = vmatmul.mubr.msk.bf16.gmra.mrb[164].mxu0 %vm722_vm1, %v7587_v3  ;;  %v6142_v39 = vld [vmem:[#allocation13 + $0x80] sm:$0xff]   ;;  %v6144_v62 = vld [vmem:[#allocation13 + $0x88] sm:$0xff]  }
 0x5fa   : > { %v2058_v11 = vmul.f32 %v2040_v17, %v2021_v59  ;;  %v2059_v26 = vmul.f32 %v2041_v61, %v2038_v10  ;;  %v2411_v24 = vmul.f32 %v2393_v22, %v2357_v53  ;;  %5477 = vmatmul.mubr.msk.bf16.gmra.mrb[176].mxu1 %vm722_vm1, %v7587_v3  ;;  %5484 = vmatprep.mubr.msk.bf16.mxu0 %vm6549_vm2, %v6548_v41 }
 0x5fb   : > { %5564 = vmatprep.mubr.msk.bf16.mxu1 %vm6549_vm2, %v6548_v41  ;;  %v7884_v29 = vadd.f32 %v2410_v28, %v2092_v46  ;;  %v2093_v31 = vadd.f32 %v2075_v47, %v7584_v63  ;;  %v2395_v1 = vmul.f32 %v2377_v33, %v7691_v43  ;;  %v2394_v7 = vmul.f32 %v2376_v37, %v2374_v34 }
 0x5fc   : > { %v2486_v38 = vpop.f32.mrb[96].mxu0  ;;  %v2076_v44 = vadd.f32 %v2058_v11, %v7595_v4  ;;  %v2603_v14 = vpop.f32.mrb[108].mxu1  ;;  %v2077_v0 = vadd.f32 %v2059_v26, %v7597_v56  ;;  %v6143_v56 = vld [vmem:[#allocation13 + $0x78] sm:$0xff]  }
 0x5fd   : > { %v2604_v3 = vadd.f32 %v2603_v14, %v2486_v38  ;;  %v5246_v9 = vpop.f32.mrb[97].mxu0  ;;  %v5286_v21 = vpop.f32.mrb[109].mxu1  ;;  %v7890_v50 = vadd.f32 %v2411_v24, %v2093_v31 }
 0x5fe   : > { %v2412_v58 = vadd.f32 %v2394_v7, %v2076_v44  ;;  %v2489_v17 = vpop.f32.mrb[98].mxu0  ;;  %v2413_v46 = vadd.f32 %v2395_v1, %v2077_v0  ;;  %v2606_v57 = vpop.f32.mrb[110].mxu1 }
 0x5ff   : > { %v2607_v63 = vadd.f32 %v2606_v57, %v2489_v17  ;;  %v5247_v6 = vpop.f32.mrb[99].mxu0  ;;  %v5287_v43 = vpop.f32.mrb[111].mxu1 }
 0x600   : > { %v7892_v61 = vadd.f32 %v2604_v3, %v2412_v58 }
 0x601   : > { %v7894_v4 = vadd.f32 %v2607_v63, %v2413_v46  ;;  %5485 = vmatmul.mubr.msk.bf16.vlgmr.msra.gmra.mrb[168].mxu0 %vm722_vm1, %v7048_v48 }
 0x602   : > { %5521 = vmatpush3.bf16.msra.mxu0 %v6141_v19  ;;  %5565 = vmatmul.mubr.msk.bf16.vlgmr.msra.gmra.mrb[180].mxu1 %vm722_vm1, %v7048_v48 }
 0x603   : > { %5601 = vmatpush3.bf16.msra.mxu1 %v6142_v39  ;;  %5488 = vmatprep.mubr.msk.bf16.mxu0 %vm6549_vm2, %v6548_v41 }
 0x604   : > { %v2494_v22 = vpop.f32.mrb[100].mxu0  ;;  %v2611_v12 = vpop.f32.mrb[112].mxu1  ;;  %5568 = vmatprep.mubr.msk.bf16.mxu1 %vm6549_vm2, %v6548_v41  ;;  %5522 = vmatprep.subr.bf16.mxu0 %v6548_v41 }
 0x605   : > { %v2612_v27 = vadd.f32 %v2611_v12, %v2494_v22  ;;  %v5250_v47 = vpop.f32.mrb[101].mxu0  ;;  %v5290_v28 = vpop.f32.mrb[113].mxu1  ;;  %5602 = vmatprep.subr.bf16.mxu1 %v6548_v41 }
 0x606   : > { %v2497_v33 = vpop.f32.mrb[102].mxu0  ;;  %v2614_v48 = vpop.f32.mrb[114].mxu1  ;;  %5523 = vmatpush3.bf16.msra.mxu0 %v6143_v56 }
 0x607   : > { %v7907_v59 = vadd.f32 %v2612_v27, %v7720_v13  ;;  %v2615_v10 = vadd.f32 %v2614_v48, %v2497_v33  ;;  %v5251_v53 = vpop.f32.mrb[103].mxu0  ;;  %v5291_v34 = vpop.f32.mrb[115].mxu1  ;;  %5603 = vmatpush3.bf16.msra.mxu1 %v6144_v62 }
 0x609   : > { %v7910_v37 = vadd.f32 %v2615_v10, %v7726_v52  ;;  %5489 = vmatmul.mubr.msk.bf16.gmra.mrb[172].mxu0 %vm722_vm1, %v7060_v55 }
 0x60a   : > { %5569 = vmatmul.mubr.msk.bf16.gmra.mrb[184].mxu1 %vm722_vm1, %v7060_v55  ;;  %5492 = vmatprep.mubr.msk.bf16.mxu0 %vm6549_vm2, %v6548_v41 }
 0x60b   : > { %5572 = vmatprep.mubr.msk.bf16.mxu1 %vm6549_vm2, %v6548_v41 }
 0x60c   : > { %v2502_v13 = vpop.f32.mrb[104].mxu0  ;;  %v2619_v11 = vpop.f32.mrb[116].mxu1 }
 0x60d   : > { %v2620_v26 = vadd.f32 %v2619_v11, %v2502_v13  ;;  %v5254_v24 = vpop.f32.mrb[105].mxu0  ;;  %v5294_v31 = vpop.f32.mrb[117].mxu1 }
 0x60e   : > { %v2505_v1 = vpop.f32.mrb[106].mxu0  ;;  %v2622_v52 = vpop.f32.mrb[118].mxu1 }
 0x60f   : > { %v7921_v7 = vadd.f32 %v2620_v26, %v7742_v16  ;;  %v2623_v38 = vadd.f32 %v2622_v52, %v2505_v1  ;;  %v5255_v44 = vpop.f32.mrb[107].mxu0  ;;  %v5295_v14 = vpop.f32.mrb[119].mxu1 }
 0x611   : > { %v7924_v55 = vadd.f32 %v2623_v38, %v7748_v45  ;;  %5493 = vmatmul.mubr.msk.bf16.gmra.mrb[176].mxu0 %vm722_vm1, %v7072_v60 }
 0x612   : > { %5573 = vmatmul.mubr.msk.bf16.gmra.mrb[188].mxu1 %vm722_vm1, %v7072_v60  ;;  %5496 = vmatprep.mubr.msk.bf16.mxu0 %vm6549_vm2, %v6548_v41 }
 0x613   : > { %5576 = vmatprep.mubr.msk.bf16.mxu1 %vm6549_vm2, %v6548_v41 }
 0x614   : > { %v2510_v16 = vpop.f32.mrb[108].mxu0  ;;  %v2627_v0 = vpop.f32.mrb[120].mxu1 }
 0x615   : > { %v2628_v3 = vadd.f32 %v2627_v0, %v2510_v16  ;;  %v5258_v9 = vpop.f32.mrb[109].mxu0  ;;  %v5298_v21 = vpop.f32.mrb[121].mxu1 }
 0x616   : > { %v2513_v58 = vpop.f32.mrb[110].mxu0  ;;  %v2630_v45 = vpop.f32.mrb[122].mxu1 }
 0x617   : > { %v7935_v17 = vadd.f32 %v2628_v3, %v7764_v54  ;;  %v2631_v46 = vadd.f32 %v2630_v45, %v2513_v58  ;;  %v5259_v57 = vpop.f32.mrb[111].mxu0  ;;  %v5299_v19 = vpop.f32.mrb[123].mxu1 }
 0x619   : > { %v7938_v60 = vadd.f32 %v2631_v46, %v7770_v49  ;;  %5497 = vmatmul.mubr.msk.bf16.gmra.mrb[180].mxu0 %vm722_vm1, %v7082_v5 }
 0x61a   : > { %5577 = vmatmul.mubr.msk.bf16.gmra.mrb[192].mxu1 %vm722_vm1, %v7082_v5  ;;  %5500 = vmatprep.mubr.msk.bf16.mxu0 %vm6549_vm2, %v6548_v41 }
 0x61b   : > { %5580 = vmatprep.mubr.msk.bf16.mxu1 %vm6549_vm2, %v6548_v41 }
 0x61c   : > { %v2518_v54 = vpop.f32.mrb[112].mxu0  ;;  %v2635_v63 = vpop.f32.mrb[124].mxu1 }
 0x61d   : > { %v2636_v6 = vadd.f32 %v2635_v63, %v2518_v54  ;;  %v5262_v43 = vpop.f32.mrb[113].mxu0  ;;  %v5302_v39 = vpop.f32.mrb[125].mxu1 }
 0x61e   : > { %v2521_v56 = vpop.f32.mrb[114].mxu0  ;;  %v2638_v49 = vpop.f32.mrb[126].mxu1 }
 0x61f   : > { %v7949_v62 = vadd.f32 %v2636_v6, %v7786_v51  ;;  %v2639_v22 = vadd.f32 %v2638_v49, %v2521_v56  ;;  %v5263_v12 = vpop.f32.mrb[115].mxu0  ;;  %v5303_v27 = vpop.f32.mrb[127].mxu1 }
 0x620   : > { %v6157_v27 = vld [vmem:[%s6937_s17 + $0x18] sm:$0xff]  }
 0x621   : > { %v7952_v5 = vadd.f32 %v2639_v22, %v7792_v42  ;;  %5501 = vmatmul.mubr.msk.bf16.gmra.mrb[184].mxu0 %vm722_vm1, %v7092_v15 }
 0x622   : > { %5581 = vmatmul.mubr.msk.bf16.gmra.mrb[196].mxu1 %vm722_vm1, %v7092_v15  ;;  %5504 = vmatprep.mubr.msk.bf16.mxu0 %vm6549_vm2, %v6548_v41 }
 0x623   : > { %5584 = vmatprep.mubr.msk.bf16.mxu1 %vm6549_vm2, %v6548_v41 }
 0x624   : > { %v2526_v51 = vpop.f32.mrb[116].mxu0  ;;  %v2643_v47 = vpop.f32.mrb[128].mxu1 }
 0x625   : > { %v2644_v28 = vadd.f32 %v2643_v47, %v2526_v51  ;;  %v5266_v33 = vpop.f32.mrb[117].mxu0  ;;  %v5306_v48 = vpop.f32.mrb[129].mxu1  ;;  %v6158_v51 = vld [vmem:[%s6937_s17 + $0x20] sm:$0xff]   ;;  %v6159_v47 = vld [vmem:[%s6937_s17 + $0x28] sm:$0xff]  }
 0x626   : > { %v2529_v10 = vpop.f32.mrb[118].mxu0  ;;  %v2646_v42 = vpop.f32.mrb[130].mxu1  ;;  %v6161_v33 = vld [vmem:[%s6937_s17 + $0x38] sm:$0xff]   ;;  %v6162_v48 = vld [vmem:[%s6937_s17 + $0x40] sm:$0xff]  }
 0x627   : > { %v7963_v53 = vadd.f32 %v2644_v28, %v7808_v32  ;;  %v2647_v34 = vadd.f32 %v2646_v42, %v2529_v10  ;;  %v5267_v13 = vpop.f32.mrb[119].mxu0  ;;  %v5307_v11 = vpop.f32.mrb[131].mxu1  ;;  %v6160_v28 = vld [vmem:[%s6937_s17 + $0x30] sm:$0xff]  }
 0x629   : > { %v7966_v15 = vadd.f32 %v2647_v34, %v7814_v8  ;;  %5505 = vmatmul.mubr.msk.bf16.gmra.mrb[188].mxu0 %vm722_vm1, %v7102_v20 }
 0x62a   : > { %5585 = vmatmul.mubr.msk.bf16.gmra.mrb[200].mxu1 %vm722_vm1, %v7102_v20  ;;  %5508 = vmatprep.mubr.msk.bf16.mxu0 %vm6549_vm2, %v6548_v41 }
 0x62b   : > { %5588 = vmatprep.mubr.msk.bf16.mxu1 %vm6549_vm2, %v6548_v41 }
 0x62c   : > { %v2534_v32 = vpop.f32.mrb[120].mxu0  ;;  %v2651_v26 = vpop.f32.mrb[132].mxu1 }
 0x62d   : > { %v2652_v24 = vadd.f32 %v2651_v26, %v2534_v32  ;;  %v5270_v31 = vpop.f32.mrb[121].mxu0  ;;  %v5310_v1 = vpop.f32.mrb[133].mxu1 }
 0x62e   : > { %v2537_v52 = vpop.f32.mrb[122].mxu0  ;;  %v2654_v8 = vpop.f32.mrb[134].mxu1 }
 0x62f   : > { %v7977_v38 = vadd.f32 %v2652_v24, %v7830_v23  ;;  %v2655_v44 = vadd.f32 %v2654_v8, %v2537_v52  ;;  %v5271_v14 = vpop.f32.mrb[123].mxu0  ;;  %v5311_v16 = vpop.f32.mrb[135].mxu1  ;;  %v2974_v24 = vld [vmem:[#allocation16 + $0x2d0] sm:$0xff] }
 0x631   : > { %v7980_v20 = vadd.f32 %v2655_v44, %v7836_v18  ;;  %5509 = vmatmul.mubr.msk.bf16.gmra.mrb[192].mxu0 %vm722_vm1, %v7112_v25 }
 0x632   : > { %5589 = vmatmul.mubr.msk.bf16.gmra.mrb[204].mxu1 %vm722_vm1, %v7112_v25  ;;  %5512 = vmatprep.mubr.msk.bf16.mxu0 %vm6549_vm2, %v6548_v41 }
 0x633   : > { %5592 = vmatprep.mubr.msk.bf16.mxu1 %vm6549_vm2, %v6548_v41 }
 0x634   : > { %v2542_v23 = vpop.f32.mrb[124].mxu0  ;;  %v2659_v0 = vpop.f32.mrb[136].mxu1 }
 0x635   : > { %v2660_v3 = vadd.f32 %v2659_v0, %v2542_v23  ;;  %v5274_v9 = vpop.f32.mrb[125].mxu0  ;;  %v5314_v21 = vpop.f32.mrb[137].mxu1  ;;  %v2975_v23 = vld [vmem:[#allocation16 + $0x2d8] sm:$0xff] }
 0x636   : > { %v2545_v58 = vpop.f32.mrb[126].mxu0  ;;  %v2662_v18 = vpop.f32.mrb[138].mxu1 }
 0x637   : > { %v7991_v45 = vadd.f32 %v2660_v3, %v7852_v40  ;;  %v2663_v46 = vadd.f32 %v2662_v18, %v2545_v58  ;;  %v5275_v57 = vpop.f32.mrb[127].mxu0  ;;  %v5315_v19 = vpop.f32.mrb[139].mxu1  ;;  %v3309_v58 = vld [vmem:[#allocation16 + $0x360] sm:$0xff] }
 0x639   : > { %v7994_v25 = vadd.f32 %v2663_v46, %v7858_v36  ;;  %5513 = vmatmul.mubr.msk.bf16.gmra.mrb[196].mxu0 %vm722_vm1, %v7122_v30 }
 0x63a   : > { %5593 = vmatmul.mubr.msk.bf16.gmra.mrb[208].mxu1 %vm722_vm1, %v7122_v30  ;;  %5516 = vmatprep.mubr.msk.bf16.mxu0 %vm6549_vm2, %v6548_v41 }
 0x63b   : > { %5596 = vmatprep.mubr.msk.bf16.mxu1 %vm6549_vm2, %v6548_v41 }
 0x63c   : > { %v2550_v40 = vpop.f32.mrb[128].mxu0 }
 0x63d   : > { %v2667_v54 = vpop.f32.mrb[140].mxu1  ;;  %v5278_v63 = vpop.f32.mrb[129].mxu0 }
 0x63e   : > { %v2668_v6 = vadd.f32 %v2667_v54, %v2550_v40  ;;  %v5318_v43 = vpop.f32.mrb[141].mxu1  ;;  %v2553_v36 = vpop.f32.mrb[130].mxu0  ;;  %v2976_v40 = vld [vmem:[#allocation16 + $0x2e0] sm:$0xff] }
 0x63f   : > { %v2670_v39 = vpop.f32.mrb[142].mxu1  ;;  %v5279_v56 = vpop.f32.mrb[131].mxu0 }
 0x640   : > { %v8005_v49 = vadd.f32 %v2668_v6, %v7884_v29  ;;  %v2671_v30 = vadd.f32 %v2670_v39, %v2553_v36  ;;  %v5319_v22 = vpop.f32.mrb[143].mxu1  ;;  %v6154_v29 = vld [vmem:[%s6937_s17] sm:$0xff]  }
 0x641   : > { %5517 = vmatmul.mubr.msk.bf16.gmra.mrb[200].mxu0 %vm722_vm1, %v7132_v35  ;;  %v3310_v36 = vld [vmem:[#allocation16 + $0x368] sm:$0xff] }
 0x642   : > { %v8010_v12 = vadd.f32 %v2671_v30, %v7890_v50  ;;  %5597 = vmatmul.mubr.msk.bf16.gmra.mrb[212].mxu1 %vm722_vm1, %v7132_v35  ;;  %5524 = vmatprep.mubr.msk.bf16.mxu0 %vm6549_vm2, %v6548_v41  ;;  %v6155_v35 = vld [vmem:[%s6937_s17 + $0x8] sm:$0xff]   ;;  %v6156_v50 = vld [vmem:[%s6937_s17 + $0x10] sm:$0xff]  }
 0x643   : > { %5604 = vmatprep.mubr.msk.bf16.mxu1 %vm6549_vm2, %v6548_v41 }
 0x649   : > { %5525 = vmatmul.mubr.msk.bf16.vlgmr.msra.gmra.mrb[168].mxu0 %vm722_vm1, %v6154_v29 }
 0x64a   : > { %5605 = vmatmul.mubr.msk.bf16.vlgmr.msra.gmra.mrb[180].mxu1 %vm722_vm1, %v6154_v29  ;;  %5528 = vmatprep.mubr.msk.bf16.mxu0 %vm6549_vm2, %v6548_v41 }
 0x64b   : > { %5608 = vmatprep.mubr.msk.bf16.mxu1 %vm6549_vm2, %v6548_v41 }
 0x651   : > { %5529 = vmatmul.mubr.msk.bf16.gmra.mrb[172].mxu0 %vm722_vm1, %v6155_v35 }
 0x652   : > { %5609 = vmatmul.mubr.msk.bf16.gmra.mrb[184].mxu1 %vm722_vm1, %v6155_v35  ;;  %5532 = vmatprep.mubr.msk.bf16.mxu0 %vm6549_vm2, %v6548_v41 }
 0x653   : > { %5612 = vmatprep.mubr.msk.bf16.mxu1 %vm6549_vm2, %v6548_v41 }
 0x659   : > { %5533 = vmatmul.mubr.msk.bf16.gmra.mrb[176].mxu0 %vm722_vm1, %v6156_v50 }
 0x65a   : > { %5613 = vmatmul.mubr.msk.bf16.gmra.mrb[188].mxu1 %vm722_vm1, %v6156_v50  ;;  %5536 = vmatprep.mubr.msk.bf16.mxu0 %vm6549_vm2, %v6548_v41 }
 0x65b   : > { %5616 = vmatprep.mubr.msk.bf16.mxu1 %vm6549_vm2, %v6548_v41 }
 0x661   : > { %5537 = vmatmul.mubr.msk.bf16.gmra.mrb[180].mxu0 %vm722_vm1, %v6157_v27 }
 0x662   : > { %5617 = vmatmul.mubr.msk.bf16.gmra.mrb[192].mxu1 %vm722_vm1, %v6157_v27  ;;  %5540 = vmatprep.mubr.msk.bf16.mxu0 %vm6549_vm2, %v6548_v41 }
 0x663   : > { %5620 = vmatprep.mubr.msk.bf16.mxu1 %vm6549_vm2, %v6548_v41 }
 0x669   : > { %5541 = vmatmul.mubr.msk.bf16.gmra.mrb[184].mxu0 %vm722_vm1, %v6158_v51 }
 0x66a   : > { %5621 = vmatmul.mubr.msk.bf16.gmra.mrb[196].mxu1 %vm722_vm1, %v6158_v51  ;;  %5544 = vmatprep.mubr.msk.bf16.mxu0 %vm6549_vm2, %v6548_v41 }
 0x66b   : > { %5624 = vmatprep.mubr.msk.bf16.mxu1 %vm6549_vm2, %v6548_v41 }
 0x671   : > { %5545 = vmatmul.mubr.msk.bf16.gmra.mrb[188].mxu0 %vm722_vm1, %v6159_v47 }
 0x672   : > { %5625 = vmatmul.mubr.msk.bf16.gmra.mrb[200].mxu1 %vm722_vm1, %v6159_v47  ;;  %5548 = vmatprep.mubr.msk.bf16.mxu0 %vm6549_vm2, %v6548_v41 }
 0x673   : > { %5628 = vmatprep.mubr.msk.bf16.mxu1 %vm6549_vm2, %v6548_v41 }
 0x679   : > { %5549 = vmatmul.mubr.msk.bf16.gmra.mrb[192].mxu0 %vm722_vm1, %v6160_v28 }
 0x67a   : > { %5629 = vmatmul.mubr.msk.bf16.gmra.mrb[204].mxu1 %vm722_vm1, %v6160_v28  ;;  %5552 = vmatprep.mubr.msk.bf16.mxu0 %vm6549_vm2, %v6548_v41 }
 0x67b   : > { %5632 = vmatprep.mubr.msk.bf16.mxu1 %vm6549_vm2, %v6548_v41 }
 0x681   : > { %5553 = vmatmul.mubr.msk.bf16.gmra.mrb[196].mxu0 %vm722_vm1, %v6161_v33 }
 0x682   : > { %5633 = vmatmul.mubr.msk.bf16.gmra.mrb[208].mxu1 %vm722_vm1, %v6161_v33  ;;  %5556 = vmatprep.mubr.msk.bf16.mxu0 %vm6549_vm2, %v6548_v41 }
 0x683   : > { %5636 = vmatprep.mubr.msk.bf16.mxu1 %vm6549_vm2, %v6548_v41 }
 0x689   : > { %5557 = vmatmul.mubr.msk.bf16.gmra.mrb[200].mxu0 %vm722_vm1, %v6162_v48 }
 0x68a   : > { %5637 = vmatmul.mubr.msk.bf16.gmra.mrb[212].mxu1 %vm722_vm1, %v6162_v48  ;;  %v2977_v48 = vld [vmem:[#allocation16 + $0x2e8] sm:$0xff] }
 0x68c   : > { %v8077_v10 = vpop.f32.mrb[132].mxu0 }
 0x68d   : > { %v8079_v42 = vpop.f32.mrb[144].mxu1  ;;  %v5366_v34 = vpop.f32.mrb[133].mxu0  ;;  %v2936_v32 = vrot.slane %v8077_v10, 1 }
 0x68e   : > { %v5446_v13 = vpop.f32.mrb[145].mxu1  ;;  %v2868_v11 = vpop.f32.mrb[134].mxu0 }
 0x68f   : > { %v2937_v26 = vrot.slane %v2868_v11, 1  ;;  %v8083_v31 = vpop.f32.mrb[146].mxu1  ;;  %v5367_v41 = vpop.f32.mrb[135].mxu0 }
 0x690   : > { %v5447_v1 = vpop.f32.mrb[147].mxu1  ;;  %v3273_v9 = vrot.slane %v8083_v31, 3 }
 0x691   : > { %v2971_v52 = vsel %vm2954_vm9, %v2936_v32, %v2937_v26 }
 0x692   : > { %v2992_v8 = vmul.f32 %v2974_v24, %v2971_v52  ;;  %v2978_v52 = vld [vmem:[#allocation16 + $0x2f0] sm:$0xff] }
 0x694   : > { %v3010_v44 = vadd.f32 %v2992_v8, %v7892_v61  ;;  %v2873_v14 = vpop.f32.mrb[136].mxu0 }
 0x695   : > { %v2938_v16 = vrot.slane %v2873_v14, 1  ;;  %v3209_v0 = vpop.f32.mrb[148].mxu1  ;;  %v5370_v3 = vpop.f32.mrb[137].mxu0 }
 0x696   : > { %v3274_v21 = vrot.slane %v3209_v0, 3  ;;  %v5450_v18 = vpop.f32.mrb[149].mxu1  ;;  %v2876_v46 = vpop.f32.mrb[138].mxu0 }
 0x697   : > { %v2970_v57 = vsel %vm2954_vm9, %v2937_v26, %v2938_v16  ;;  %v2939_v19 = vrot.slane %v2876_v46, 1  ;;  %v3212_v54 = vpop.f32.mrb[150].mxu1  ;;  %v5371_v63 = vpop.f32.mrb[139].mxu0  ;;  %v3311_v26 = vld [vmem:[#allocation16 + $0x370] sm:$0xff] }
 0x698   : > { %v2993_v6 = vmul.f32 %v2975_v23, %v2970_v57  ;;  %v3305_v61 = vsel %vm1349_vm5, %v3273_v9, %v3274_v21  ;;  %v3275_v43 = vrot.slane %v3212_v54, 3  ;;  %v5451_v39 = vpop.f32.mrb[151].mxu1  ;;  %v3312_v23 = vld [vmem:[#allocation16 + $0x378] sm:$0xff] }
 0x699   : > { %v3327_v56 = vmul.f32 %v3309_v58, %v3305_v61  ;;  %v2969_v30 = vsel %vm2954_vm9, %v2938_v16, %v2939_v19  ;;  %v2979_v61 = vld [vmem:[#allocation16 + $0x2f8] sm:$0xff] }
 0x69a   : > { %v3011_v22 = vadd.f32 %v2993_v6, %v7894_v4  ;;  %v2994_v29 = vmul.f32 %v2976_v40, %v2969_v30  ;;  %v3304_v35 = vsel %vm1349_vm5, %v3274_v21, %v3275_v43 }
 0x69b   : > { %v8102_v50 = vadd.f32 %v3327_v56, %v3010_v44  ;;  %v3328_v27 = vmul.f32 %v3310_v36, %v3304_v35  ;;  %v3313_v56 = vld [vmem:[#allocation16 + $0x380] sm:$0xff] }
 0x69c   : > { %v3012_v51 = vadd.f32 %v2994_v29, %v7907_v59  ;;  %v2881_v47 = vpop.f32.mrb[140].mxu0  ;;  %v2980_v35 = vld [vmem:[#allocation16 + $0x300] sm:$0xff] }
 0x69d   : > { %v8105_v28 = vadd.f32 %v3328_v27, %v3011_v22  ;;  %v2940_v33 = vrot.slane %v2881_v47, 1  ;;  %v3217_v34 = vpop.f32.mrb[152].mxu1  ;;  %v5374_v13 = vpop.f32.mrb[141].mxu0 }
 0x69e   : > { %v3276_v11 = vrot.slane %v3217_v34, 3  ;;  %v5454_v24 = vpop.f32.mrb[153].mxu1  ;;  %v2884_v4 = vpop.f32.mrb[142].mxu0 }
 0x69f   : > { %v2968_v41 = vsel %vm2954_vm9, %v2939_v19, %v2940_v33  ;;  %v2941_v1 = vrot.slane %v2884_v4, 1  ;;  %v3220_v8 = vpop.f32.mrb[154].mxu1  ;;  %v5375_v44 = vpop.f32.mrb[143].mxu0 }
 0x6a0   : > { %v2995_v14 = vmul.f32 %v2977_v48, %v2968_v41  ;;  %v3303_v59 = vsel %vm1349_vm5, %v3275_v43, %v3276_v11  ;;  %v3277_v16 = vrot.slane %v3220_v8, 3  ;;  %v5455_v0 = vpop.f32.mrb[155].mxu1  ;;  %v3314_v48 = vld [vmem:[#allocation16 + $0x388] sm:$0xff] }
 0x6a1   : > { %v3329_v3 = vmul.f32 %v3311_v26, %v3303_v59  ;;  %v2967_v21 = vsel %vm2954_vm9, %v2940_v33, %v2941_v1  ;;  %v2981_v59 = vld [vmem:[#allocation16 + $0x308] sm:$0xff] }
 0x6a2   : > { %v3013_v58 = vadd.f32 %v2995_v14, %v7910_v37  ;;  %v2996_v18 = vmul.f32 %v2978_v52, %v2967_v21  ;;  %v3302_v46 = vsel %vm1349_vm5, %v3276_v11, %v3277_v16 }
 0x6a3   : > { %v8116_v57 = vadd.f32 %v3329_v3, %v3012_v51  ;;  %v3330_v19 = vmul.f32 %v3312_v23, %v3302_v46  ;;  %v3315_v3 = vld [vmem:[#allocation16 + $0x390] sm:$0xff] }
 0x6a4   : > { %v3014_v40 = vadd.f32 %v2996_v18, %v7921_v7  ;;  %v2889_v54 = vpop.f32.mrb[144].mxu0  ;;  %v2982_v46 = vld [vmem:[#allocation16 + $0x310] sm:$0xff] }
 0x6a5   : > { %v8119_v63 = vadd.f32 %v3330_v19, %v3013_v58  ;;  %v2942_v6 = vrot.slane %v2889_v54, 1  ;;  %v3225_v43 = vpop.f32.mrb[156].mxu1  ;;  %v5378_v36 = vpop.f32.mrb[145].mxu0 }
 0x6a6   : > { %v3278_v39 = vrot.slane %v3225_v43, 3  ;;  %v5458_v30 = vpop.f32.mrb[157].mxu1  ;;  %v2892_v37 = vpop.f32.mrb[146].mxu0 }
 0x6a7   : > { %v2966_v22 = vsel %vm2954_vm9, %v2941_v1, %v2942_v6  ;;  %v2943_v29 = vrot.slane %v2892_v37, 1  ;;  %v3228_v27 = vpop.f32.mrb[158].mxu1  ;;  %v5379_v51 = vpop.f32.mrb[147].mxu0 }
 0x6a8   : > { %v2997_v47 = vmul.f32 %v2979_v61, %v2966_v22  ;;  %v3301_v7 = vsel %vm1349_vm5, %v3277_v16, %v3278_v39  ;;  %v3279_v33 = vrot.slane %v3228_v27, 3  ;;  %v5459_v34 = vpop.f32.mrb[159].mxu1  ;;  %v3316_v61 = vld [vmem:[#allocation16 + $0x398] sm:$0xff] }
 0x6a9   : > { %v3331_v13 = vmul.f32 %v3313_v56, %v3301_v7  ;;  %v2965_v11 = vsel %vm2954_vm9, %v2942_v6, %v2943_v29  ;;  %v2983_v7 = vld [vmem:[#allocation16 + $0x318] sm:$0xff] }
 0x6aa   : > { %v3015_v26 = vadd.f32 %v2997_v47, %v7924_v55  ;;  %v2998_v24 = vmul.f32 %v2980_v35, %v2965_v11  ;;  %v3300_v4 = vsel %vm1349_vm5, %v3278_v39, %v3279_v33 }
 0x6ab   : > { %v8130_v41 = vadd.f32 %v3331_v13, %v3014_v40  ;;  %v3332_v1 = vmul.f32 %v3314_v48, %v3300_v4  ;;  %v3317_v13 = vld [vmem:[#allocation16 + $0x3a0] sm:$0xff] }
 0x6ac   : > { %v3016_v52 = vadd.f32 %v2998_v24, %v7935_v17  ;;  %v2897_v8 = vpop.f32.mrb[148].mxu0  ;;  %v2984_v4 = vld [vmem:[#allocation16 + $0x320] sm:$0xff] }
 0x6ad   : > { %v8133_v44 = vadd.f32 %v3332_v1, %v3015_v26  ;;  %v2944_v14 = vrot.slane %v2897_v8, 1  ;;  %v3233_v16 = vpop.f32.mrb[160].mxu1  ;;  %v5382_v23 = vpop.f32.mrb[149].mxu0 }
 0x6ae   : > { %v3280_v0 = vrot.slane %v3233_v16, 3  ;;  %v5462_v21 = vpop.f32.mrb[161].mxu1  ;;  %v2900_v55 = vpop.f32.mrb[150].mxu0 }
 0x6af   : > { %v2964_v58 = vsel %vm2954_vm9, %v2943_v29, %v2944_v14  ;;  %v2945_v18 = vrot.slane %v2900_v55, 1  ;;  %v3236_v19 = vpop.f32.mrb[162].mxu1  ;;  %v5383_v40 = vpop.f32.mrb[151].mxu0 }
 0x6b0   : > { %v2999_v54 = vmul.f32 %v2981_v59, %v2964_v58  ;;  %v3299_v17 = vsel %vm1349_vm5, %v3279_v33, %v3280_v0  ;;  %v3281_v6 = vrot.slane %v3236_v19, 3  ;;  %v5463_v43 = vpop.f32.mrb[163].mxu1  ;;  %v3318_v59 = vld [vmem:[#allocation16 + $0x3a8] sm:$0xff] }
 0x6b1   : > { %v3333_v36 = vmul.f32 %v3315_v3, %v3299_v17  ;;  %v2963_v39 = vsel %vm2954_vm9, %v2944_v14, %v2945_v18  ;;  %v2985_v17 = vld [vmem:[#allocation16 + $0x328] sm:$0xff] }
 0x6b2   : > { %v3017_v56 = vadd.f32 %v2999_v54, %v7938_v60  ;;  %v3000_v30 = vmul.f32 %v2982_v46, %v2963_v39  ;;  %v3298_v37 = vsel %vm1349_vm5, %v3280_v0, %v3281_v6 }
 0x6b3   : > { %v8144_v22 = vadd.f32 %v3333_v36, %v3016_v52  ;;  %v3334_v29 = vmul.f32 %v3316_v61, %v3298_v37  ;;  %v3319_v36 = vld [vmem:[#allocation16 + $0x3b0] sm:$0xff] }
 0x6b4   : > { %v3018_v35 = vadd.f32 %v3000_v30, %v7949_v62  ;;  %v2905_v27 = vpop.f32.mrb[152].mxu0  ;;  %v2986_v37 = vld [vmem:[#allocation16 + $0x330] sm:$0xff] }
 0x6b5   : > { %v8147_v51 = vadd.f32 %v3334_v29, %v3017_v56  ;;  %v2946_v47 = vrot.slane %v2905_v27, 1  ;;  %v3241_v33 = vpop.f32.mrb[164].mxu1  ;;  %v5386_v48 = vpop.f32.mrb[153].mxu0 }
 0x6b6   : > { %v3282_v34 = vrot.slane %v3241_v33, 3  ;;  %v5466_v11 = vpop.f32.mrb[165].mxu1  ;;  %v2908_v60 = vpop.f32.mrb[154].mxu0 }
 0x6b7   : > { %v2962_v26 = vsel %vm2954_vm9, %v2945_v18, %v2946_v47  ;;  %v2947_v24 = vrot.slane %v2908_v60, 1  ;;  %v3244_v1 = vpop.f32.mrb[166].mxu1  ;;  %v5387_v52 = vpop.f32.mrb[155].mxu0 }
 0x6b8   : > { %v3001_v8 = vmul.f32 %v2983_v7, %v2962_v26  ;;  %v3297_v62 = vsel %vm1349_vm5, %v3281_v6, %v3282_v34  ;;  %v3283_v14 = vrot.slane %v3244_v1, 3  ;;  %v5467_v16 = vpop.f32.mrb[167].mxu1  ;;  %v3320_v7 = vld [vmem:[#allocation16 + $0x3b8] sm:$0xff] }
 0x6b9   : > { %v3335_v23 = vmul.f32 %v3317_v13, %v3297_v62  ;;  %v2961_v0 = vsel %vm2954_vm9, %v2946_v47, %v2947_v24  ;;  %v2987_v62 = vld [vmem:[#allocation16 + $0x338] sm:$0xff] }
 0x6ba   : > { %v3019_v3 = vadd.f32 %v3001_v8, %v7952_v5  ;;  %v3002_v21 = vmul.f32 %v2984_v4, %v2961_v0  ;;  %v3296_v55 = vsel %vm1349_vm5, %v3282_v34, %v3283_v14 }
 0x6bb   : > { %v8158_v58 = vadd.f32 %v3335_v23, %v3018_v35  ;;  %v3336_v18 = vmul.f32 %v3318_v59, %v3296_v55  ;;  %v3321_v23 = vld [vmem:[#allocation16 + $0x3c0] sm:$0xff] }
 0x6bc   : > { %v3020_v46 = vadd.f32 %v3002_v21, %v7963_v53  ;;  %v2913_v19 = vpop.f32.mrb[156].mxu0  ;;  %v2988_v55 = vld [vmem:[#allocation16 + $0x340] sm:$0xff] }
 0x6bd   : > { %v8161_v40 = vadd.f32 %v3336_v18, %v3019_v3  ;;  %v2948_v54 = vrot.slane %v2913_v19, 1  ;;  %v3249_v6 = vpop.f32.mrb[168].mxu1  ;;  %v5390_v61 = vpop.f32.mrb[157].mxu0 }
 0x6be   : > { %v3284_v43 = vrot.slane %v3249_v6, 3  ;;  %v5470_v39 = vpop.f32.mrb[169].mxu1  ;;  %v2916_v5 = vpop.f32.mrb[158].mxu0 }
 0x6bf   : > { %v2960_v56 = vsel %vm2954_vm9, %v2947_v24, %v2948_v54  ;;  %v2949_v30 = vrot.slane %v2916_v5, 1  ;;  %v3252_v29 = vpop.f32.mrb[170].mxu1  ;;  %v5391_v35 = vpop.f32.mrb[159].mxu0 }
 0x6c0   : > { %v3003_v27 = vmul.f32 %v2985_v17, %v2960_v56  ;;  %v3295_v53 = vsel %vm1349_vm5, %v3283_v14, %v3284_v43  ;;  %v3285_v47 = vrot.slane %v3252_v29, 3  ;;  %v5471_v33 = vpop.f32.mrb[171].mxu1  ;;  %v3322_v17 = vld [vmem:[#allocation16 + $0x3c8] sm:$0xff] }
 0x6c1   : > { %v3337_v48 = vmul.f32 %v3319_v36, %v3295_v53  ;;  %v2959_v34 = vsel %vm2954_vm9, %v2948_v54, %v2949_v30  ;;  %v2989_v53 = vld [vmem:[#allocation16 + $0x348] sm:$0xff] }
 0x6c2   : > { %v3021_v13 = vadd.f32 %v3003_v27, %v7966_v15  ;;  %v3004_v11 = vmul.f32 %v2986_v37, %v2959_v34  ;;  %v3294_v60 = vsel %vm1349_vm5, %v3284_v43, %v3285_v47 }
 0x6c3   : > { %v8172_v26 = vadd.f32 %v3337_v48, %v3020_v46  ;;  %v3338_v24 = vmul.f32 %v3320_v7, %v3294_v60  ;;  %v3323_v48 = vld [vmem:[#allocation16 + $0x3d0] sm:$0xff] }
 0x6c4   : > { %v3022_v4 = vadd.f32 %v3004_v11, %v7977_v38  ;;  %v2921_v1 = vpop.f32.mrb[160].mxu0 }
 0x6c5   : > { %v8175_v52 = vadd.f32 %v3338_v24, %v3021_v13  ;;  %v2950_v8 = vrot.slane %v2921_v1, 1  ;;  %v3257_v14 = vpop.f32.mrb[172].mxu1  ;;  %v5394_v59 = vpop.f32.mrb[161].mxu0  ;;  %v3272_v13 = vrot.slane %v8079_v42, 3  ;;  %v2990_v24 = vld [vmem:[#allocation16 + $0x350] sm:$0xff] }
 0x6c6   : > { %v3286_v16 = vrot.slane %v3257_v14, 3  ;;  %v5474_v0 = vpop.f32.mrb[173].mxu1  ;;  %v2924_v15 = vpop.f32.mrb[162].mxu0  ;;  %v3324_v59 = vld [vmem:[#allocation16 + $0x3d8] sm:$0xff] }
 0x6c7   : > { %v2958_v3 = vsel %vm2954_vm9, %v2949_v30, %v2950_v8  ;;  %v2951_v21 = vrot.slane %v2924_v15, 1  ;;  %v3260_v18 = vpop.f32.mrb[174].mxu1  ;;  %v5395_v46 = vpop.f32.mrb[163].mxu0  ;;  %v3306_v42 = vsel %vm1349_vm5, %v3272_v13, %v3273_v9 }
 0x6c8   : > { %v3005_v19 = vmul.f32 %v2987_v62, %v2958_v3  ;;  %v3293_v38 = vsel %vm1349_vm5, %v3285_v47, %v3286_v16  ;;  %v3287_v54 = vrot.slane %v3260_v18, 3  ;;  %v5475_v6 = vpop.f32.mrb[175].mxu1 }
 0x6c9   : > { %v3339_v61 = vmul.f32 %v3321_v23, %v3293_v38  ;;  %v2957_v43 = vsel %vm2954_vm9, %v2950_v8, %v2951_v21  ;;  %v3326_v23 = vld [vmem:[#allocation16 + $0x3e8] sm:$0xff] }
 0x6ca   : > { %v3023_v36 = vadd.f32 %v3005_v19, %v7980_v20  ;;  %v3006_v39 = vmul.f32 %v2988_v55, %v2957_v43  ;;  %v3292_v5 = vsel %vm1349_vm5, %v3286_v16, %v3287_v54 }
 0x6cb   : > { %v8186_v56 = vadd.f32 %v3339_v61, %v3022_v4  ;;  %v3340_v30 = vmul.f32 %v3322_v17, %v3292_v5  ;;  %v2991_v4 = vld [vmem:[#allocation16 + $0x358] sm:$0xff] }
 0x6cc   : > { %v3024_v37 = vadd.f32 %v3006_v39, %v7991_v45  ;;  %v2929_v29 = vpop.f32.mrb[164].mxu0 }
 0x6cd   : > { %v8189_v35 = vadd.f32 %v3340_v30, %v3023_v36  ;;  %v2952_v27 = vrot.slane %v2929_v29, 1  ;;  %v3265_v47 = vpop.f32.mrb[176].mxu1  ;;  %v5398_v7 = vpop.f32.mrb[165].mxu0 }
 0x6ce   : > { %v3288_v33 = vrot.slane %v3265_v47, 3  ;;  %v5478_v34 = vpop.f32.mrb[177].mxu1  ;;  %v2932_v20 = vpop.f32.mrb[166].mxu0 }
 0x6cf   : > { %v2956_v11 = vsel %vm2954_vm9, %v2951_v21, %v2952_v27  ;;  %v2953_v60 = vrot.slane %v2932_v20, 1  ;;  %v3268_v45 = vpop.f32.mrb[178].mxu1  ;;  %v5399_v1 = vpop.f32.mrb[167].mxu0  ;;  %v3325_v21 = vld [vmem:[#allocation16 + $0x3e0] sm:$0xff] }
 0x6d0   : > { %v3007_v8 = vmul.f32 %v2989_v53, %v2956_v11  ;;  %v3291_v62 = vsel %vm1349_vm5, %v3287_v54, %v3288_v33  ;;  %v3289_v14 = vrot.slane %v3268_v45, 3  ;;  %v5479_v16 = vpop.f32.mrb[179].mxu1  ;;  %v3344_v54 = vmul.f32 %v3326_v23, %v3306_v42  ;;  %v3644_v45 = vld [vmem:[#allocation16 + $0x3f0] sm:$0xff] }
 0x6d1   : > { %v3341_v0 = vmul.f32 %v3323_v48, %v3291_v62  ;;  %v2955_v15 = vsel %vm2954_vm9, %v2952_v27, %v2953_v60  ;;  %v2972_v3 = vsel %vm2954_vm9, %v2953_v60, %v2936_v32  ;;  %v3661_v27 = vld [vmem:[#allocation16 + $0x478] sm:$0xff]  ;;  %v3996_v48 = vld [vmem:[#allocation16 + $0x508] sm:$0xff] }
 0x6d2   : > { %v3025_v55 = vadd.f32 %v3007_v8, %v7994_v25  ;;  %v3008_v18 = vmul.f32 %v2990_v24, %v2955_v15  ;;  %v3009_v46 = vmul.f32 %v2991_v4, %v2972_v3  ;;  %v3290_v31 = vsel %vm1349_vm5, %v3288_v33, %v3289_v14  ;;  %v8233_v24 = vld [vmem:[#allocation17] ss:$0 sm:$0xff]  ;;  %v3645_v15 = vld [vmem:[#allocation16 + $0x3f8] sm:$0xff] }
 0x6d3   : > { %v8209_v19 = vadd.f32 %v3341_v0, %v3024_v37  ;;  %v3307_v9 = vsel %vm1349_vm5, %v3289_v14, %v3272_v13  ;;  %v3342_v38 = vmul.f32 %v3324_v59, %v3290_v31  ;;  %v3979_v59 = vld [vmem:[#allocation16 + $0x480] sm:$0xff] }
 0x6d4   : > { %v3026_v10 = vadd.f32 %v3008_v18, %v8005_v49  ;;  %v3027_v17 = vadd.f32 %v3009_v46, %v8010_v12  ;;  %v3343_v32 = vmul.f32 %v3325_v21, %v3307_v9 }
 0x6d5   : > { %v8215_v6 = vadd.f32 %v3342_v38, %v3025_v55 }
 0x6d6   : > { %v8217_v25 = vadd.f32 %v3343_v32, %v3026_v10  ;;  %v3362_v61 = vadd.f32 %v3344_v54, %v3027_v17  ;;  %v3980_v10 = vld [vmem:[#allocation16 + $0x488] sm:$0xff] }
 0x71c   : > { %v8219_v43 = vpop.f32.mrb[168].mxu0 }
 0x71d   : > { %v8221_v36 = vpop.f32.mrb[180].mxu1  ;;  %v5526_v39 = vpop.f32.mrb[169].mxu0  ;;  %v3607_v37 = vrot.slane %v8219_v43, 4 }
 0x71e   : > { %v5606_v5 = vpop.f32.mrb[181].mxu1  ;;  %v3539_v30 = vpop.f32.mrb[170].mxu0  ;;  %v3942_v12 = vrot.slane %v8221_v36, 5 }
 0x71f   : > { %v3608_v29 = vrot.slane %v3539_v30, 4  ;;  %v3874_v49 = vpop.f32.mrb[182].mxu1  ;;  %v5527_v53 = vpop.f32.mrb[171].mxu0 }
 0x720   : > { %v3943_v47 = vrot.slane %v3874_v49, 5  ;;  %v5607_v7 = vpop.f32.mrb[183].mxu1 }
 0x721   : > { %v3641_v33 = vsel %vm1684_vm6, %v3607_v37, %v3608_v29 }
 0x722   : > { %v3679_v34 = vmul.f32 %v3661_v27, %v3641_v33  ;;  %v3976_v20 = vsel %vm2020_vm7, %v3942_v12, %v3943_v47 }
 0x723   : > { %v4014_v11 = vmul.f32 %v3996_v48, %v3976_v20  ;;  %v3981_v20 = vld [vmem:[#allocation16 + $0x490] sm:$0xff] }
 0x724   : > { %v3697_v13 = vadd.f32 %v3679_v34, %v3362_v61  ;;  %v3544_v60 = vpop.f32.mrb[172].mxu0 }
 0x725   : > { %v3609_v4 = vrot.slane %v3544_v60, 4  ;;  %v3879_v1 = vpop.f32.mrb[184].mxu1  ;;  %v5530_v8 = vpop.f32.mrb[173].mxu0 }
 0x726   : > { %v4032_v62 = vadd.f32 %v4014_v11, %v3697_v13  ;;  %v3944_v14 = vrot.slane %v3879_v1, 5  ;;  %v5610_v16 = vpop.f32.mrb[185].mxu1  ;;  %v3547_v42 = vpop.f32.mrb[174].mxu0 }
 0x727   : > { %v3640_v23 = vsel %vm1684_vm6, %v3608_v29, %v3609_v4  ;;  %v3610_v0 = vrot.slane %v3547_v42, 4  ;;  %v3882_v3 = vpop.f32.mrb[186].mxu1  ;;  %v5531_v21 = vpop.f32.mrb[175].mxu0 }
 0x728   : > { %v4057_v55 = vadd.f32 %v8233_v24, %v4032_v62  ;;  %v3662_v18 = vmul.f32 %v3644_v45, %v3640_v23  ;;  %v3975_v46 = vsel %vm2020_vm7, %v3943_v47, %v3944_v14  ;;  %v3945_v31 = vrot.slane %v3882_v3, 5  ;;  %v5611_v9 = vpop.f32.mrb[187].mxu1  ;;  %v3646_v47 = vld [vmem:[#allocation16 + $0x400] sm:$0xff]  ;;  %v3982_v3 = vld [vmem:[#allocation16 + $0x498] sm:$0xff] }
 0x729   : > { %v3997_v38 = vmul.f32 %v3979_v59, %v3975_v46  ;;  %v3639_v54 = vsel %vm1684_vm6, %v3609_v4, %v3610_v0  ;;  %v3647_v4 = vld [vmem:[#allocation16 + $0x408] sm:$0xff] }
 0x72a   : > { %v4075_v17 = vmax.f32 %v4057_v55, 0.0  ;;  %v3680_v32 = vadd.f32 %v3662_v18, %v8102_v50  ;;  %v3663_v61 = vmul.f32 %v3645_v15, %v3639_v54  ;;  %v3974_v39 = vsel %vm2020_vm7, %v3944_v14, %v3945_v31 }
 0x72b   : > { %v3998_v27 = vmul.f32 %v3980_v10, %v3974_v39 }
 0x72c   : > { %v4646_v5 = vpack.c.bf16 %v4075_v17, %v4075_v17  ;;  %v4015_v30 = vadd.f32 %v3997_v38, %v3680_v32  ;;  %v3681_v29 = vadd.f32 %v3663_v61, %v8105_v28  ;;  %v3552_v49 = vpop.f32.mrb[176].mxu0  ;;  %v3648_v32 = vld [vmem:[#allocation16 + $0x410] sm:$0xff] }
 0x72d   : > { %v3611_v53 = vrot.slane %v3552_v49, 4  ;;  %v3887_v7 = vpop.f32.mrb[188].mxu1  ;;  %v5534_v33 = vpop.f32.mrb[177].mxu0 }
 0x72e   : > { %4166 = vst.msk [vmem:[%s8248_s27 + $0x44] sm:$0xf] %vm4148_vm10, %v4646_v5  ;;  %v4040_v50 = vadd.f32 %v8233_v24, %v4015_v30  ;;  %v4016_v48 = vadd.f32 %v3998_v27, %v3681_v29  ;;  %v3946_v34 = vrot.slane %v3887_v7, 5  ;;  %v5614_v13 = vpop.f32.mrb[189].mxu1  ;;  %v3555_v11 = vpop.f32.mrb[178].mxu0  ;;  %v3983_v29 = vld [vmem:[#allocation16 + $0x4a0] sm:$0xff] }
 0x72f   : > { %v3638_v28 = vsel %vm1684_vm6, %v3610_v0, %v3611_v53  ;;  %v3612_v60 = vrot.slane %v3555_v11, 4  ;;  %v3890_v45 = vpop.f32.mrb[190].mxu1  ;;  %v5535_v1 = vpop.f32.mrb[179].mxu0 }
 0x730   : > { %v4058_v8 = vmax.f32 %v4040_v50, 0.0  ;;  %v4041_v62 = vadd.f32 %v8233_v24, %v4016_v48  ;;  %v3664_v14 = vmul.f32 %v3646_v47, %v3638_v28  ;;  %v3973_v59 = vsel %vm2020_vm7, %v3945_v31, %v3946_v34  ;;  %v5615_v16 = vpop.f32.mrb[191].mxu1 }
 0x731   : > { %v3999_v42 = vmul.f32 %v3981_v20, %v3973_v59  ;;  %v3637_v23 = vsel %vm1684_vm6, %v3611_v53, %v3612_v60  ;;  %v3947_v15 = vrot.slane %v3890_v45, 5  ;;  %v3984_v45 = vld [vmem:[#allocation16 + $0x4a8] sm:$0xff] }
 0x732   : > { %v4629_v0 = vpack.c.bf16 %v4058_v8, %v4058_v8  ;;  %v4059_v21 = vmax.f32 %v4041_v62, 0.0  ;;  %v3682_v55 = vadd.f32 %v3664_v14, %v8116_v57  ;;  %v3665_v18 = vmul.f32 %v3647_v4, %v3637_v23 }
 0x733   : > { %v3972_v46 = vsel %vm2020_vm7, %v3946_v34, %v3947_v15 }
 0x734   : > { %4149 = vst.msk [vmem:[%s8248_s27] sm:$0xf] %vm4148_vm10, %v4629_v0  ;;  %v4630_v9 = vpack.c.bf16 %v4059_v21, %v4059_v21  ;;  %v4017_v31 = vadd.f32 %v3999_v42, %v3682_v55  ;;  %v3683_v38 = vadd.f32 %v3665_v18, %v8119_v63  ;;  %v4000_v54 = vmul.f32 %v3982_v3, %v3972_v46  ;;  %v3560_v10 = vpop.f32.mrb[180].mxu0  ;;  %v3649_v63 = vld [vmem:[#allocation16 + $0x418] sm:$0xff]  ;;  %v3650_v0 = vld [vmem:[#allocation16 + $0x420] sm:$0xff] }
 0x735   : > { %v3613_v17 = vrot.slane %v3560_v10, 4  ;;  %v3895_v61 = vpop.f32.mrb[192].mxu1  ;;  %v5538_v39 = vpop.f32.mrb[181].mxu0 }
 0x736   : > { %4150 = vst.msk [vmem:[%s8248_s27 + $0x4] sm:$0xf] %vm4148_vm10, %v4630_v9  ;;  %v4042_v57 = vadd.f32 %v8233_v24, %v4017_v31  ;;  %v4018_v5 = vadd.f32 %v4000_v54, %v3683_v38  ;;  %v3948_v30 = vrot.slane %v3895_v61, 5  ;;  %v5618_v27 = vpop.f32.mrb[193].mxu1  ;;  %v3563_v49 = vpop.f32.mrb[182].mxu0  ;;  %v3985_v9 = vld [vmem:[#allocation16 + $0x4b0] sm:$0xff] }
 0x737   : > { %v3636_v53 = vsel %vm1684_vm6, %v3612_v60, %v3613_v17  ;;  %v3614_v47 = vrot.slane %v3563_v49, 4  ;;  %v3898_v7 = vpop.f32.mrb[194].mxu1  ;;  %v5539_v33 = vpop.f32.mrb[183].mxu0 }
 0x738   : > { %v4060_v50 = vmax.f32 %v4042_v57, 0.0  ;;  %v4043_v48 = vadd.f32 %v8233_v24, %v4018_v5  ;;  %v3666_v34 = vmul.f32 %v3648_v32, %v3636_v53  ;;  %v3971_v20 = vsel %vm2020_vm7, %v3947_v15, %v3948_v30  ;;  %v5619_v13 = vpop.f32.mrb[195].mxu1  ;;  %v3986_v53 = vld [vmem:[#allocation16 + $0x4b8] sm:$0xff] }
 0x739   : > { %v4001_v11 = vmul.f32 %v3983_v29, %v3971_v20  ;;  %v3635_v28 = vsel %vm1684_vm6, %v3613_v17, %v3614_v47  ;;  %v3949_v4 = vrot.slane %v3898_v7, 5 }
 0x73a   : > { %v4631_v60 = vpack.c.bf16 %v4060_v50, %v4060_v50  ;;  %v4061_v1 = vmax.f32 %v4043_v48, 0.0  ;;  %v3684_v8 = vadd.f32 %v3666_v34, %v8130_v41  ;;  %v3667_v62 = vmul.f32 %v3649_v63, %v3635_v28 }
 0x73b   : > { %v3970_v14 = vsel %vm2020_vm7, %v3948_v30, %v3949_v4 }
 0x73c   : > { %4151 = vst.msk [vmem:[%s8248_s27 + $0x8] sm:$0xf] %vm4148_vm10, %v4631_v60  ;;  %v4632_v59 = vpack.c.bf16 %v4061_v1, %v4061_v1  ;;  %v4019_v16 = vadd.f32 %v4001_v11, %v3684_v8  ;;  %v3685_v42 = vadd.f32 %v3667_v62, %v8133_v44  ;;  %v4002_v23 = vmul.f32 %v3984_v45, %v3970_v14  ;;  %v3568_v15 = vpop.f32.mrb[184].mxu0  ;;  %v3651_v44 = vld [vmem:[#allocation16 + $0x428] sm:$0xff]  ;;  %v3987_v62 = vld [vmem:[#allocation16 + $0x4c0] sm:$0xff] }
 0x73d   : > { %v3615_v3 = vrot.slane %v3568_v15, 4  ;;  %v3903_v21 = vpop.f32.mrb[196].mxu1  ;;  %v5542_v55 = vpop.f32.mrb[185].mxu0 }
 0x73e   : > { %4152 = vst.msk [vmem:[%s8248_s27 + $0xc] sm:$0xf] %vm4148_vm10, %v4632_v59  ;;  %v4044_v41 = vadd.f32 %v8233_v24, %v4019_v16  ;;  %v4020_v18 = vadd.f32 %v4002_v23, %v3685_v42  ;;  %v3950_v46 = vrot.slane %v3903_v21, 5  ;;  %v5622_v31 = vpop.f32.mrb[197].mxu1  ;;  %v3571_v38 = vpop.f32.mrb[186].mxu0 }
 0x73f   : > { %v3634_v54 = vsel %vm1684_vm6, %v3614_v47, %v3615_v3  ;;  %v3616_v10 = vrot.slane %v3571_v38, 4  ;;  %v3906_v17 = vpop.f32.mrb[198].mxu1  ;;  %v5543_v32 = vpop.f32.mrb[187].mxu0  ;;  %v3988_v31 = vld [vmem:[#allocation16 + $0x4c8] sm:$0xff] }
 0x740   : > { %v4062_v61 = vmax.f32 %v4044_v41, 0.0  ;;  %v4045_v39 = vadd.f32 %v8233_v24, %v4020_v18  ;;  %v3668_v57 = vmul.f32 %v3650_v0, %v3634_v54  ;;  %v3969_v5 = vsel %vm2020_vm7, %v3949_v4, %v3950_v46  ;;  %v5623_v30 = vpop.f32.mrb[199].mxu1  ;;  %v3652_v4 = vld [vmem:[#allocation16 + $0x430] sm:$0xff] }
 0x741   : > { %v4003_v29 = vmul.f32 %v3985_v9, %v3969_v5  ;;  %v3633_v27 = vsel %vm1684_vm6, %v3615_v3, %v3616_v10  ;;  %v3951_v49 = vrot.slane %v3906_v17, 5 }
 0x742   : > { %v4633_v47 = vpack.c.bf16 %v4062_v61, %v4062_v61  ;;  %v4063_v63 = vmax.f32 %v4045_v39, 0.0  ;;  %v3686_v7 = vadd.f32 %v3668_v57, %v8144_v22  ;;  %v3669_v33 = vmul.f32 %v3651_v44, %v3633_v27 }
 0x743   : > { %v3968_v50 = vsel %vm2020_vm7, %v3950_v46, %v3951_v49 }
 0x744   : > { %4153 = vst.msk [vmem:[%s8248_s27 + $0x10] sm:$0xf] %vm4148_vm10, %v4633_v47  ;;  %v4634_v48 = vpack.c.bf16 %v4063_v63, %v4063_v63  ;;  %v4021_v34 = vadd.f32 %v4003_v29, %v3686_v7  ;;  %v3687_v20 = vadd.f32 %v3669_v33, %v8147_v51  ;;  %v4004_v13 = vmul.f32 %v3986_v53, %v3968_v50  ;;  %v3576_v11 = vpop.f32.mrb[188].mxu0  ;;  %v3653_v51 = vld [vmem:[#allocation16 + $0x438] sm:$0xff]  ;;  %v3654_v29 = vld [vmem:[#allocation16 + $0x440] sm:$0xff]  ;;  %v3989_v63 = vld [vmem:[#allocation16 + $0x4d0] sm:$0xff] }
 0x745   : > { %v3617_v28 = vrot.slane %v3576_v11, 4  ;;  %v3911_v45 = vpop.f32.mrb[200].mxu1  ;;  %v5546_v60 = vpop.f32.mrb[189].mxu0 }
 0x746   : > { %4154 = vst.msk [vmem:[%s8248_s27 + $0x14] sm:$0xf] %vm4148_vm10, %v4634_v48  ;;  %v4046_v22 = vadd.f32 %v8233_v24, %v4021_v34  ;;  %v4022_v1 = vadd.f32 %v4004_v13, %v3687_v20  ;;  %v3952_v8 = vrot.slane %v3911_v45, 5  ;;  %v5626_v14 = vpop.f32.mrb[201].mxu1  ;;  %v3579_v59 = vpop.f32.mrb[190].mxu0 }
 0x747   : > { %v3632_v16 = vsel %vm1684_vm6, %v3616_v10, %v3617_v28  ;;  %v3618_v42 = vrot.slane %v3579_v59, 4  ;;  %v3914_v23 = vpop.f32.mrb[202].mxu1  ;;  %v5547_v15 = vpop.f32.mrb[191].mxu0 }
 0x748   : > { %v4064_v3 = vmax.f32 %v4046_v22, 0.0  ;;  %v4047_v0 = vadd.f32 %v8233_v24, %v4022_v1  ;;  %v3670_v21 = vmul.f32 %v3652_v4, %v3632_v16  ;;  %v3967_v55 = vsel %vm2020_vm7, %v3951_v49, %v3952_v8  ;;  %v5627_v41 = vpop.f32.mrb[203].mxu1 }
 0x749   : > { %v4005_v18 = vmul.f32 %v3987_v62, %v3967_v55  ;;  %v3631_v46 = vsel %vm1684_vm6, %v3617_v28, %v3618_v42  ;;  %v3953_v9 = vrot.slane %v3914_v23, 5  ;;  %v3656_v55 = vld [vmem:[#allocation16 + $0x450] sm:$0xff] }
 0x74a   : > { %v4635_v38 = vpack.c.bf16 %v4064_v3, %v4064_v3  ;;  %v4065_v54 = vmax.f32 %v4047_v0, 0.0  ;;  %v3688_v10 = vadd.f32 %v3670_v21, %v8158_v58  ;;  %v3671_v44 = vmul.f32 %v3653_v51, %v3631_v46 }
 0x74b   : > { %v3966_v17 = vsel %vm2020_vm7, %v3952_v8, %v3953_v9  ;;  %v3990_v8 = vld [vmem:[#allocation16 + $0x4d8] sm:$0xff] }
 0x74c   : > { %4155 = vst.msk [vmem:[%s8248_s27 + $0x18] sm:$0xf] %vm4148_vm10, %v4635_v38  ;;  %v4636_v32 = vpack.c.bf16 %v4065_v54, %v4065_v54  ;;  %v4023_v61 = vadd.f32 %v4005_v18, %v3688_v10  ;;  %v3689_v39 = vadd.f32 %v3671_v44, %v8161_v40  ;;  %v4006_v57 = vmul.f32 %v3988_v31, %v3966_v17  ;;  %v3584_v5 = vpop.f32.mrb[192].mxu0  ;;  %v3655_v40 = vld [vmem:[#allocation16 + $0x448] sm:$0xff]  ;;  %v3991_v31 = vld [vmem:[#allocation16 + $0x4e0] sm:$0xff] }
 0x74d   : > { %v3619_v30 = vrot.slane %v3584_v5, 4  ;;  %v3919_v27 = vpop.f32.mrb[204].mxu1  ;;  %v5550_v49 = vpop.f32.mrb[193].mxu0 }
 0x74e   : > { %4156 = vst.msk [vmem:[%s8248_s27 + $0x1c] sm:$0xf] %vm4148_vm10, %v4636_v32  ;;  %v4048_v58 = vadd.f32 %v8233_v24, %v4023_v61  ;;  %v4024_v53 = vadd.f32 %v4006_v57, %v3689_v39  ;;  %v3954_v47 = vrot.slane %v3919_v27, 5  ;;  %v5630_v7 = vpop.f32.mrb[205].mxu1  ;;  %v3587_v33 = vpop.f32.mrb[194].mxu0 }
 0x74f   : > { %v3630_v50 = vsel %vm1684_vm6, %v3618_v42, %v3619_v30  ;;  %v3620_v48 = vrot.slane %v3587_v33, 4  ;;  %v3922_v34 = vpop.f32.mrb[206].mxu1  ;;  %v5551_v20 = vpop.f32.mrb[195].mxu0 }
 0x750   : > { %v4066_v13 = vmax.f32 %v4048_v58, 0.0  ;;  %v4049_v11 = vadd.f32 %v8233_v24, %v4024_v53  ;;  %v3672_v28 = vmul.f32 %v3654_v29, %v3630_v50  ;;  %v3965_v4 = vsel %vm2020_vm7, %v3953_v9, %v3954_v47  ;;  %v5631_v45 = vpop.f32.mrb[207].mxu1  ;;  %v3992_v58 = vld [vmem:[#allocation16 + $0x4e8] sm:$0xff] }
 0x751   : > { %v4007_v60 = vmul.f32 %v3989_v63, %v3965_v4  ;;  %v3629_v22 = vsel %vm1684_vm6, %v3619_v30, %v3620_v48  ;;  %v3955_v1 = vrot.slane %v3922_v34, 5 }
 0x752   : > { %v4637_v62 = vpack.c.bf16 %v4066_v13, %v4066_v13  ;;  %v4067_v14 = vmax.f32 %v4049_v11, 0.0  ;;  %v3690_v59 = vadd.f32 %v3672_v28, %v8172_v26  ;;  %v3673_v16 = vmul.f32 %v3655_v40, %v3629_v22  ;;  %v3658_v11 = vld [vmem:[#allocation16 + $0x460] sm:$0xff]  ;;  %v3993_v22 = vld [vmem:[#allocation16 + $0x4f0] sm:$0xff] }
 0x753   : > { %v3964_v42 = vsel %vm2020_vm7, %v3954_v47, %v3955_v1 }
 0x754   : > { %4157 = vst.msk [vmem:[%s8248_s27 + $0x20] sm:$0xf] %vm4148_vm10, %v4637_v62  ;;  %v4638_v51 = vpack.c.bf16 %v4067_v14, %v4067_v14  ;;  %v4025_v23 = vadd.f32 %v4007_v60, %v3690_v59  ;;  %v3691_v15 = vadd.f32 %v3673_v16, %v8175_v52  ;;  %v4008_v3 = vmul.f32 %v3990_v8, %v3964_v42  ;;  %v3592_v0 = vpop.f32.mrb[196].mxu0  ;;  %v3657_v52 = vld [vmem:[#allocation16 + $0x458] sm:$0xff] }
 0x755   : > { %v3621_v21 = vrot.slane %v3592_v0, 4  ;;  %v3927_v41 = vpop.f32.mrb[208].mxu1  ;;  %v5554_v18 = vpop.f32.mrb[197].mxu0 }
 0x756   : > { %4158 = vst.msk [vmem:[%s8248_s27 + $0x24] sm:$0xf] %vm4148_vm10, %v4638_v51  ;;  %v4050_v26 = vadd.f32 %v8233_v24, %v4025_v23  ;;  %v4026_v46 = vadd.f32 %v4008_v3, %v3691_v15  ;;  %v3956_v9 = vrot.slane %v3927_v41, 5  ;;  %v5634_v38 = vpop.f32.mrb[209].mxu1  ;;  %v3595_v54 = vpop.f32.mrb[198].mxu0  ;;  %v3660_v3 = vld [vmem:[#allocation16 + $0x470] sm:$0xff] }
 0x757   : > { %v3628_v10 = vsel %vm1684_vm6, %v3620_v48, %v3621_v21  ;;  %v3622_v44 = vrot.slane %v3595_v54, 4  ;;  %v3930_v17 = vpop.f32.mrb[210].mxu1  ;;  %v5555_v32 = vpop.f32.mrb[199].mxu0  ;;  %v3995_v54 = vld [vmem:[#allocation16 + $0x500] sm:$0xff] }
 0x758   : > { %v4068_v61 = vmax.f32 %v4050_v26, 0.0  ;;  %v4051_v39 = vadd.f32 %v8233_v24, %v4026_v46  ;;  %v3674_v57 = vmul.f32 %v3656_v55, %v3628_v10  ;;  %v3963_v5 = vsel %vm2020_vm7, %v3955_v1, %v3956_v9  ;;  %v5635_v30 = vpop.f32.mrb[211].mxu1  ;;  %v3994_v26 = vld [vmem:[#allocation16 + $0x4f8] sm:$0xff] }
 0x759   : > { %v4009_v29 = vmul.f32 %v3991_v31, %v3963_v5  ;;  %v3627_v27 = vsel %vm1684_vm6, %v3621_v21, %v3622_v44  ;;  %v3957_v49 = vrot.slane %v3930_v17, 5 }
 0x75a   : > { %v4639_v53 = vpack.c.bf16 %v4068_v61, %v4068_v61  ;;  %v4069_v47 = vmax.f32 %v4051_v39, 0.0  ;;  %v3692_v63 = vadd.f32 %v3674_v57, %v8186_v56  ;;  %v3675_v7 = vmul.f32 %v3657_v52, %v3627_v27 }
 0x75b   : > { %v3962_v33 = vsel %vm2020_vm7, %v3956_v9, %v3957_v49 }
 0x75c   : > { %4159 = vst.msk [vmem:[%s8248_s27 + $0x28] sm:$0xf] %vm4148_vm10, %v4639_v53  ;;  %v4640_v50 = vpack.c.bf16 %v4069_v47, %v4069_v47  ;;  %v4027_v48 = vadd.f32 %v4009_v29, %v3692_v63  ;;  %v3693_v40 = vadd.f32 %v3675_v7, %v8189_v35  ;;  %v4010_v34 = vmul.f32 %v3992_v58, %v3962_v33  ;;  %v3600_v20 = vpop.f32.mrb[200].mxu0  ;;  %v3659_v35 = vld [vmem:[#allocation16 + $0x468] sm:$0xff] }
 0x75d   : > { %v3623_v13 = vrot.slane %v3600_v20, 4  ;;  %v3935_v28 = vpop.f32.mrb[212].mxu1  ;;  %v5558_v4 = vpop.f32.mrb[201].mxu0 }
 0x75e   : > { %4160 = vst.msk [vmem:[%s8248_s27 + $0x2c] sm:$0xf] %vm4148_vm10, %v4640_v50  ;;  %v4052_v56 = vadd.f32 %v8233_v24, %v4027_v48  ;;  %v4028_v45 = vadd.f32 %v4010_v34, %v3693_v40  ;;  %v3958_v60 = vrot.slane %v3935_v28, 5  ;;  %v5638_v1 = vpop.f32.mrb[213].mxu1  ;;  %v3603_v8 = vpop.f32.mrb[202].mxu0 }
 0x75f   : > { %v3626_v62 = vsel %vm1684_vm6, %v3622_v44, %v3623_v13  ;;  %v3624_v14 = vrot.slane %v3603_v8, 4  ;;  %v3938_v59 = vpop.f32.mrb[214].mxu1  ;;  %v5559_v16 = vpop.f32.mrb[203].mxu0 }
 0x760   : > { %v4070_v42 = vmax.f32 %v4052_v56, 0.0  ;;  %v4053_v51 = vadd.f32 %v8233_v24, %v4028_v45  ;;  %v3676_v23 = vmul.f32 %v3658_v11, %v3626_v62  ;;  %v3961_v15 = vsel %vm2020_vm7, %v3957_v49, %v3958_v60  ;;  %v5639_v0 = vpop.f32.mrb[215].mxu1 }
 0x761   : > { %v4011_v21 = vmul.f32 %v3993_v22, %v3961_v15  ;;  %v3625_v55 = vsel %vm1684_vm6, %v3623_v13, %v3624_v14  ;;  %v3642_v41 = vsel %vm1684_vm6, %v3624_v14, %v3607_v37  ;;  %v3959_v18 = vrot.slane %v3938_v59, 5 }
 0x762   : > { %v4641_v46 = vpack.c.bf16 %v4070_v42, %v4070_v42  ;;  %v4071_v9 = vmax.f32 %v4053_v51, 0.0  ;;  %v3694_v31 = vadd.f32 %v3676_v23, %v8209_v19  ;;  %v3677_v38 = vmul.f32 %v3659_v35, %v3625_v55 }
 0x763   : > { %v3678_v10 = vmul.f32 %v3660_v3, %v3642_v41  ;;  %v3960_v44 = vsel %vm2020_vm7, %v3958_v60, %v3959_v18  ;;  %v3977_v43 = vsel %vm2020_vm7, %v3959_v18, %v3942_v12 }
 0x764   : > { %4161 = vst.msk [vmem:[%s8248_s27 + $0x30] sm:$0xf] %vm4148_vm10, %v4641_v46  ;;  %v4642_v37 = vpack.c.bf16 %v4071_v9, %v4071_v9  ;;  %v4029_v52 = vadd.f32 %v4011_v21, %v3694_v31  ;;  %v3695_v17 = vadd.f32 %v3677_v38, %v8215_v6  ;;  %v4012_v19 = vmul.f32 %v3994_v26, %v3960_v44 }
 0x765   : > { %v3696_v32 = vadd.f32 %v3678_v10, %v8217_v25  ;;  %v4013_v61 = vmul.f32 %v3995_v54, %v3977_v43 }
 0x766   : > { %4162 = vst.msk [vmem:[%s8248_s27 + $0x34] sm:$0xf] %vm4148_vm10, %v4642_v37  ;;  %v4054_v39 = vadd.f32 %v8233_v24, %v4029_v52  ;;  %v4030_v36 = vadd.f32 %v4012_v19, %v3695_v17 }
 0x767   : > { %v4031_v2 = vadd.f32 %v4013_v61, %v3696_v32 }
 0x768   : > { %v4072_v12 = vmax.f32 %v4054_v39, 0.0  ;;  %v4055_v57 = vadd.f32 %v8233_v24, %v4030_v36 }
 0x769   : > { %v4056_v6 = vadd.f32 %v8233_v24, %v4031_v2 }
 0x76a   : > { %v4643_v5 = vpack.c.bf16 %v4072_v12, %v4072_v12  ;;  %v4073_v30 = vmax.f32 %v4055_v57, 0.0 }
 0x76b   : > { %v4074_v25 = vmax.f32 %v4056_v6, 0.0 }
 0x76c   : > { %4163 = vst.msk [vmem:[%s8248_s27 + $0x38] sm:$0xf] %vm4148_vm10, %v4643_v5  ;;  %v4644_v29 = vpack.c.bf16 %v4073_v30, %v4073_v30 }
 0x76d   : > { %v4645_v27 = vpack.c.bf16 %v4074_v25, %v4074_v25 }
 0x76e   : > { %4164 = vst.msk [vmem:[%s8248_s27 + $0x3c] sm:$0xf] %vm4148_vm10, %v4644_v29 }
 0x76f   : > { %4165 = vst.msk [vmem:[%s8248_s27 + $0x40] sm:$0xf] %vm4148_vm10, %v4645_v27 }
 0x770   : > { %6458 = shalt.err (!%p6455_p3)
}
 0x771   : > { %s6459_s4 = scalar_lea.hbm %s8383_s23, 1152  ;;  %s6463_s17 = scalar_lea.hbm %s8490_s26, 2304 }
 0x772   : > { %p6460_p0 = scmp.ne.s32.totalorder %s8383_s23, %s6459_s4  ;;  %p6464_p7 = scmp.lt.u32.totalorder %s8383_s23, %s8490_s26 }
 0x773   : > { %p6465_p10 = scmp.lt.u32.totalorder %s6463_s17, %s6459_s4  ;;  %p6467_p11 = scmp.lt.u32.totalorder %s6459_s4, %s8383_s23 }
 0x774   : > { %p6461_p5 = pnand %p6460_p0, %p8491_p12 }
 0x775   : > { %p6466_p1 = por %p6465_p10, %p6464_p7 }
 0x776   : > { %p6462_p2 = pneg %p6461_p5 }
 0x777   : > { %p6468_p13 = por %p6467_p11, %p6466_p1 }
 0x779   : > { %p6469_p8 = pnand %p6468_p13, %p6462_p2 }
 0x77b   : > { %6472 = shalt.err (!%p6469_p8)
}
 0x77c   : > { %s6551_s29 = smov 64   ;;  %s6552_s11 = smov 4  }
 0x77d   : > { %5970 = dma.vmem_to_hbm [thread:$0]  (%p8491_p12), %s8385_s24, 1152, %s8383_s23, %s4168_s19, %s6551_s29, %s6551_s29, %s6552_s11  }
 0x77e PF: > { %s4196_s25 = sand.u32 1, %s6519_s13   ;;  %p8492_p6 = scmp.ne.s32.totalorder %s8476_s1, 0 }
 0x77f   : > { %p8493_p9 = scmp.ge.s32.totalorder %s6531_s16, 2  ;;  %s4197_s30 = scalar_lea.sflag [#allocation4], %s4196_s25 }
 0x781   : > { %p6005_p4 = pnand %p8493_p9, %p8492_p6 }
 0x783   : > { %6514 = dma.done.wait (!%p6005_p4), %s4197_s30, 1152  }
 0x784   : > { %6516 = vsyncadd (!%p6005_p4), %s4197_s30, 4294966144  ;;  %p28_p3 = scmp.ge.s32.totalorder %s6855_s21, 4   ;;  %s8494_s13 = smov %s6523_s14 }
 0x785   : > { %s8495_s14 = smov %s6527_s15  ;;  %s8496_s15 = smov %s6867_s20 }
 0x786   : > { %s8497_s16 = smov %s6855_s21  ;;  %30 = sbr.rel (!%p28_p3) target bundleno = 16 (0x10), region = 164 }
 0x78d   :  { %4202 = vsyncpa [#allocation3], 1 }
 0x78e   :  { %4204 = vsyncpa [#allocation3 + $0x1], 1 }
 0x78f   :  { %4205 = vsyncpa [#allocation6], 1 }
 0x790   :  { %4206 = vsyncpa [#allocation9], 1 }
 0x791   :  { %4207 = vsyncpa [#allocation12], 1 }
 0x792   :  { %4208 = vsyncpa [#allocation15], 1 }
 0x793   :  { %4209 = vsyncpa [#allocation18], 1 }
 0x794   :  { %4210 = vsyncpa [#allocation4], 1 }
 0x795   :  { %4212 = vsyncpa [#allocation4 + $0x1], 1 }

</bundles_post_ra>
